<compile_context>
chip_gen: v6e
topology: v6e:2x2x1
jax: 0.10.0
libtpu: 0.0.40
codegen_flags: <defaults>
</compile_context>

<pallas_src>
import jax
import jax.numpy as jnp
from jax.experimental import pallas as pl
from jax.experimental.pallas import tpu as pltpu


# ------------------------------- fused kernel --------------------------------


def _lg_kernel(x_ref, w1_ref, b1_ref, w2_ref, b2_ref, w3_ref, b3_ref,
               wg_ref, bg_ref, out_ref, padl_ref, padg_ref):
    """Fused LModule + GModule (mode='cut') for one batch element.

    x_ref / out_ref : (1, T, H, W, C) blocks.
    w1 (C, M), w2 (9*M, M), w3 (M, C), wg (9*T, T); biases (1, .) (BN folded).
    padl_ref : VMEM scratch (T, H+2, W+2, M)  -- LModule 3x3 zero padding.
    padg_ref : VMEM scratch (H+2, W+2, T)     -- GModule 3x3 zero padding.
    """
    _, T, H, W, C = x_ref.shape
    M = w1_ref.shape[1]
    HW = H * W
    N = T * HW

    x = x_ref[0].astype(jnp.float32)                             # (T, H, W, C)

    # ---- temporal channel shift (first C//2 channels come from t+1) ----
    x_next = jnp.concatenate(
        [x[1:], jnp.zeros((1, H, W, C), jnp.float32)], axis=0)   # x[t+1], 0-pad
    lane = jax.lax.broadcasted_iota(jnp.int32, (1, 1, 1, C), 3)
    xs = jnp.where(lane < C // 2, x_next, x)                     # (T, H, W, C)

    # ---- conv_short1 (1x1) + BN: one (T*H*W, C) @ (C, M) matmul ----
    f1 = jnp.dot(xs.reshape(N, C), w1_ref[...],
                 preferred_element_type=jnp.float32) + b1_ref[...]   # (N, M)

    # ---- conv_short2 (3x3, pad=1) + BN: im2col -> single K=9*M matmul ----
    # Only the border of the padded scratch needs zeroing; the interior is
    # fully rewritten every step (also correct under core-parallel sharding).
    padl_ref[:, 0:1, :, :] = jnp.zeros((T, 1, W + 2, M), jnp.float32)
    padl_ref[:, H + 1:H + 2, :, :] = jnp.zeros((T, 1, W + 2, M), jnp.float32)
    padl_ref[:, :, 0:1, :] = jnp.zeros((T, H + 2, 1, M), jnp.float32)
    padl_ref[:, :, W + 1:W + 2, :] = jnp.zeros((T, H + 2, 1, M), jnp.float32)
    padl_ref[:, 1:H + 1, 1:W + 1, :] = f1.reshape(T, H, W, M)
    cols = jnp.concatenate(
        [padl_ref[:, dy:dy + H, dx:dx + W, :].reshape(N, M)
         for dy in range(3) for dx in range(3)], axis=-1)        # (N, 9*M)
    f2 = jnp.dot(cols, w2_ref[...],
                 preferred_element_type=jnp.float32) + b2_ref[...]   # (N, M)

    # ---- conv_short3 (1x1) + BN, sigmoid gate, multiply with original x ----
    f3 = jnp.dot(f2, w3_ref[...],
                 preferred_element_type=jnp.float32) + b3_ref[...]   # (N, C)
    x_flat = x.reshape(N, C)
    lm = jax.nn.sigmoid(f3) * x_flat                              # (N, C)

    # ---- GModule (mode='cut'): mean over C -> 3x3 conv over T -> gate ----
    m = jnp.mean(lm, axis=-1, keepdims=True)                      # (N, 1)
    # rows of lm are ordered (t, h, w): regroup to (H*W, T)
    xm = jnp.concatenate([m[t * HW:(t + 1) * HW] for t in range(T)],
                         axis=-1)                                 # (HW, T)

    padg_ref[0:1, :, :] = jnp.zeros((1, W + 2, T), jnp.float32)
    padg_ref[H + 1:H + 2, :, :] = jnp.zeros((1, W + 2, T), jnp.float32)
    padg_ref[:, 0:1, :] = jnp.zeros((H + 2, 1, T), jnp.float32)
    padg_ref[:, W + 1:W + 2, :] = jnp.zeros((H + 2, 1, T), jnp.float32)
    padg_ref[1:H + 1, 1:W + 1, :] = xm.reshape(H, W, T)
    gcols = jnp.concatenate(
        [padg_ref[dy:dy + H, dx:dx + W, :].reshape(HW, T)
         for dy in range(3) for dx in range(3)], axis=-1)         # (HW, 9*T)
    g = jnp.dot(gcols, wg_ref[...],
                preferred_element_type=jnp.float32) + bg_ref[...]     # (HW, T)
    gate = jax.nn.sigmoid(g)

    # broadcast gate over channels; rows of lm are ordered (t, h, w)
    gate_col = jnp.concatenate([gate[:, t:t + 1] for t in range(T)],
                               axis=0)                            # (N, 1)
    out = gate_col * lm                                           # (N, C)
    out_ref[0] = out.reshape(T, H, W, C).astype(out_ref.dtype)


# ----------------------------- pallas_call wrapper ----------------------------


def lgmodule_pallas(x_bthwc, w1, b1, w2c, b2, w3, b3, wgc, bg):
    B, T, H, W, C = x_bthwc.shape
    M = w1.shape[1]

    def bcast_spec(shape):
        nd = len(shape)
        return pl.BlockSpec(shape, lambda b, _nd=nd: (0,) * _nd)

    return pl.pallas_call(
        _lg_kernel,
        out_shape=jax.ShapeDtypeStruct((B, T, H, W, C), jnp.float32),
        grid=(B,),
        in_specs=[
            pl.BlockSpec((1, T, H, W, C), lambda b: (b, 0, 0, 0, 0)),
            bcast_spec((C, M)), bcast_spec((1, M)),
            bcast_spec((9 * M, M)), bcast_spec((1, M)),
            bcast_spec((M, C)), bcast_spec((1, C)),
            bcast_spec((9 * T, T)), bcast_spec((1, T)),
        ],
        out_specs=pl.BlockSpec((1, T, H, W, C), lambda b: (b, 0, 0, 0, 0)),
        scratch_shapes=[
            pltpu.VMEM((T, H + 2, W + 2, M), jnp.float32),
            pltpu.VMEM((H + 2, W + 2, T), jnp.float32),
        ],
        compiler_params=pltpu.CompilerParams(
            dimension_semantics=("parallel",)),
    )(x_bthwc, w1, b1, w2c, b2, w3, b3, wgc, bg)


# ------------------------------- glue / wrapper -------------------------------


def _w1x1_to_kernel(w):   # torch (Co, Ci, 1, 1) -> (Ci, Co)
    return jnp.transpose(w[:, :, 0, 0], (1, 0))


def _w3x3_to_im2col(w):   # torch (Co, Ci, 3, 3) -> (9*Ci, Co), rows (ky,kx,ci)
    co, ci = w.shape[0], w.shape[1]
    return jnp.transpose(w, (2, 3, 1, 0)).reshape(9 * ci, co)


def lgmodule_forward(x, params):
    """x: (T, B, C, H, W) float32 (same layout as the PyTorch module)."""
    T, B, C, H, W = x.shape
    x_k = jnp.transpose(x, (1, 0, 3, 4, 2))                       # (B,T,H,W,C)

    w1 = _w1x1_to_kernel(params["w1"]); b1 = params["b1"][None, :]
    w2 = _w3x3_to_im2col(params["w2"]); b2 = params["b2"][None, :]
    w3 = _w1x1_to_kernel(params["w3"]); b3 = params["b3"][None, :]
    wg = _w3x3_to_im2col(params["wg"]); bg = params["bg"][None, :]

    out_k = lgmodule_pallas(x_k, w1, b1, w2, b2, w3, b3, wg, bg)  # (B,T,H,W,C)
    return jnp.transpose(out_k, (1, 0, 4, 2, 3))                  # (T,B,C,H,W)


# ------------------------- deterministic parameters ---------------------------


def _fold_bn(w, b, gamma, beta, mean, var, eps=1e-5):
    s = gamma / jnp.sqrt(var + eps)
    return w * s[:, None, None, None], (b - mean) * s + beta


def init_params(key, C, M, T):
    ks = jax.random.split(key, 20)

    def conv_w(k, co, ci, kh, kw):
        bound = 1.0 / jnp.sqrt(ci * kh * kw)
        return jax.random.uniform(k, (co, ci, kh, kw), jnp.float32, -bound, bound)

    def conv_b(k, co, fan_in):
        bound = 1.0 / jnp.sqrt(fan_in)
        return jax.random.uniform(k, (co,), jnp.float32, -bound, bound)

    def bn(k, c):
        k1, k2, k3, k4 = jax.random.split(k, 4)
        gamma = 1.0 + 0.1 * jax.random.normal(k1, (c,), jnp.float32)
        beta = 0.05 * jax.random.normal(k2, (c,), jnp.float32)
        mean = 0.05 * jax.random.normal(k3, (c,), jnp.float32)
        var = 1.0 + 0.2 * jax.random.uniform(k4, (c,), jnp.float32)
        return gamma, beta, mean, var

    w1 = conv_w(ks[0], M, C, 1, 1); b1 = conv_b(ks[1], M, C * 1 * 1)
    w2 = conv_w(ks[2], M, M, 3, 3); b2 = conv_b(ks[3], M, M * 3 * 3)
    w3 = conv_w(ks[4], C, M, 1, 1); b3 = conv_b(ks[5], C, M * 1 * 1)
    wg = conv_w(ks[6], T, T, 3, 3); bg = conv_b(ks[7], T, T * 3 * 3)

    w1f, b1f = _fold_bn(w1, b1, *bn(ks[8], M))
    w2f, b2f = _fold_bn(w2, b2, *bn(ks[9], M))
    w3f, b3f = _fold_bn(w3, b3, *bn(ks[10], C))
    wgf, bgf = _fold_bn(wg, bg, *bn(ks[11], T))

    return dict(w1=w1f, b1=b1f, w2=w2f, b2=b2f, w3=w3f, b3=b3f, wg=wgf, bg=bgf)


# ------------------------------ pure-JAX reference ----------------------------


def shift_channels_jax(x):
    # out[:-1, :, :C//2] = x[1:, :, :C//2]; out[:, :, C//2:] = x[:, :, C//2:]
    C = x.shape[2]
    half = C // 2
    first = jnp.concatenate(
        [x[1:, :, :half], jnp.zeros_like(x[:1, :, :half])], axis=0)
    return jnp.concatenate([first, x[:, :, half:]], axis=2)


def _conv2d_nchw(x, w, b, pad):
    y = jax.lax.conv_general_dilated(
        x, w, window_strides=(1, 1), padding=[(pad, pad), (pad, pad)],
        dimension_numbers=("NCHW", "OIHW", "NCHW"))
    return y + b[None, :, None, None]


def lg_reference(x, p):
    T, B, C, H, W = x.shape
    xs = shift_channels_jax(x)
    f = xs.reshape(T * B, C, H, W)
    f = _conv2d_nchw(f, p["w1"], p["b1"], 0)
    f = _conv2d_nchw(f, p["w2"], p["b2"], 1)
    f = _conv2d_nchw(f, p["w3"], p["b3"], 0)
    lm = jax.nn.sigmoid(f).reshape(T, B, C, H, W) * x

    g = jnp.mean(lm, axis=2)                      # (T, B, H, W)
    g = jnp.transpose(g, (1, 0, 2, 3))            # (B, T, H, W)
    g = _conv2d_nchw(g, p["wg"], p["bg"], 1)
    g = jnp.transpose(g, (1, 0, 2, 3))            # (T, B, H, W)
    gate = jax.nn.sigmoid(g)[:, :, None]          # (T, B, 1, H, W)
    return gate * lm


# ------------------------------------ main ------------------------------------

if __name__ == "__main__":
    T, B, C, H, W = 4, 2, 8, 8, 8       # time, batch, in_channels, spatial
    M = 16                              # mid_channels

    key = jax.random.PRNGKey(0)
    kx, kp = jax.random.split(key)
    x = jax.random.normal(kx, (T, B, C, H, W), jnp.float32)
    params = init_params(kp, C, M, T)

    fwd = jax.jit(lgmodule_forward)
    out = jax.block_until_ready(fwd(x, params))

    ref = jax.block_until_ready(lg_reference(x, params))
    assert out.shape == (T, B, C, H, W)
    max_err = float(jnp.max(jnp.abs(out - ref)))
    if max_err > 1e-3:
        raise AssertionError(f"Pallas output mismatch vs reference: {max_err}")

    print("KERNEL_OK")
</pallas_src>

<mosaic_0001>
module attributes {stable_mosaic.version = 11 : i64} {
  func.func @_lg_kernel(%arg0: i32, %arg1: memref<1x4x8x8x8xf32, #tpu.memory_space<vmem>>, %arg2: memref<8x16xf32, #tpu.memory_space<vmem>>, %arg3: memref<1x16xf32, #tpu.memory_space<vmem>>, %arg4: memref<144x16xf32, #tpu.memory_space<vmem>>, %arg5: memref<1x16xf32, #tpu.memory_space<vmem>>, %arg6: memref<16x8xf32, #tpu.memory_space<vmem>>, %arg7: memref<1x8xf32, #tpu.memory_space<vmem>>, %arg8: memref<36x4xf32, #tpu.memory_space<vmem>>, %arg9: memref<1x4xf32, #tpu.memory_space<vmem>>, %arg10: memref<1x4x8x8x8xf32, #tpu.memory_space<vmem>>, %arg11: memref<4x10x10x16xf32, #tpu.memory_space<vmem>>, %arg12: memref<10x10x4xf32, #tpu.memory_space<vmem>>) attributes {dimension_semantics = [#tpu.dimension_semantics<parallel>], iteration_bounds = array<i64: 2>, scalar_prefetch = 0 : i64, scratch_operands = 2 : i64, tpu.core_type = #tpu.core_type<tc>, window_params = [{transform_indices = @transform_0, window_bounds = array<i64: 1, 4, 8, 8, 8>}, {pipeline_mode = #tpu.pipeline_mode<synchronous>, transform_indices = @transform_1, window_bounds = array<i64: 8, 16>}, {pipeline_mode = #tpu.pipeline_mode<synchronous>, transform_indices = @transform_2, window_bounds = array<i64: 1, 16>}, {pipeline_mode = #tpu.pipeline_mode<synchronous>, transform_indices = @transform_3, window_bounds = array<i64: 144, 16>}, {pipeline_mode = #tpu.pipeline_mode<synchronous>, transform_indices = @transform_4, window_bounds = array<i64: 1, 16>}, {pipeline_mode = #tpu.pipeline_mode<synchronous>, transform_indices = @transform_5, window_bounds = array<i64: 16, 8>}, {pipeline_mode = #tpu.pipeline_mode<synchronous>, transform_indices = @transform_6, window_bounds = array<i64: 1, 8>}, {pipeline_mode = #tpu.pipeline_mode<synchronous>, transform_indices = @transform_7, window_bounds = array<i64: 36, 4>}, {pipeline_mode = #tpu.pipeline_mode<synchronous>, transform_indices = @transform_8, window_bounds = array<i64: 1, 4>}, {transform_indices = @transform_9, window_bounds = array<i64: 1, 4, 8, 8, 8>}]} {
    %c0 = arith.constant 0 : index
    %c0_0 = arith.constant 0 : index
    %c0_1 = arith.constant 0 : index
    %c0_2 = arith.constant 0 : index
    %c0_3 = arith.constant 0 : index
    %0 = vector.load %arg1[%c0, %c0_0, %c0_1, %c0_2, %c0_3] : memref<1x4x8x8x8xf32, #tpu.memory_space<vmem>>, vector<1x4x8x8x8xf32>
    %1 = vector.shape_cast %0 : vector<1x4x8x8x8xf32> to vector<4x8x8x8xf32>
    %2 = vector.extract_strided_slice %1 {offsets = [1, 0, 0, 0], sizes = [3, 8, 8, 8], strides = [1, 1, 1, 1]} : vector<4x8x8x8xf32> to vector<3x8x8x8xf32>
    %cst = arith.constant 0.000000e+00 : f32
    %3 = vector.broadcast %cst : f32 to vector<1x8x8x8xf32>
    %4 = tpu.concatenate %2, %3 in 0 : vector<3x8x8x8xf32>, vector<1x8x8x8xf32> -> vector<4x8x8x8xf32>
    %5 = tpu.iota {dimensions = array<i32: 3>} : vector<1x1x1x8xi32>
    %c4_i32 = arith.constant 4 : i32
    %6 = vector.broadcast %c4_i32 : i32 to vector<1x1x1x8xi32>
    %7 = arith.cmpi slt, %5, %6 : vector<1x1x1x8xi32>
    %8 = vector.shape_cast %7 : vector<1x1x1x8xi1> to vector<1x1x1x8xi1>
    %9 = vector.broadcast %8 : vector<1x1x1x8xi1> to vector<4x8x8x8xi1>
    %10 = arith.select %9, %4, %1 : vector<4x8x8x8xi1>, vector<4x8x8x8xf32>
    %11 = vector.shape_cast %10 : vector<4x8x8x8xf32> to vector<256x8xf32>
    %c0_4 = arith.constant 0 : index
    %c0_5 = arith.constant 0 : index
    %12 = vector.load %arg2[%c0_4, %c0_5] : memref<8x16xf32, #tpu.memory_space<vmem>>, vector<8x16xf32>
    %cst_6 = arith.constant dense<0.000000e+00> : vector<256x16xf32>
    %13 = tpu.matmul %11, %12, %cst_6 {dimension_numbers = #tpu.dot_dimension_numbers<[1], [0], [0], [1], [0, 0, 1, 1], [], []>} : vector<256x8xf32>, vector<8x16xf32>, vector<256x16xf32> -> vector<256x16xf32>
    %c0_7 = arith.constant 0 : index
    %c0_8 = arith.constant 0 : index
    %14 = vector.load %arg3[%c0_7, %c0_8] : memref<1x16xf32, #tpu.memory_space<vmem>>, vector<1x16xf32>
    %15 = vector.broadcast %14 : vector<1x16xf32> to vector<256x16xf32>
    %16 = arith.addf %13, %15 : vector<256x16xf32>
    %cst_9 = arith.constant 0.000000e+00 : f32
    %17 = vector.broadcast %cst_9 : f32 to vector<4x1x10x16xf32>
    %c0_10 = arith.constant 0 : index
    %c0_11 = arith.constant 0 : index
    %c0_12 = arith.constant 0 : index
    %c0_13 = arith.constant 0 : index
    %18 = vector.load %arg11[%c0_10, %c0_11, %c0_12, %c0_13] : memref<4x10x10x16xf32, #tpu.memory_space<vmem>>, vector<4x1x10x16xf32>
    tpu.vector_store %arg11[%c0_10, %c0_11, %c0_12, %c0_13], %17 {strides = array<i32>} : memref<4x10x10x16xf32, #tpu.memory_space<vmem>>, vector<4x1x10x16xf32>,
    %cst_14 = arith.constant 0.000000e+00 : f32
    %19 = vector.broadcast %cst_14 : f32 to vector<4x1x10x16xf32>
    %c0_15 = arith.constant 0 : index
    %c9 = arith.constant 9 : index
    %c0_16 = arith.constant 0 : index
    %c0_17 = arith.constant 0 : index
    %20 = vector.load %arg11[%c0_15, %c9, %c0_16, %c0_17] : memref<4x10x10x16xf32, #tpu.memory_space<vmem>>, vector<4x1x10x16xf32>
    tpu.vector_store %arg11[%c0_15, %c9, %c0_16, %c0_17], %19 {strides = array<i32>} : memref<4x10x10x16xf32, #tpu.memory_space<vmem>>, vector<4x1x10x16xf32>,
    %cst_18 = arith.constant 0.000000e+00 : f32
    %21 = vector.broadcast %cst_18 : f32 to vector<4x10x1x16xf32>
    %c0_19 = arith.constant 0 : index
    %c0_20 = arith.constant 0 : index
    %c0_21 = arith.constant 0 : index
    %c0_22 = arith.constant 0 : index
    %22 = vector.load %arg11[%c0_19, %c0_20, %c0_21, %c0_22] : memref<4x10x10x16xf32, #tpu.memory_space<vmem>>, vector<4x10x1x16xf32>
    tpu.vector_store %arg11[%c0_19, %c0_20, %c0_21, %c0_22], %21 {strides = array<i32>} : memref<4x10x10x16xf32, #tpu.memory_space<vmem>>, vector<4x10x1x16xf32>,
    %cst_23 = arith.constant 0.000000e+00 : f32
    %23 = vector.broadcast %cst_23 : f32 to vector<4x10x1x16xf32>
    %c0_24 = arith.constant 0 : index
    %c0_25 = arith.constant 0 : index
    %c9_26 = arith.constant 9 : index
    %c0_27 = arith.constant 0 : index
    %24 = vector.load %arg11[%c0_24, %c0_25, %c9_26, %c0_27] : memref<4x10x10x16xf32, #tpu.memory_space<vmem>>, vector<4x10x1x16xf32>
    tpu.vector_store %arg11[%c0_24, %c0_25, %c9_26, %c0_27], %23 {strides = array<i32>} : memref<4x10x10x16xf32, #tpu.memory_space<vmem>>, vector<4x10x1x16xf32>,
    %25 = vector.shape_cast %16 : vector<256x16xf32> to vector<4x8x8x16xf32>
    %c0_28 = arith.constant 0 : index
    %c1 = arith.constant 1 : index
    %c1_29 = arith.constant 1 : index
    %c0_30 = arith.constant 0 : index
    %26 = vector.load %arg11[%c0_28, %c1, %c1_29, %c0_30] : memref<4x10x10x16xf32, #tpu.memory_space<vmem>>, vector<4x8x8x16xf32>
    tpu.vector_store %arg11[%c0_28, %c1, %c1_29, %c0_30], %25 {strides = array<i32>} : memref<4x10x10x16xf32, #tpu.memory_space<vmem>>, vector<4x8x8x16xf32>,
    %c0_31 = arith.constant 0 : index
    %c0_32 = arith.constant 0 : index
    %c0_33 = arith.constant 0 : index
    %c0_34 = arith.constant 0 : index
    %27 = vector.load %arg11[%c0_31, %c0_32, %c0_33, %c0_34] : memref<4x10x10x16xf32, #tpu.memory_space<vmem>>, vector<4x8x8x16xf32>
    %28 = vector.shape_cast %27 : vector<4x8x8x16xf32> to vector<256x16xf32>
    %c0_35 = arith.constant 0 : index
    %c0_36 = arith.constant 0 : index
    %c1_37 = arith.constant 1 : index
    %c0_38 = arith.constant 0 : index
    %29 = vector.load %arg11[%c0_35, %c0_36, %c1_37, %c0_38] : memref<4x10x10x16xf32, #tpu.memory_space<vmem>>, vector<4x8x8x16xf32>
    %30 = vector.shape_cast %29 : vector<4x8x8x16xf32> to vector<256x16xf32>
    %c0_39 = arith.constant 0 : index
    %c0_40 = arith.constant 0 : index
    %c2 = arith.constant 2 : index
    %c0_41 = arith.constant 0 : index
    %31 = vector.load %arg11[%c0_39, %c0_40, %c2, %c0_41] : memref<4x10x10x16xf32, #tpu.memory_space<vmem>>, vector<4x8x8x16xf32>
    %32 = vector.shape_cast %31 : vector<4x8x8x16xf32> to vector<256x16xf32>
    %c0_42 = arith.constant 0 : index
    %c1_43 = arith.constant 1 : index
    %c0_44 = arith.constant 0 : index
    %c0_45 = arith.constant 0 : index
    %33 = vector.load %arg11[%c0_42, %c1_43, %c0_44, %c0_45] : memref<4x10x10x16xf32, #tpu.memory_space<vmem>>, vector<4x8x8x16xf32>
    %34 = vector.shape_cast %33 : vector<4x8x8x16xf32> to vector<256x16xf32>
    %c0_46 = arith.constant 0 : index
    %c1_47 = arith.constant 1 : index
    %c1_48 = arith.constant 1 : index
    %c0_49 = arith.constant 0 : index
    %35 = vector.load %arg11[%c0_46, %c1_47, %c1_48, %c0_49] : memref<4x10x10x16xf32, #tpu.memory_space<vmem>>, vector<4x8x8x16xf32>
    %36 = vector.shape_cast %35 : vector<4x8x8x16xf32> to vector<256x16xf32>
    %c0_50 = arith.constant 0 : index
    %c1_51 = arith.constant 1 : index
    %c2_52 = arith.constant 2 : index
    %c0_53 = arith.constant 0 : index
    %37 = vector.load %arg11[%c0_50, %c1_51, %c2_52, %c0_53] : memref<4x10x10x16xf32, #tpu.memory_space<vmem>>, vector<4x8x8x16xf32>
    %38 = vector.shape_cast %37 : vector<4x8x8x16xf32> to vector<256x16xf32>
    %c0_54 = arith.constant 0 : index
    %c2_55 = arith.constant 2 : index
    %c0_56 = arith.constant 0 : index
    %c0_57 = arith.constant 0 : index
    %39 = vector.load %arg11[%c0_54, %c2_55, %c0_56, %c0_57] : memref<4x10x10x16xf32, #tpu.memory_space<vmem>>, vector<4x8x8x16xf32>
    %40 = vector.shape_cast %39 : vector<4x8x8x16xf32> to vector<256x16xf32>
    %c0_58 = arith.constant 0 : index
    %c2_59 = arith.constant 2 : index
    %c1_60 = arith.constant 1 : index
    %c0_61 = arith.constant 0 : index
    %41 = vector.load %arg11[%c0_58, %c2_59, %c1_60, %c0_61] : memref<4x10x10x16xf32, #tpu.memory_space<vmem>>, vector<4x8x8x16xf32>
    %42 = vector.shape_cast %41 : vector<4x8x8x16xf32> to vector<256x16xf32>
    %c0_62 = arith.constant 0 : index
    %c2_63 = arith.constant 2 : index
    %c2_64 = arith.constant 2 : index
    %c0_65 = arith.constant 0 : index
    %43 = vector.load %arg11[%c0_62, %c2_63, %c2_64, %c0_65] : memref<4x10x10x16xf32, #tpu.memory_space<vmem>>, vector<4x8x8x16xf32>
    %44 = vector.shape_cast %43 : vector<4x8x8x16xf32> to vector<256x16xf32>
    %45 = tpu.concatenate %28, %30, %32, %34, %36, %38, %40, %42, %44 in 1 : vector<256x16xf32>, vector<256x16xf32>, vector<256x16xf32>, vector<256x16xf32>, vector<256x16xf32>, vector<256x16xf32>, vector<256x16xf32>, vector<256x16xf32>, vector<256x16xf32> -> vector<256x144xf32>
    %c0_66 = arith.constant 0 : index
    %c0_67 = arith.constant 0 : index
    %46 = vector.load %arg4[%c0_66, %c0_67] : memref<144x16xf32, #tpu.memory_space<vmem>>, vector<144x16xf32>
    %cst_68 = arith.constant dense<0.000000e+00> : vector<256x16xf32>
    %47 = tpu.matmul %45, %46, %cst_68 {dimension_numbers = #tpu.dot_dimension_numbers<[1], [0], [0], [1], [0, 0, 1, 1], [], []>} : vector<256x144xf32>, vector<144x16xf32>, vector<256x16xf32> -> vector<256x16xf32>
    %c0_69 = arith.constant 0 : index
    %c0_70 = arith.constant 0 : index
    %48 = vector.load %arg5[%c0_69, %c0_70] : memref<1x16xf32, #tpu.memory_space<vmem>>, vector<1x16xf32>
    %49 = vector.broadcast %48 : vector<1x16xf32> to vector<256x16xf32>
    %50 = arith.addf %47, %49 : vector<256x16xf32>
    %c0_71 = arith.constant 0 : index
    %c0_72 = arith.constant 0 : index
    %51 = vector.load %arg6[%c0_71, %c0_72] : memref<16x8xf32, #tpu.memory_space<vmem>>, vector<16x8xf32>
    %cst_73 = arith.constant dense<0.000000e+00> : vector<256x8xf32>
    %52 = tpu.matmul %50, %51, %cst_73 {dimension_numbers = #tpu.dot_dimension_numbers<[1], [0], [0], [1], [0, 0, 1, 1], [], []>} : vector<256x16xf32>, vector<16x8xf32>, vector<256x8xf32> -> vector<256x8xf32>
    %c0_74 = arith.constant 0 : index
    %c0_75 = arith.constant 0 : index
    %53 = vector.load %arg7[%c0_74, %c0_75] : memref<1x8xf32, #tpu.memory_space<vmem>>, vector<1x8xf32>
    %54 = vector.broadcast %53 : vector<1x8xf32> to vector<256x8xf32>
    %55 = arith.addf %52, %54 : vector<256x8xf32>
    %56 = vector.shape_cast %1 : vector<4x8x8x8xf32> to vector<256x8xf32>
    %57 = arith.negf %55 : vector<256x8xf32>
    %58 = math.exp %57 : vector<256x8xf32>
    %cst_76 = arith.constant 1.000000e+00 : f32
    %59 = vector.broadcast %cst_76 : f32 to vector<256x8xf32>
    %60 = arith.addf %59, %58 : vector<256x8xf32>
    %61 = arith.divf %59, %60 : vector<256x8xf32>
    %62 = arith.mulf %61, %56 : vector<256x8xf32>
    %cst_77 = arith.constant dense<0.000000e+00> : vector<256xf32>
    %63 = vector.multi_reduction <add>, %62, %cst_77 [1] : vector<256x8xf32> to vector<256xf32>
    %64 = vector.shape_cast %63 : vector<256xf32> to vector<256x1xf32>
    %cst_78 = arith.constant 8.000000e+00 : f32
    %65 = vector.broadcast %cst_78 : f32 to vector<256x1xf32>
    %66 = arith.divf %64, %65 : vector<256x1xf32>
    %67 = vector.extract_strided_slice %66 {offsets = [0, 0], sizes = [64, 1], strides = [1, 1]} : vector<256x1xf32> to vector<64x1xf32>
    %68 = vector.extract_strided_slice %66 {offsets = [64, 0], sizes = [64, 1], strides = [1, 1]} : vector<256x1xf32> to vector<64x1xf32>
    %69 = vector.extract_strided_slice %66 {offsets = [128, 0], sizes = [64, 1], strides = [1, 1]} : vector<256x1xf32> to vector<64x1xf32>
    %70 = vector.extract_strided_slice %66 {offsets = [192, 0], sizes = [64, 1], strides = [1, 1]} : vector<256x1xf32> to vector<64x1xf32>
    %71 = tpu.concatenate %67, %68, %69, %70 in 1 : vector<64x1xf32>, vector<64x1xf32>, vector<64x1xf32>, vector<64x1xf32> -> vector<64x4xf32>
    %cst_79 = arith.constant 0.000000e+00 : f32
    %72 = vector.broadcast %cst_79 : f32 to vector<1x10x4xf32>
    %c0_80 = arith.constant 0 : index
    %c0_81 = arith.constant 0 : index
    %c0_82 = arith.constant 0 : index
    %73 = vector.load %arg12[%c0_80, %c0_81, %c0_82] : memref<10x10x4xf32, #tpu.memory_space<vmem>>, vector<1x10x4xf32>
    tpu.vector_store %arg12[%c0_80, %c0_81, %c0_82], %72 {strides = array<i32>} : memref<10x10x4xf32, #tpu.memory_space<vmem>>, vector<1x10x4xf32>,
    %cst_83 = arith.constant 0.000000e+00 : f32
    %74 = vector.broadcast %cst_83 : f32 to vector<1x10x4xf32>
    %c9_84 = arith.constant 9 : index
    %c0_85 = arith.constant 0 : index
    %c0_86 = arith.constant 0 : index
    %75 = vector.load %arg12[%c9_84, %c0_85, %c0_86] : memref<10x10x4xf32, #tpu.memory_space<vmem>>, vector<1x10x4xf32>
    tpu.vector_store %arg12[%c9_84, %c0_85, %c0_86], %74 {strides = array<i32>} : memref<10x10x4xf32, #tpu.memory_space<vmem>>, vector<1x10x4xf32>,
    %cst_87 = arith.constant 0.000000e+00 : f32
    %76 = vector.broadcast %cst_87 : f32 to vector<10x1x4xf32>
    %c0_88 = arith.constant 0 : index
    %c0_89 = arith.constant 0 : index
    %c0_90 = arith.constant 0 : index
    %77 = vector.load %arg12[%c0_88, %c0_89, %c0_90] : memref<10x10x4xf32, #tpu.memory_space<vmem>>, vector<10x1x4xf32>
    tpu.vector_store %arg12[%c0_88, %c0_89, %c0_90], %76 {strides = array<i32>} : memref<10x10x4xf32, #tpu.memory_space<vmem>>, vector<10x1x4xf32>,
    %cst_91 = arith.constant 0.000000e+00 : f32
    %78 = vector.broadcast %cst_91 : f32 to vector<10x1x4xf32>
    %c0_92 = arith.constant 0 : index
    %c9_93 = arith.constant 9 : index
    %c0_94 = arith.constant 0 : index
    %79 = vector.load %arg12[%c0_92, %c9_93, %c0_94] : memref<10x10x4xf32, #tpu.memory_space<vmem>>, vector<10x1x4xf32>
    tpu.vector_store %arg12[%c0_92, %c9_93, %c0_94], %78 {strides = array<i32>} : memref<10x10x4xf32, #tpu.memory_space<vmem>>, vector<10x1x4xf32>,
    %80 = vector.shape_cast %71 : vector<64x4xf32> to vector<8x8x4xf32>
    %c1_95 = arith.constant 1 : index
    %c1_96 = arith.constant 1 : index
    %c0_97 = arith.constant 0 : index
    %81 = vector.load %arg12[%c1_95, %c1_96, %c0_97] : memref<10x10x4xf32, #tpu.memory_space<vmem>>, vector<8x8x4xf32>
    tpu.vector_store %arg12[%c1_95, %c1_96, %c0_97], %80 {strides = array<i32>} : memref<10x10x4xf32, #tpu.memory_space<vmem>>, vector<8x8x4xf32>,
    %c0_98 = arith.constant 0 : index
    %c0_99 = arith.constant 0 : index
    %c0_100 = arith.constant 0 : index
    %82 = vector.load %arg12[%c0_98, %c0_99, %c0_100] : memref<10x10x4xf32, #tpu.memory_space<vmem>>, vector<8x8x4xf32>
    %83 = vector.shape_cast %82 : vector<8x8x4xf32> to vector<64x4xf32>
    %c0_101 = arith.constant 0 : index
    %c1_102 = arith.constant 1 : index
    %c0_103 = arith.constant 0 : index
    %84 = vector.load %arg12[%c0_101, %c1_102, %c0_103] : memref<10x10x4xf32, #tpu.memory_space<vmem>>, vector<8x8x4xf32>
    %85 = vector.shape_cast %84 : vector<8x8x4xf32> to vector<64x4xf32>
    %c0_104 = arith.constant 0 : index
    %c2_105 = arith.constant 2 : index
    %c0_106 = arith.constant 0 : index
    %86 = vector.load %arg12[%c0_104, %c2_105, %c0_106] : memref<10x10x4xf32, #tpu.memory_space<vmem>>, vector<8x8x4xf32>
    %87 = vector.shape_cast %86 : vector<8x8x4xf32> to vector<64x4xf32>
    %c1_107 = arith.constant 1 : index
    %c0_108 = arith.constant 0 : index
    %c0_109 = arith.constant 0 : index
    %88 = vector.load %arg12[%c1_107, %c0_108, %c0_109] : memref<10x10x4xf32, #tpu.memory_space<vmem>>, vector<8x8x4xf32>
    %89 = vector.shape_cast %88 : vector<8x8x4xf32> to vector<64x4xf32>
    %c1_110 = arith.constant 1 : index
    %c1_111 = arith.constant 1 : index
    %c0_112 = arith.constant 0 : index
    %90 = vector.load %arg12[%c1_110, %c1_111, %c0_112] : memref<10x10x4xf32, #tpu.memory_space<vmem>>, vector<8x8x4xf32>
    %91 = vector.shape_cast %90 : vector<8x8x4xf32> to vector<64x4xf32>
    %c1_113 = arith.constant 1 : index
    %c2_114 = arith.constant 2 : index
    %c0_115 = arith.constant 0 : index
    %92 = vector.load %arg12[%c1_113, %c2_114, %c0_115] : memref<10x10x4xf32, #tpu.memory_space<vmem>>, vector<8x8x4xf32>
    %93 = vector.shape_cast %92 : vector<8x8x4xf32> to vector<64x4xf32>
    %c2_116 = arith.constant 2 : index
    %c0_117 = arith.constant 0 : index
    %c0_118 = arith.constant 0 : index
    %94 = vector.load %arg12[%c2_116, %c0_117, %c0_118] : memref<10x10x4xf32, #tpu.memory_space<vmem>>, vector<8x8x4xf32>
    %95 = vector.shape_cast %94 : vector<8x8x4xf32> to vector<64x4xf32>
    %c2_119 = arith.constant 2 : index
    %c1_120 = arith.constant 1 : index
    %c0_121 = arith.constant 0 : index
    %96 = vector.load %arg12[%c2_119, %c1_120, %c0_121] : memref<10x10x4xf32, #tpu.memory_space<vmem>>, vector<8x8x4xf32>
    %97 = vector.shape_cast %96 : vector<8x8x4xf32> to vector<64x4xf32>
    %c2_122 = arith.constant 2 : index
    %c2_123 = arith.constant 2 : index
    %c0_124 = arith.constant 0 : index
    %98 = vector.load %arg12[%c2_122, %c2_123, %c0_124] : memref<10x10x4xf32, #tpu.memory_space<vmem>>, vector<8x8x4xf32>
    %99 = vector.shape_cast %98 : vector<8x8x4xf32> to vector<64x4xf32>
    %100 = tpu.concatenate %83, %85, %87, %89, %91, %93, %95, %97, %99 in 1 : vector<64x4xf32>, vector<64x4xf32>, vector<64x4xf32>, vector<64x4xf32>, vector<64x4xf32>, vector<64x4xf32>, vector<64x4xf32>, vector<64x4xf32>, vector<64x4xf32> -> vector<64x36xf32>
    %c0_125 = arith.constant 0 : index
    %c0_126 = arith.constant 0 : index
    %101 = vector.load %arg8[%c0_125, %c0_126] : memref<36x4xf32, #tpu.memory_space<vmem>>, vector<36x4xf32>
    %cst_127 = arith.constant dense<0.000000e+00> : vector<64x4xf32>
    %102 = tpu.matmul %100, %101, %cst_127 {dimension_numbers = #tpu.dot_dimension_numbers<[1], [0], [0], [1], [0, 0, 1, 1], [], []>} : vector<64x36xf32>, vector<36x4xf32>, vector<64x4xf32> -> vector<64x4xf32>
    %c0_128 = arith.constant 0 : index
    %c0_129 = arith.constant 0 : index
    %103 = vector.load %arg9[%c0_128, %c0_129] : memref<1x4xf32, #tpu.memory_space<vmem>>, vector<1x4xf32>
    %104 = vector.broadcast %103 : vector<1x4xf32> to vector<64x4xf32>
    %105 = arith.addf %102, %104 : vector<64x4xf32>
    %106 = arith.negf %105 : vector<64x4xf32>
    %107 = math.exp %106 : vector<64x4xf32>
    %cst_130 = arith.constant 1.000000e+00 : f32
    %108 = vector.broadcast %cst_130 : f32 to vector<64x4xf32>
    %109 = arith.addf %108, %107 : vector<64x4xf32>
    %110 = arith.divf %108, %109 : vector<64x4xf32>
    %111 = vector.extract_strided_slice %110 {offsets = [0, 0], sizes = [64, 1], strides = [1, 1]} : vector<64x4xf32> to vector<64x1xf32>
    %112 = vector.extract_strided_slice %110 {offsets = [0, 1], sizes = [64, 1], strides = [1, 1]} : vector<64x4xf32> to vector<64x1xf32>
    %113 = vector.extract_strided_slice %110 {offsets = [0, 2], sizes = [64, 1], strides = [1, 1]} : vector<64x4xf32> to vector<64x1xf32>
    %114 = vector.extract_strided_slice %110 {offsets = [0, 3], sizes = [64, 1], strides = [1, 1]} : vector<64x4xf32> to vector<64x1xf32>
    %115 = tpu.concatenate %111, %112, %113, %114 in 0 : vector<64x1xf32>, vector<64x1xf32>, vector<64x1xf32>, vector<64x1xf32> -> vector<256x1xf32>
    %116 = vector.broadcast %115 : vector<256x1xf32> to vector<256x8xf32>
    %117 = arith.mulf %116, %62 : vector<256x8xf32>
    %118 = vector.shape_cast %117 : vector<256x8xf32> to vector<4x8x8x8xf32>
    %c0_131 = arith.constant 0 : index
    %c0_132 = arith.constant 0 : index
    %c0_133 = arith.constant 0 : index
    %c0_134 = arith.constant 0 : index
    %c0_135 = arith.constant 0 : index
    %119 = vector.load %arg10[%c0_131, %c0_132, %c0_133, %c0_134, %c0_135] : memref<1x4x8x8x8xf32, #tpu.memory_space<vmem>>, vector<1x4x8x8x8xf32>
    %120 = vector.shape_cast %119 : vector<1x4x8x8x8xf32> to vector<4x8x8x8xf32>
    %121 = vector.shape_cast %118 : vector<4x8x8x8xf32> to vector<1x4x8x8x8xf32>
    tpu.vector_store %arg10[%c0_131, %c0_132, %c0_133, %c0_134, %c0_135], %121 {strides = array<i32>} : memref<1x4x8x8x8xf32, #tpu.memory_space<vmem>>, vector<1x4x8x8x8xf32>,
    return
  }
  func.func @transform_0(%arg0: i32) -> (i32, i32, i32, i32, i32) {
    %c0_i32 = arith.constant 0 : i32
    %c0_i32_0 = arith.constant 0 : i32
    %c0_i32_1 = arith.constant 0 : i32
    %c0_i32_2 = arith.constant 0 : i32
    %c0_i32_3 = arith.constant 0 : i32
    return %arg0, %c0_i32, %c0_i32_0, %c0_i32_1, %c0_i32_2 : i32, i32, i32, i32, i32
  }
  func.func @transform_1(%arg0: i32) -> (i32, i32) {
    %c0_i32 = arith.constant 0 : i32
    %c0_i32_0 = arith.constant 0 : i32
    %c0_i32_1 = arith.constant 0 : i32
    return %c0_i32, %c0_i32_0 : i32, i32
  }
  func.func @transform_2(%arg0: i32) -> (i32, i32) {
    %c0_i32 = arith.constant 0 : i32
    %c0_i32_0 = arith.constant 0 : i32
    %c0_i32_1 = arith.constant 0 : i32
    return %c0_i32, %c0_i32_0 : i32, i32
  }
  func.func @transform_3(%arg0: i32) -> (i32, i32) {
    %c0_i32 = arith.constant 0 : i32
    %c0_i32_0 = arith.constant 0 : i32
    %c0_i32_1 = arith.constant 0 : i32
    return %c0_i32, %c0_i32_0 : i32, i32
  }
  func.func @transform_4(%arg0: i32) -> (i32, i32) {
    %c0_i32 = arith.constant 0 : i32
    %c0_i32_0 = arith.constant 0 : i32
    %c0_i32_1 = arith.constant 0 : i32
    return %c0_i32, %c0_i32_0 : i32, i32
  }
  func.func @transform_5(%arg0: i32) -> (i32, i32) {
    %c0_i32 = arith.constant 0 : i32
    %c0_i32_0 = arith.constant 0 : i32
    %c0_i32_1 = arith.constant 0 : i32
    return %c0_i32, %c0_i32_0 : i32, i32
  }
  func.func @transform_6(%arg0: i32) -> (i32, i32) {
    %c0_i32 = arith.constant 0 : i32
    %c0_i32_0 = arith.constant 0 : i32
    %c0_i32_1 = arith.constant 0 : i32
    return %c0_i32, %c0_i32_0 : i32, i32
  }
  func.func @transform_7(%arg0: i32) -> (i32, i32) {
    %c0_i32 = arith.constant 0 : i32
    %c0_i32_0 = arith.constant 0 : i32
    %c0_i32_1 = arith.constant 0 : i32
    return %c0_i32, %c0_i32_0 : i32, i32
  }
  func.func @transform_8(%arg0: i32) -> (i32, i32) {
    %c0_i32 = arith.constant 0 : i32
    %c0_i32_0 = arith.constant 0 : i32
    %c0_i32_1 = arith.constant 0 : i32
    return %c0_i32, %c0_i32_0 : i32, i32
  }
  func.func @transform_9(%arg0: i32) -> (i32, i32, i32, i32, i32) {
    %c0_i32 = arith.constant 0 : i32
    %c0_i32_0 = arith.constant 0 : i32
    %c0_i32_1 = arith.constant 0 : i32
    %c0_i32_2 = arith.constant 0 : i32
    %c0_i32_3 = arith.constant 0 : i32
    return %arg0, %c0_i32, %c0_i32_0, %c0_i32_1, %c0_i32_2 : i32, i32, i32, i32, i32
  }
}

</mosaic_0001>

<bundles_post_ra>
// kernel: lgmodule_forward.1
= control target key start
LH: loop header
LB: loop body
LE: loop exit
PB: predicated region body
PF: predicated region fallthrough
CT: control target
= control target key end

     0   :  { %s5510_s30 = smov 0   ;;  %s7422_s0 = inlined_call_operand.vmem [shape: f32[2,4,8,8,8], index: 0, kind: input, shape index: {}]   ;;  %s7423_s1 = inlined_call_operand.vmem [shape: f32[8,16], index: 1, kind: input, shape index: {}]   ;;  %s7424_s2 = inlined_call_operand.vmem [shape: f32[1,16], index: 2, kind: input, shape index: {}]   ;;  %s7425_s3 = inlined_call_operand.vmem [shape: f32[144,16], index: 3, kind: input, shape index: {}]   ;;  %s7426_s4 = inlined_call_operand.vmem [shape: f32[1,16], index: 4, kind: input, shape index: {}]   ;;  %s7427_s5 = inlined_call_operand.vmem [shape: f32[16,8], index: 5, kind: input, shape index: {}]   ;;  %s7428_s6 = inlined_call_operand.vmem [shape: f32[1,8], index: 6, kind: input, shape index: {}]   ;;  %s7429_s7 = inlined_call_operand.vmem [shape: f32[36,4], index: 7, kind: input, shape index: {}]   ;;  %s7430_s8 = inlined_call_operand.vmem [shape: f32[1,4], index: 8, kind: input, shape index: {}]   ;;  %s7431_s9 = inlined_call_operand.vmem [shape: f32[2,4,8,8,8], index: 9, kind: output, shape index: {}]  }
   0x1 LB: > { %s4267_s10 = sadd.s32 4294967295, %s5440_s30   ;;  %p4271_p0 = scmp.ge.s32.totalorder %s5440_s30, 1  ;;  %s5440_s30 = sphi %s5510_s30, %s19_s30  }
   0x2   : > { %p287_p1 = scmp.lt.s32.totalorder %s5440_s30, 3 }
   0x4   : > { %p288_p2 = pnand %p4271_p0, %p287_p1 }
   0x6   : > { %291 = sbr.rel (%p288_p2) target bundleno = 1844 (0x734), region = 56 }
   0xb   : > { %v402_v0 = vld [vmem:[%s7423_s1] sm:$0xff]  ;;  %p323_p3 = scmp.lt.s32.totalorder %s4267_s10, 1  ;;  %v365_v1 = vlaneseq  ;;  %vm410_vm1 = vcmask 64512   ;;  %vm732_vm2 = vcmask 130048   ;;  %vm751_vm3 = vcmask 122880   ;;  %s5443_s26 = smov 48  }
   0xc   : > { %4509 = vmatprep.subr.mxu0 %v402_v0  ;;  %vm734_vm4 = vcmask 123904   ;;  %s5444_s27 = smov 16   ;;  %s5445_s14 = smov 64   ;;  %vm2082_vm5 = vcmask 261120   ;;  %vm2115_vm6 = vcmask 392192   ;;  %vm2148_vm7 = vcmask 523264  }
   0xd   : > { %4510 = vmatpush3.msra.mxu0 %v402_v0  ;;  %s7454_s10 = smov (!%p323_p3, %s4267_s10), 1  ;;  %v5523_v2 = vand.u32 127, %v365_v1  ;;  %v5442_v1 = vmov 0.0   ;;  %s5446_s15 = smov 32   ;;  %vm2181_vm8 = vcmask 654336   ;;  %vm2214_vm9 = vcmask 785408  }
   0xe   : > { %s4427_s13 = sshll.u32 %s7454_s10, 8  ;;  %794 = vst.msk [vmem:[#allocation2 + $0x29] sm:$0x1] %vm751_vm3, %v5442_v1  ;;  %753 = vst.msk [vmem:[#allocation2 + $0x10] sm:$0x1] %vm751_vm3, %v5442_v1  ;;  %4633 = vmatprep.subr.mxu1 %v5442_v1  ;;  %2401 = vmatprep.subr.mxu0 %v5442_v1  ;;  %s5447_s21 = smov 96  }
   0xf   : > { %vm367_vm0 = vcmp.lt.s32.totalorder %v5523_v2, 4  ;;  %s5532_s16 = scalar_lea.vmem %s7422_s0, %s4427_s13  ;;  %733 = vst.msk [vmem:[#allocation2] sm:$0xff] %vm732_vm2, %v5442_v1  ;;  %736 = vst.msk [vmem:[#allocation2 + $0xa0] sm:$0xff] %vm732_vm2, %v5442_v1  ;;  %v2295_v2 = vld [vmem:[%s7425_s3 + $0x78] sm:$0xff]  ;;  %s5448_s22 = smov 80   ;;  %vm2247_vm10 = vcmask 916480  }
  0x10   : > { %v333_v3 = vld [vmem:[%s5532_s16] sm:$0xff]  ;;  %v334_v5 = vld [vmem:[%s5532_s16 + $0x8] sm:$0xff]  ;;  %v335_v8 = vld [vmem:[%s5532_s16 + $0x10] sm:$0xff]  ;;  %738 = vst.msk [vmem:[#allocation2 + $0x140] sm:$0xff] %vm732_vm2, %v5442_v1  ;;  %4651 = vmatpush1.msra.mxu1 %v2295_v2  ;;  %s5449_s29 = smov 112   ;;  %vm3338_vm11 = vcmask 25600  }
  0x11   : > { %v341_v4 = vld [vmem:[%s5532_s16 + $0x40] sm:$0xff]  ;;  %v342_v7 = vld [vmem:[%s5532_s16 + $0x48] sm:$0xff]  ;;  %v343_v9 = vld [vmem:[%s5532_s16 + $0x50] sm:$0xff]  ;;  %740 = vst.msk [vmem:[#allocation2 + $0x1e0] sm:$0xff] %vm732_vm2, %v5442_v1  ;;  %4634 = vmatprep.subr.mxu1 %v5442_v1  ;;  %vm3336_vm12 = vcmask 31744   ;;  %vm3343_vm13 = vcmask 24576  }
  0x12   : > { %v370_v6 = vsel %vm367_vm0, %v341_v4, %v333_v3  ;;  %v371_v10 = vsel %vm367_vm0, %v342_v7, %v334_v5  ;;  %v372_v11 = vsel %vm367_vm0, %v343_v9, %v335_v8  ;;  %v336_v12 = vld [vmem:[%s5532_s16 + $0x18] sm:$0xff]  ;;  %v337_v14 = vld [vmem:[%s5532_s16 + $0x20] sm:$0xff]  ;;  %v338_v18 = vld [vmem:[%s5532_s16 + $0x28] sm:$0xff]  ;;  %743 = vst.msk [vmem:[#allocation2 + $0x90] sm:$0xff] %vm732_vm2, %v5442_v1  ;;  %s5450_s19 = smov 8   ;;  %s5451_s20 = smov 4  }
  0x13   : > { %4511 = vmatprep.mubr.msk.f32.mxu0 %vm410_vm1, %v370_v6  ;;  %v344_v13 = vld [vmem:[%s5532_s16 + $0x58] sm:$0xff]  ;;  %v345_v15 = vld [vmem:[%s5532_s16 + $0x60] sm:$0xff]  ;;  %v346_v19 = vld [vmem:[%s5532_s16 + $0x68] sm:$0xff]  ;;  %745 = vst.msk [vmem:[#allocation2 + $0x130] sm:$0xff] %vm732_vm2, %v5442_v1  ;;  %vm3309_vm14 = vcmask 7168   ;;  %vm3318_vm15 = vcmask 15360  }
  0x14   : > { %4512 = vmatmul.mubr.msk.f32.vlgmr.msra.gmra.mxu0 %vm410_vm1, %v371_v10  ;;  %v373_v16 = vsel %vm367_vm0, %v344_v13, %v336_v12  ;;  %v374_v17 = vsel %vm367_vm0, %v345_v15, %v337_v14  ;;  %v339_v20 = vld [vmem:[%s5532_s16 + $0x30] sm:$0xff]  ;;  %v375_v22 = vsel %vm367_vm0, %v346_v19, %v338_v18  ;;  %v340_v24 = vld [vmem:[%s5532_s16 + $0x38] sm:$0xff]  ;;  %v349_v26 = vld [vmem:[%s5532_s16 + $0x80] sm:$0xff]  ;;  %747 = vst.msk [vmem:[#allocation2 + $0x1d0] sm:$0xff] %vm732_vm2, %v5442_v1  ;;  %s5455_s25 = smov 20  }
  0x15   : > { %4514 = vmatprep.mubr.msk.f32.mxu0 %vm410_vm1, %v372_v11  ;;  %v347_v21 = vld [vmem:[%s5532_s16 + $0x70] sm:$0xff]  ;;  %v348_v25 = vld [vmem:[%s5532_s16 + $0x78] sm:$0xff]  ;;  %v378_v28 = vsel %vm367_vm0, %v349_v26, %v341_v4  ;;  %v350_v29 = vld [vmem:[%s5532_s16 + $0x88] sm:$0xff]  ;;  %749 = vst.msk [vmem:[#allocation2 + $0x270] sm:$0xff] %vm732_vm2, %v5442_v1  ;;  %2402 = vmatpush1.msra.mxu0 %v2295_v2 }
  0x16   : > { %v376_v23 = vsel %vm367_vm0, %v347_v21, %v339_v20  ;;  %v377_v27 = vsel %vm367_vm0, %v348_v25, %v340_v24  ;;  %v351_v30 = vld [vmem:[%s5532_s16 + $0x90] sm:$0xff]  ;;  %v379_v31 = vsel %vm367_vm0, %v350_v29, %v342_v7  ;;  %v352_v33 = vld [vmem:[%s5532_s16 + $0x98] sm:$0xff]  ;;  %v353_v34 = vld [vmem:[%s5532_s16 + $0xa0] sm:$0xff]  ;;  %754 = vst.msk [vmem:[#allocation2 + $0x20] sm:$0x1] %vm751_vm3, %v5442_v1  ;;  %2403 = vmatprep.subr.mxu0 %v5442_v1 }
  0x17   : > { %v380_v32 = vsel %vm367_vm0, %v351_v30, %v343_v9  ;;  %v381_v35 = vsel %vm367_vm0, %v352_v33, %v344_v13  ;;  %v382_v36 = vsel %vm367_vm0, %v353_v34, %v345_v15  ;;  %v354_v37 = vld [vmem:[%s5532_s16 + $0xa8] sm:$0xff]  ;;  %v355_v38 = vld [vmem:[%s5532_s16 + $0xb0] sm:$0xff]  ;;  %v356_v41 = vld [vmem:[%s5532_s16 + $0xb8] sm:$0xff]  ;;  %755 = vst.msk [vmem:[#allocation2 + $0x30] sm:$0x1] %vm751_vm3, %v5442_v1 }
  0x18   : > { %4515 = vmatmul.mubr.msk.f32.gmra.mxu0 %vm410_vm1, %v373_v16  ;;  %v383_v39 = vsel %vm367_vm0, %v354_v37, %v346_v19  ;;  %v384_v40 = vsel %vm367_vm0, %v355_v38, %v347_v21  ;;  %v357_v42 = vld [vmem:[%s5532_s16 + $0xc0] sm:$0xff]  ;;  %v385_v43 = vsel %vm367_vm0, %v356_v41, %v348_v25  ;;  %v358_v45 = vld [vmem:[%s5532_s16 + $0xc8] sm:$0xff]  ;;  %v359_v46 = vld [vmem:[%s5532_s16 + $0xd0] sm:$0xff]  ;;  %756 = vst.msk [vmem:[#allocation2 + $0x40] sm:$0x1] %vm751_vm3, %v5442_v1 }
  0x19   : > { %4517 = vmatprep.mubr.msk.f32.mxu0 %vm410_vm1, %v374_v17  ;;  %v386_v44 = vsel %vm367_vm0, %v357_v42, %v349_v26  ;;  %v387_v47 = vsel %vm367_vm0, %v358_v45, %v350_v29  ;;  %v388_v48 = vsel %vm367_vm0, %v359_v46, %v351_v30  ;;  %v360_v49 = vld [vmem:[%s5532_s16 + $0xd8] sm:$0xff]  ;;  %v361_v50 = vld [vmem:[%s5532_s16 + $0xe0] sm:$0xff]  ;;  %v362_v53 = vld [vmem:[%s5532_s16 + $0xe8] sm:$0xff]  ;;  %v394_v59 = vsel %vm367_vm0, 0.0, %v357_v42  ;;  %757 = vst.msk [vmem:[#allocation2 + $0x50] sm:$0x1] %vm751_vm3, %v5442_v1 }
  0x1a   : > { %v389_v51 = vsel %vm367_vm0, %v360_v49, %v352_v33  ;;  %v390_v52 = vsel %vm367_vm0, %v361_v50, %v353_v34  ;;  %v5626_v54 = vld [vmem:[%s5532_s16 + $0xf0] sm:$0xff]  ;;  %v391_v55 = vsel %vm367_vm0, %v362_v53, %v354_v37  ;;  %v5636_v57 = vld [vmem:[%s5532_s16 + $0xf8] sm:$0xff]  ;;  %v395_v60 = vsel %vm367_vm0, 0.0, %v358_v45  ;;  %758 = vst.msk [vmem:[#allocation2 + $0x60] sm:$0x1] %vm751_vm3, %v5442_v1  ;;  %v2293_v6 = vld [vmem:[%s7425_s3 + $0x68] sm:$0xff] }
  0x1b   : > { %v392_v56 = vsel %vm367_vm0, %v5626_v54, %v355_v38  ;;  %v393_v58 = vsel %vm367_vm0, %v5636_v57, %v356_v41  ;;  %v396_v61 = vsel %vm367_vm0, 0.0, %v359_v46  ;;  %v397_v62 = vsel %vm367_vm0, 0.0, %v360_v49  ;;  %759 = vst.msk [vmem:[#allocation2 + $0x70] sm:$0x1] %vm751_vm3, %v5442_v1  ;;  %760 = vst.msk [vmem:[#allocation2 + $0x80] sm:$0x1] %vm751_vm3, %v5442_v1 }
  0x1c   : > { %4518 = vmatmul.mubr.msk.f32.gmra.mxu0 %vm410_vm1, %v375_v22  ;;  %v398_v63 = vsel %vm367_vm0, 0.0, %v361_v50  ;;  %v399_v0 = vsel %vm367_vm0, 0.0, %v362_v53  ;;  %763 = vst.msk [vmem:[#allocation2 + $0xb0] sm:$0x1] %vm751_vm3, %v5442_v1  ;;  %764 = vst.msk [vmem:[#allocation2 + $0xc0] sm:$0x1] %vm751_vm3, %v5442_v1 }
  0x1d   : > { %4520 = vmatprep.mubr.msk.f32.mxu0 %vm410_vm1, %v376_v23  ;;  %765 = vst.msk [vmem:[#allocation2 + $0xd0] sm:$0x1] %vm751_vm3, %v5442_v1  ;;  %766 = vst.msk [vmem:[#allocation2 + $0xe0] sm:$0x1] %vm751_vm3, %v5442_v1  ;;  %v400_v3 = vsel %vm367_vm0, 0.0, %v5626_v54  ;;  %v401_v4 = vsel %vm367_vm0, 0.0, %v5636_v57 }
  0x1e   : > { %767 = vst.msk [vmem:[#allocation2 + $0xf0] sm:$0x1] %vm751_vm3, %v5442_v1  ;;  %768 = vst.msk [vmem:[#allocation2 + $0x100] sm:$0x1] %vm751_vm3, %v5442_v1  ;;  %v2294_v5 = vld [vmem:[%s7425_s3 + $0x70] sm:$0xff]  ;;  %v2292_v8 = vld [vmem:[%s7425_s3 + $0x60] sm:$0xff] }
  0x1f   : > { %769 = vst.msk [vmem:[#allocation2 + $0x110] sm:$0x1] %vm751_vm3, %v5442_v1  ;;  %770 = vst.msk [vmem:[#allocation2 + $0x120] sm:$0x1] %vm751_vm3, %v5442_v1  ;;  %4652 = vmatpush1.msra.mxu1 %v2294_v5  ;;  %2404 = vmatpush1.msra.mxu0 %v2294_v5  ;;  %v5872_v7 = vld [vmem:[%s7424_s2] ss:$0 sm:$0xff] }
  0x20   : > { %4521 = vmatmul.mubr.msk.f32.gmra.mxu0 %vm410_vm1, %v377_v27  ;;  %773 = vst.msk [vmem:[#allocation2 + $0x150] sm:$0x1] %vm751_vm3, %v5442_v1  ;;  %774 = vst.msk [vmem:[#allocation2 + $0x160] sm:$0x1] %vm751_vm3, %v5442_v1  ;;  %4635 = vmatprep.subr.mxu1 %v5442_v1  ;;  %v2291_v9 = vld [vmem:[%s7425_s3 + $0x58] sm:$0xff]  ;;  %v2290_v14 = vld [vmem:[%s7425_s3 + $0x50] sm:$0xff] }
  0x21   : > { %4523 = vmatprep.mubr.msk.f32.mxu0 %vm410_vm1, %v378_v28  ;;  %775 = vst.msk [vmem:[#allocation2 + $0x170] sm:$0x1] %vm751_vm3, %v5442_v1  ;;  %776 = vst.msk [vmem:[#allocation2 + $0x180] sm:$0x1] %vm751_vm3, %v5442_v1  ;;  %2405 = vmatprep.subr.mxu0 %v5442_v1  ;;  %v2289_v18 = vld [vmem:[%s7425_s3 + $0x48] sm:$0xff]  ;;  %v2288_v21 = vld [vmem:[%s7425_s3 + $0x40] sm:$0xff] }
  0x22   : > { %777 = vst.msk [vmem:[#allocation2 + $0x190] sm:$0x1] %vm751_vm3, %v5442_v1  ;;  %778 = vst.msk [vmem:[#allocation2 + $0x1a0] sm:$0x1] %vm751_vm3, %v5442_v1  ;;  %4653 = vmatpush1.msra.mxu1 %v2293_v6  ;;  %2406 = vmatpush1.msra.mxu0 %v2293_v6  ;;  %v2287_v26 = vld [vmem:[%s7425_s3 + $0x38] sm:$0xff]  ;;  %v2286_v29 = vld [vmem:[%s7425_s3 + $0x30] sm:$0xff] }
  0x23   : > { %779 = vst.msk [vmem:[#allocation2 + $0x1b0] sm:$0x1] %vm751_vm3, %v5442_v1  ;;  %780 = vst.msk [vmem:[#allocation2 + $0x1c0] sm:$0x1] %vm751_vm3, %v5442_v1  ;;  %4636 = vmatprep.subr.mxu1 %v5442_v1  ;;  %2407 = vmatprep.subr.mxu0 %v5442_v1  ;;  %v2285_v34 = vld [vmem:[%s7425_s3 + $0x28] sm:$0xff]  ;;  %v2283_v46 = vld [vmem:[%s7425_s3 + $0x18] sm:$0xff] }
  0x24   : > { %4524 = vmatmul.mubr.msk.f32.gmra.mxu0 %vm410_vm1, %v379_v31  ;;  %783 = vst.msk [vmem:[#allocation2 + $0x1f0] sm:$0x1] %vm751_vm3, %v5442_v1  ;;  %784 = vst.msk [vmem:[#allocation2 + $0x200] sm:$0x1] %vm751_vm3, %v5442_v1  ;;  %4654 = vmatpush1.msra.mxu1 %v2292_v8  ;;  %vm3327_vm0 = vcmask 23552  }
  0x25   : > { %4526 = vmatprep.mubr.msk.f32.mxu0 %vm410_vm1, %v380_v32  ;;  %785 = vst.msk [vmem:[#allocation2 + $0x210] sm:$0x1] %vm751_vm3, %v5442_v1  ;;  %786 = vst.msk [vmem:[#allocation2 + $0x220] sm:$0x1] %vm751_vm3, %v5442_v1  ;;  %2408 = vmatpush1.msra.mxu0 %v2292_v8  ;;  %v2297_v8 = vld [vmem:[%s7425_s3 + $0x88] sm:$0xff] }
  0x26   : > { %787 = vst.msk [vmem:[#allocation2 + $0x230] sm:$0x1] %vm751_vm3, %v5442_v1  ;;  %788 = vst.msk [vmem:[#allocation2 + $0x240] sm:$0x1] %vm751_vm3, %v5442_v1  ;;  %4637 = vmatprep.subr.mxu1 %v5442_v1  ;;  %2409 = vmatprep.subr.mxu0 %v5442_v1 }
  0x27   : > { %789 = vst.msk [vmem:[#allocation2 + $0x250] sm:$0x1] %vm751_vm3, %v5442_v1  ;;  %790 = vst.msk [vmem:[#allocation2 + $0x260] sm:$0x1] %vm751_vm3, %v5442_v1  ;;  %4655 = vmatpush1.msra.mxu1 %v2291_v9  ;;  %2410 = vmatpush1.msra.mxu0 %v2291_v9 }
  0x28   : > { %4527 = vmatmul.mubr.msk.f32.gmra.mxu0 %vm410_vm1, %v381_v35  ;;  %793 = vst.msk [vmem:[#allocation2 + $0x19] sm:$0x1] %vm751_vm3, %v5442_v1  ;;  %795 = vst.msk [vmem:[#allocation2 + $0x39] sm:$0x1] %vm751_vm3, %v5442_v1  ;;  %4638 = vmatprep.subr.mxu1 %v5442_v1  ;;  %v2284_v35 = vld [vmem:[%s7425_s3 + $0x20] sm:$0xff] }
  0x29   : > { %4529 = vmatprep.mubr.msk.f32.mxu0 %vm410_vm1, %v382_v36  ;;  %796 = vst.msk [vmem:[#allocation2 + $0x49] sm:$0x1] %vm751_vm3, %v5442_v1  ;;  %797 = vst.msk [vmem:[#allocation2 + $0x59] sm:$0x1] %vm751_vm3, %v5442_v1  ;;  %2411 = vmatprep.subr.mxu0 %v5442_v1 }
  0x2a   : > { %798 = vst.msk [vmem:[#allocation2 + $0x69] sm:$0x1] %vm751_vm3, %v5442_v1  ;;  %799 = vst.msk [vmem:[#allocation2 + $0x79] sm:$0x1] %vm751_vm3, %v5442_v1  ;;  %4656 = vmatpush1.msra.mxu1 %v2290_v14  ;;  %2412 = vmatpush1.msra.mxu0 %v2290_v14 }
  0x2b   : > { %800 = vst.msk [vmem:[#allocation2 + $0x89] sm:$0x1] %vm751_vm3, %v5442_v1  ;;  %803 = vst.msk [vmem:[#allocation2 + $0xb9] sm:$0x1] %vm751_vm3, %v5442_v1  ;;  %4639 = vmatprep.subr.mxu1 %v5442_v1  ;;  %2413 = vmatprep.subr.mxu0 %v5442_v1 }
  0x2c   : > { %4530 = vmatmul.mubr.msk.f32.gmra.mxu0 %vm410_vm1, %v383_v39  ;;  %804 = vst.msk [vmem:[#allocation2 + $0xc9] sm:$0x1] %vm751_vm3, %v5442_v1  ;;  %805 = vst.msk [vmem:[#allocation2 + $0xd9] sm:$0x1] %vm751_vm3, %v5442_v1  ;;  %4657 = vmatpush1.msra.mxu1 %v2289_v18 }
  0x2d   : > { %4532 = vmatprep.mubr.msk.f32.mxu0 %vm410_vm1, %v384_v40  ;;  %806 = vst.msk [vmem:[#allocation2 + $0xe9] sm:$0x1] %vm751_vm3, %v5442_v1  ;;  %807 = vst.msk [vmem:[#allocation2 + $0xf9] sm:$0x1] %vm751_vm3, %v5442_v1  ;;  %2414 = vmatpush1.msra.mxu0 %v2289_v18 }
  0x2e   : > { %808 = vst.msk [vmem:[#allocation2 + $0x109] sm:$0x1] %vm751_vm3, %v5442_v1  ;;  %809 = vst.msk [vmem:[#allocation2 + $0x119] sm:$0x1] %vm751_vm3, %v5442_v1  ;;  %4640 = vmatprep.subr.mxu1 %v5442_v1  ;;  %2415 = vmatprep.subr.mxu0 %v5442_v1 }
  0x2f   : > { %810 = vst.msk [vmem:[#allocation2 + $0x129] sm:$0x1] %vm751_vm3, %v5442_v1  ;;  %813 = vst.msk [vmem:[#allocation2 + $0x159] sm:$0x1] %vm751_vm3, %v5442_v1  ;;  %4658 = vmatpush1.msra.mxu1 %v2288_v21  ;;  %2416 = vmatpush1.msra.mxu0 %v2288_v21 }
  0x30   : > { %4533 = vmatmul.mubr.msk.f32.gmra.mxu0 %vm410_vm1, %v385_v43  ;;  %814 = vst.msk [vmem:[#allocation2 + $0x169] sm:$0x1] %vm751_vm3, %v5442_v1  ;;  %815 = vst.msk [vmem:[#allocation2 + $0x179] sm:$0x1] %vm751_vm3, %v5442_v1  ;;  %4641 = vmatprep.subr.mxu1 %v5442_v1 }
  0x31   : > { %4535 = vmatprep.mubr.msk.f32.mxu0 %vm410_vm1, %v386_v44  ;;  %816 = vst.msk [vmem:[#allocation2 + $0x189] sm:$0x1] %vm751_vm3, %v5442_v1  ;;  %817 = vst.msk [vmem:[#allocation2 + $0x199] sm:$0x1] %vm751_vm3, %v5442_v1  ;;  %2417 = vmatprep.subr.mxu0 %v5442_v1 }
  0x32   : > { %818 = vst.msk [vmem:[#allocation2 + $0x1a9] sm:$0x1] %vm751_vm3, %v5442_v1  ;;  %819 = vst.msk [vmem:[#allocation2 + $0x1b9] sm:$0x1] %vm751_vm3, %v5442_v1  ;;  %4659 = vmatpush1.msra.mxu1 %v2287_v26  ;;  %2418 = vmatpush1.msra.mxu0 %v2287_v26 }
  0x33   : > { %820 = vst.msk [vmem:[#allocation2 + $0x1c9] sm:$0x1] %vm751_vm3, %v5442_v1  ;;  %823 = vst.msk [vmem:[#allocation2 + $0x1f9] sm:$0x1] %vm751_vm3, %v5442_v1  ;;  %4642 = vmatprep.subr.mxu1 %v5442_v1  ;;  %2419 = vmatprep.subr.mxu0 %v5442_v1 }
  0x34   : > { %4536 = vmatmul.mubr.msk.f32.gmra.mxu0 %vm410_vm1, %v387_v47  ;;  %824 = vst.msk [vmem:[#allocation2 + $0x209] sm:$0x1] %vm751_vm3, %v5442_v1  ;;  %825 = vst.msk [vmem:[#allocation2 + $0x219] sm:$0x1] %vm751_vm3, %v5442_v1  ;;  %4660 = vmatpush1.msra.mxu1 %v2286_v29 }
  0x35   : > { %4538 = vmatprep.mubr.msk.f32.mxu0 %vm410_vm1, %v388_v48  ;;  %826 = vst.msk [vmem:[#allocation2 + $0x229] sm:$0x1] %vm751_vm3, %v5442_v1  ;;  %827 = vst.msk [vmem:[#allocation2 + $0x239] sm:$0x1] %vm751_vm3, %v5442_v1  ;;  %2420 = vmatpush1.msra.mxu0 %v2286_v29 }
  0x36   : > { %828 = vst.msk [vmem:[#allocation2 + $0x249] sm:$0x1] %vm751_vm3, %v5442_v1  ;;  %829 = vst.msk [vmem:[#allocation2 + $0x259] sm:$0x1] %vm751_vm3, %v5442_v1  ;;  %4643 = vmatprep.subr.mxu1 %v5442_v1  ;;  %2421 = vmatprep.subr.mxu0 %v5442_v1 }
  0x37   : > { %830 = vst.msk [vmem:[#allocation2 + $0x269] sm:$0x1] %vm751_vm3, %v5442_v1  ;;  %752 = vst.msk [vmem:[#allocation2] sm:$0x1] %vm751_vm3, %v5442_v1  ;;  %4661 = vmatpush1.msra.mxu1 %v2285_v34  ;;  %2422 = vmatpush1.msra.mxu0 %v2285_v34 }
  0x38   : > { %4539 = vmatmul.mubr.msk.f32.gmra.mxu0 %vm410_vm1, %v389_v51  ;;  %761 = vst.msk [vmem:[#allocation2 + $0x90] sm:$0x1] %vm751_vm3, %v5442_v1  ;;  %762 = vst.msk [vmem:[#allocation2 + $0xa0] sm:$0x1] %vm751_vm3, %v5442_v1  ;;  %4644 = vmatprep.subr.mxu1 %v5442_v1 }
  0x39   : > { %4541 = vmatprep.mubr.msk.f32.mxu0 %vm410_vm1, %v390_v52  ;;  %771 = vst.msk [vmem:[#allocation2 + $0x130] sm:$0x1] %vm751_vm3, %v5442_v1  ;;  %772 = vst.msk [vmem:[#allocation2 + $0x140] sm:$0x1] %vm751_vm3, %v5442_v1  ;;  %4662 = vmatpush1.msra.mxu1 %v2284_v35  ;;  %v2282_v52 = vld [vmem:[%s7425_s3 + $0x10] sm:$0xff] }
  0x3a   : > { %781 = vst.msk [vmem:[#allocation2 + $0x1d0] sm:$0x1] %vm751_vm3, %v5442_v1  ;;  %782 = vst.msk [vmem:[#allocation2 + $0x1e0] sm:$0x1] %vm751_vm3, %v5442_v1  ;;  %4645 = vmatprep.subr.mxu1 %v5442_v1  ;;  %2423 = vmatprep.subr.mxu0 %v5442_v1 }
  0x3b   : > { %791 = vst.msk [vmem:[#allocation2 + $0x270] sm:$0x1] %vm751_vm3, %v5442_v1  ;;  %4663 = vmatpush1.msra.mxu1 %v2283_v46  ;;  %2424 = vmatpush1.msra.mxu0 %v2284_v35 }
  0x3c   : > { %4542 = vmatmul.mubr.msk.f32.gmra.mxu0 %vm410_vm1, %v391_v55  ;;  %746 = vst.msk [vmem:[#allocation2 + $0x138] sm:$0x3] %vm734_vm4, %v5442_v1  ;;  %735 = vst.msk [vmem:[#allocation2 + $0x8] sm:$0x3] %vm734_vm4, %v5442_v1  ;;  %4646 = vmatprep.subr.mxu1 %v5442_v1 }
  0x3d   : > { %4544 = vmatprep.mubr.msk.f32.mxu0 %vm410_vm1, %v392_v56  ;;  %737 = vst.msk [vmem:[#allocation2 + $0xa8] sm:$0x3] %vm734_vm4, %v5442_v1  ;;  %739 = vst.msk [vmem:[#allocation2 + $0x148] sm:$0x3] %vm734_vm4, %v5442_v1  ;;  %v2281_v56 = vld [vmem:[%s7425_s3 + $0x8] sm:$0xff]  ;;  %4664 = vmatpush1.msra.mxu1 %v2282_v52 }
  0x3e   : > { %741 = vst.msk [vmem:[#allocation2 + $0x1e8] sm:$0x3] %vm734_vm4, %v5442_v1  ;;  %744 = vst.msk [vmem:[#allocation2 + $0x98] sm:$0x3] %vm734_vm4, %v5442_v1  ;;  %4647 = vmatprep.subr.mxu1 %v5442_v1  ;;  %2425 = vmatprep.subr.mxu0 %v5442_v1 }
  0x3f   : > { %748 = vst.msk [vmem:[#allocation2 + $0x1d8] sm:$0x3] %vm734_vm4, %v5442_v1  ;;  %750 = vst.msk [vmem:[#allocation2 + $0x278] sm:$0x3] %vm734_vm4, %v5442_v1  ;;  %4665 = vmatpush1.msra.mxu1 %v2281_v56  ;;  %2426 = vmatpush1.msra.mxu0 %v2283_v46  ;;  %vm3718_vm4 = vcmask 97280  }
  0x40   : > { %4545 = vmatmul.mubr.msk.f32.gmra.mxu0 %vm410_vm1, %v393_v58  ;;  %811 = vst.msk [vmem:[#allocation2 + $0x139] sm:$0x1] %vm751_vm3, %v5442_v1  ;;  %792 = vst.msk [vmem:[#allocation2 + $0x9] sm:$0x1] %vm751_vm3, %v5442_v1  ;;  %4648 = vmatprep.subr.mxu1 %v5442_v1 }
  0x41   : > { %4547 = vmatprep.mubr.msk.f32.mxu0 %vm410_vm1, %v394_v59  ;;  %801 = vst.msk [vmem:[#allocation2 + $0x99] sm:$0x1] %vm751_vm3, %v5442_v1  ;;  %802 = vst.msk [vmem:[#allocation2 + $0xa9] sm:$0x1] %vm751_vm3, %v5442_v1  ;;  %2427 = vmatprep.subr.mxu0 %v5442_v1 }
  0x42   : > { %812 = vst.msk [vmem:[#allocation2 + $0x149] sm:$0x1] %vm751_vm3, %v5442_v1  ;;  %821 = vst.msk [vmem:[#allocation2 + $0x1d9] sm:$0x1] %vm751_vm3, %v5442_v1  ;;  %2428 = vmatpush1.msra.mxu0 %v2282_v52 }
  0x43   : > { %822 = vst.msk [vmem:[#allocation2 + $0x1e9] sm:$0x1] %vm751_vm3, %v5442_v1  ;;  %831 = vst.msk [vmem:[#allocation2 + $0x279] sm:$0x1] %vm751_vm3, %v5442_v1  ;;  %2429 = vmatprep.subr.mxu0 %v5442_v1  ;;  %vm3807_vm3 = vcmask 1043456  }
  0x44   : > { %4548 = vmatmul.mubr.msk.f32.gmra.mxu0 %vm410_vm1, %v395_v60  ;;  %3339 = vst.msk [vmem:[#allocation3 + $0x8] sm:$0x3] %vm3338_vm11, %v5442_v1  ;;  %3342 = vst.msk [vmem:[#allocation3 + $0x98] sm:$0x3] %vm3338_vm11, %v5442_v1 }
  0x45   : > { %4550 = vmatprep.mubr.msk.f32.mxu0 %vm410_vm1, %v396_v61  ;;  %2430 = vmatpush1.msra.mxu0 %v2281_v56  ;;  %v1097_v46 = vld [vmem:[#allocation2 + $0x91] sm:$0xff]  ;;  %3337 = vst.msk [vmem:[#allocation3] sm:$0xff] %vm3336_vm12, %v5442_v1  ;;  %3341 = vst.msk [vmem:[#allocation3 + $0x90] sm:$0xff] %vm3336_vm12, %v5442_v1 }
  0x46   : > { %2431 = vmatprep.subr.mxu0 %v5442_v1  ;;  %3354 = vst.msk [vmem:[#allocation3 + $0x9] sm:$0x1] %vm3343_vm13, %v5442_v1  ;;  %3345 = vst.msk [vmem:[#allocation3 + $0x10] sm:$0x1] %vm3343_vm13, %v5442_v1 }
  0x47   : > { %3346 = vst.msk [vmem:[#allocation3 + $0x20] sm:$0x1] %vm3343_vm13, %v5442_v1  ;;  %3347 = vst.msk [vmem:[#allocation3 + $0x30] sm:$0x1] %vm3343_vm13, %v5442_v1 }
  0x48   : > { %4551 = vmatmul.mubr.msk.f32.gmra.mxu0 %vm410_vm1, %v397_v62  ;;  %3348 = vst.msk [vmem:[#allocation3 + $0x40] sm:$0x1] %vm3343_vm13, %v5442_v1  ;;  %3349 = vst.msk [vmem:[#allocation3 + $0x50] sm:$0x1] %vm3343_vm13, %v5442_v1 }
  0x49   : > { %4553 = vmatprep.mubr.msk.f32.mxu0 %vm410_vm1, %v398_v63  ;;  %v1073_v63 = vld [vmem:[#allocation2 + $0x130] sm:$0xff]  ;;  %3350 = vst.msk [vmem:[#allocation3 + $0x60] sm:$0x1] %vm3343_vm13, %v5442_v1  ;;  %3351 = vst.msk [vmem:[#allocation3 + $0x70] sm:$0x1] %vm3343_vm13, %v5442_v1 }
  0x4a   : > { %3352 = vst.msk [vmem:[#allocation3 + $0x80] sm:$0x1] %vm3343_vm13, %v5442_v1  ;;  %3355 = vst.msk [vmem:[#allocation3 + $0x19] sm:$0x1] %vm3343_vm13, %v5442_v1 }
  0x4b   : > { %3356 = vst.msk [vmem:[#allocation3 + $0x29] sm:$0x1] %vm3343_vm13, %v5442_v1  ;;  %3357 = vst.msk [vmem:[#allocation3 + $0x39] sm:$0x1] %vm3343_vm13, %v5442_v1 }
  0x4c   : > { %4554 = vmatmul.mubr.msk.f32.gmra.mxu0 %vm410_vm1, %v399_v0  ;;  %v2280_v0 = vld [vmem:[%s7425_s3] sm:$0xff]  ;;  %3358 = vst.msk [vmem:[#allocation3 + $0x49] sm:$0x1] %vm3343_vm13, %v5442_v1  ;;  %3359 = vst.msk [vmem:[#allocation3 + $0x59] sm:$0x1] %vm3343_vm13, %v5442_v1 }
  0x4d   : > { %4556 = vmatprep.mubr.msk.f32.mxu0 %vm410_vm1, %v400_v3  ;;  %4666 = vmatpush1.msra.mxu1 %v2280_v0  ;;  %3360 = vst.msk [vmem:[#allocation3 + $0x69] sm:$0x1] %vm3343_vm13, %v5442_v1  ;;  %3361 = vst.msk [vmem:[#allocation3 + $0x79] sm:$0x1] %vm3343_vm13, %v5442_v1 }
  0x4e   : > { %4649 = vmatprep.subr.mxu1 %v5442_v1  ;;  %2432 = vmatpush1.msra.mxu0 %v2280_v0  ;;  %3362 = vst.msk [vmem:[#allocation3 + $0x89] sm:$0x1] %vm3343_vm13, %v5442_v1  ;;  %3363 = vst.msk [vmem:[#allocation3 + $0x99] sm:$0x1] %vm3343_vm13, %v5442_v1 }
  0x4f   : > { %4667 = vmatpush2.msra.mxu1 %v2297_v8  ;;  %2461 = vmatprep.subr.mxu0 %v5442_v1  ;;  %3344 = vst.msk [vmem:[#allocation3] sm:$0x1] %vm3343_vm13, %v5442_v1  ;;  %3353 = vst.msk [vmem:[#allocation3 + $0x90] sm:$0x1] %vm3343_vm13, %v5442_v1 }
  0x50   : > { %4557 = vmatmul.mubr.msk.f32.gmra.mxu0 %vm410_vm1, %v401_v4  ;;  %4650 = vmatprep.subr.mxu1 %v5442_v1 }
  0x51   : > { %2462 = vmatpush2.msra.mxu0 %v2297_v8 }
  0x52   : > { %2463 = vmatprep.subr.mxu0 %v5442_v1  ;;  %v3381_v1 = vld [vmem:[#allocation3 + $0x1] sm:$0xff] }
  0xd4   : > { %v4513_v10 = vpop.f32.mrf.mxu0 }
  0xd5   : > { %v579_v11 = vadd.f32 %v4513_v10, %v5872_v7 }
  0xd6   : > { %v573_v12 = vpop.f32.mrf.mxu0 }
  0xd7   : > { %834 = vst.msk [vmem:[#allocation2 + $0x21] sm:$0xff] %vm732_vm2, %v579_v11  ;;  %v574_v13 = vadd.f32 %v5872_v7, %v573_v12  ;;  %v1105_v11 = vld [vmem:[#allocation2 + $0x131] sm:$0xff] }
  0xd8   : > { %v4516_v15 = vpop.f32.mrf.mxu0 }
  0xd9   : > { %833 = vst.msk [vmem:[#allocation2 + $0x11] sm:$0xff] %vm732_vm2, %v574_v13  ;;  %v589_v16 = vadd.f32 %v4516_v15, %v5872_v7  ;;  %v2296_v13 = vld [vmem:[%s7425_s3 + $0x80] sm:$0xff] }
  0xda   : > { %v583_v17 = vpop.f32.mrf.mxu0  ;;  %4668 = vmatpush2.msra.mxu1 %v2296_v13  ;;  %2464 = vmatpush2.msra.mxu0 %v2296_v13 }
  0xdb   : > { %836 = vst.msk [vmem:[#allocation2 + $0x41] sm:$0xff] %vm732_vm2, %v589_v16  ;;  %v584_v19 = vadd.f32 %v5872_v7, %v583_v17 }
  0xdc   : > { %v4519_v20 = vpop.f32.mrf.mxu0 }
  0xdd   : > { %835 = vst.msk [vmem:[#allocation2 + $0x31] sm:$0xff] %vm732_vm2, %v584_v19  ;;  %v599_v22 = vadd.f32 %v4519_v20, %v5872_v7 }
  0xde   : > { %v593_v23 = vpop.f32.mrf.mxu0  ;;  %v5908_v24 = vld [vmem:[#allocation2 + $0x22] sm:$0xff] }
  0xdf   : > { %838 = vst.msk [vmem:[#allocation2 + $0x61] sm:$0xff] %vm732_vm2, %v599_v22  ;;  %v594_v25 = vadd.f32 %v5872_v7, %v593_v23  ;;  %4310 = vmatprep.mubr.msk.f32.mxu0 %vm732_vm2, %v5908_v24  ;;  %v5932_v33 = vld [vmem:[#allocation2 + $0x21] sm:$0xff]  ;;  %v1065_v23 = vld [vmem:[#allocation2 + $0x90] sm:$0xff] }
  0xe0   : > { %v4522_v27 = vpop.f32.mrf.mxu0 }
  0xe1   : > { %837 = vst.msk [vmem:[#allocation2 + $0x51] sm:$0xff] %vm732_vm2, %v594_v25  ;;  %v609_v28 = vadd.f32 %v4522_v27, %v5872_v7 }
  0xe2   : > { %v603_v30 = vpop.f32.mrf.mxu0  ;;  %v5926_v31 = vld [vmem:[#allocation2 + $0x42] sm:$0xff] }
  0xe3   : > { %840 = vst.msk [vmem:[#allocation2 + $0x81] sm:$0xff] %vm732_vm2, %v609_v28  ;;  %v604_v32 = vadd.f32 %v5872_v7, %v603_v30  ;;  %4312 = vmatprep.mubr.msk.f32.mxu1 %vm732_vm2, %v5926_v31  ;;  %v5943_v38 = vld [vmem:[#allocation2 + $0x40] sm:$0xff] }
  0xe4   : > { %v4525_v36 = vpop.f32.mrf.mxu0  ;;  %v5941_v37 = vld [vmem:[#allocation2 + $0x30] sm:$0xff]  ;;  %v996_v48 = vld [vmem:[#allocation2 + $0x41] sm:$0xff] }
  0xe5   : > { %v5945_v39 = vld [vmem:[#allocation2 + $0x31] sm:$0xff]  ;;  %839 = vst.msk [vmem:[#allocation2 + $0x71] sm:$0xff] %vm732_vm2, %v604_v32  ;;  %v619_v40 = vadd.f32 %v4525_v36, %v5872_v7  ;;  %v4705_v41 = vpack.i.bf16 %v5943_v38, %v5941_v37  ;;  %v4720_v6 = vpack.i.bf16 %v5941_v37, %v1073_v63 }
  0xe6   : > { %v4695_v42 = vpack.i.bf16 %v5945_v39, %v5932_v33  ;;  %v613_v43 = vpop.f32.mrf.mxu0  ;;  %v932_v44 = vld [vmem:[#allocation2 + $0x32] sm:$0xff]  ;;  %v4710_v50 = vpack.i.bf16 %v996_v48, %v5945_v39  ;;  %v6005_v10 = vld [vmem:[#allocation2 + $0x60] sm:$0xff]  ;;  %v4725_v16 = vpack.i.bf16 %v5945_v39, %v1105_v11 }
  0xe7   : > { %842 = vst.msk [vmem:[#allocation2 + $0xc1] sm:$0xff] %vm732_vm2, %v619_v40  ;;  %v614_v45 = vadd.f32 %v5872_v7, %v613_v43  ;;  %4706 = vrot.lane.b32.xlu1 %v4705_v41, %s5443_s26  ;;  %v4700_v51 = vpack.i.bf16 %v932_v44, %v5908_v24  ;;  %v4715_v60 = vpack.i.bf16 %v5926_v31, %v932_v44  ;;  %v6021_v17 = vld [vmem:[#allocation2 + $0x62] sm:$0xff] }
  0xe8   : > { %4696 = vrot.lane.b32.xlu0 %v4695_v42, %s5444_s27  ;;  %v4528_v47 = vpop.f32.mrf.mxu0  ;;  %v5970_v54 = vld [vmem:[#allocation2 + $0x50] sm:$0xff]  ;;  %v1094_v35 = vld [vmem:[#allocation2 + $0x61] sm:$0xff] }
  0xe9   : > { %841 = vst.msk [vmem:[#allocation2 + $0xb1] sm:$0xff] %vm732_vm2, %v614_v45  ;;  %v629_v49 = vadd.f32 %v4528_v47, %v5872_v7  ;;  %v4730_v59 = vpack.i.bf16 %v5970_v54, %v5943_v38  ;;  %v5987_v62 = vld [vmem:[#allocation2 + $0x51] sm:$0xff]  ;;  %v4750_v15 = vpack.i.bf16 %v6005_v10, %v5970_v54 }
  0xea   : > { %v623_v53 = vpop.f32.mrf.mxu0  ;;  %v4740_v5 = vpack.i.bf16 %v5987_v62, %v996_v48  ;;  %v6028_v21 = vld [vmem:[#allocation2 + $0x52] sm:$0xff]  ;;  %v6030_v22 = vld [vmem:[#allocation2 + $0x80] sm:$0xff]  ;;  %v4755_v43 = vpack.i.bf16 %v1094_v35, %v5987_v62 }
  0xeb   : > { %844 = vst.msk [vmem:[#allocation2 + $0xe1] sm:$0xff] %vm732_vm2, %v629_v49  ;;  %v624_v55 = vadd.f32 %v5872_v7, %v623_v53  ;;  %4711 = vrot.lane.b32.xlu1 %v4710_v50, %s5445_s14  ;;  %v4760_v26 = vpack.i.bf16 %v6021_v17, %v6028_v21  ;;  %v4765_v29 = vpack.i.bf16 %v1065_v23, %v6030_v22  ;;  %v1096_v45 = vld [vmem:[#allocation2 + $0x81] sm:$0xff] }
  0xec   : > { %4701 = vrot.lane.b32.xlu0 %v4700_v51, %s5446_s15  ;;  %v4531_v57 = vpop.f32.mrf.mxu0  ;;  %v4745_v34 = vpack.i.bf16 %v6028_v21, %v5926_v31  ;;  %v1095_v36 = vld [vmem:[#allocation2 + $0x71] sm:$0xff]  ;;  %v4770_v52 = vpack.i.bf16 %v1097_v46, %v1096_v45 }
  0xed   : > { %843 = vst.msk [vmem:[#allocation2 + $0xd1] sm:$0xff] %vm732_vm2, %v624_v55  ;;  %v639_v58 = vadd.f32 %v4531_v57, %v5872_v7  ;;  %v4780_v31 = vpack.i.bf16 %v1095_v36, %v1094_v35  ;;  %v6055_v44 = vld [vmem:[#allocation2 + $0x72] sm:$0xff] }
  0xee   : > { %v633_v61 = vpop.f32.mrf.mxu0  ;;  %v4790_v51 = vpack.i.bf16 %v6055_v44, %v6021_v17  ;;  %v6065_v53 = vld [vmem:[#allocation2 + $0x70] sm:$0xff] }
  0xef   : > { %846 = vst.msk [vmem:[#allocation2 + $0x101] sm:$0xff] %vm732_vm2, %v639_v58  ;;  %v634_v3 = vadd.f32 %v5872_v7, %v633_v61  ;;  %4731 = vrot.lane.b32.xlu1 %v4730_v59, %s5447_s21  ;;  %v905_v58 = vld [vmem:[#allocation2 + $0xa1] sm:$0xff]  ;;  %v4800_v61 = vpack.i.bf16 %v1096_v45, %v1095_v36  ;;  %v4775_v62 = vpack.i.bf16 %v6065_v53, %v6005_v10 }
  0xf0   : > { %4716 = vrot.lane.b32.xlu0 %v4715_v60, %s5448_s22  ;;  %v4534_v4 = vpop.f32.mrf.mxu0  ;;  %v906_v59 = vld [vmem:[#allocation2 + $0xb1] sm:$0xff]  ;;  %v4795_v13 = vpack.i.bf16 %v6030_v22, %v6065_v53  ;;  %v929_v36 = vld [vmem:[#allocation2 + $0x2] sm:$0xff] }
  0xf1   : > { %845 = vst.msk [vmem:[#allocation2 + $0xf1] sm:$0xff] %vm732_vm2, %v634_v3  ;;  %v649_v2 = vadd.f32 %v4534_v4, %v5872_v7  ;;  %v4810_v3 = vpack.i.bf16 %v906_v59, %v905_v58 }
  0xf2   : > { %v643_v9 = vpop.f32.mrf.mxu0  ;;  %v1068_v45 = vld [vmem:[#allocation2 + $0xe0] sm:$0xff] }
  0xf3   : > { %848 = vst.msk [vmem:[#allocation2 + $0x121] sm:$0xff] %vm732_vm2, %v649_v2  ;;  %v644_v12 = vadd.f32 %v5872_v7, %v643_v9  ;;  %4741 = vrot.lane.b32.xlu1 %v4740_v5, %s5444_s27 }
  0xf4   : > { %4721 = vrot.lane.b32.xlu0 %v4720_v6, %s5447_s21  ;;  %v4537_v14 = vpop.f32.mrf.mxu0  ;;  %v970_v6 = vld [vmem:[#allocation2 + $0xc0] sm:$0xff]  ;;  %v1099_v23 = vld [vmem:[#allocation2 + $0xd1] sm:$0xff] }
  0xf5   : > { %847 = vst.msk [vmem:[#allocation2 + $0x111] sm:$0xff] %vm732_vm2, %v644_v12  ;;  %v659_v18 = vadd.f32 %v4537_v14, %v5872_v7  ;;  %v1033_v14 = vld [vmem:[#allocation2 + $0xb2] sm:$0xff] }
  0xf6   : > { %v653_v19 = vpop.f32.mrf.mxu0 }
  0xf7   : > { %4751 = vrot.lane.b32.xlu1 %v4750_v15, %s5443_s26  ;;  %v654_v20 = vadd.f32 %v5872_v7, %v653_v19  ;;  %850 = vst.msk [vmem:[#allocation2 + $0x161] sm:$0xff] %vm732_vm2, %v659_v18  ;;  %v1034_v15 = vld [vmem:[#allocation2 + $0xc2] sm:$0xff] }
  0xf8   : > { %4726 = vrot.lane.b32.xlu0 %v4725_v16, %s5449_s29  ;;  %v4540_v25 = vpop.f32.mrf.mxu0  ;;  %v6092_v16 = vld [vmem:[#allocation2 + $0x82] sm:$0xff]  ;;  %v4830_v18 = vpack.i.bf16 %v1034_v15, %v1033_v14  ;;  %v1069_v46 = vld [vmem:[#allocation2 + $0xf0] sm:$0xff] }
  0xf9   : > { %849 = vst.msk [vmem:[#allocation2 + $0x151] sm:$0xff] %vm732_vm2, %v654_v20  ;;  %v669_v27 = vadd.f32 %v4540_v25, %v5872_v7  ;;  %v4805_v19 = vpack.i.bf16 %v6092_v16, %v6055_v44  ;;  %v1098_v20 = vld [vmem:[#allocation2 + $0xc1] sm:$0xff] }
  0xfa   : > { %v663_v28 = vpop.f32.mrf.mxu0  ;;  %v937_v25 = vld [vmem:[#allocation2 + $0xa2] sm:$0xff]  ;;  %v4840_v22 = vpack.i.bf16 %v1099_v23, %v1098_v20 }
  0xfb   : > { %4761 = vrot.lane.b32.xlu1 %v4760_v26, %s5448_s22  ;;  %v664_v30 = vadd.f32 %v5872_v7, %v663_v28  ;;  %852 = vst.msk [vmem:[#allocation2 + $0x181] sm:$0xff] %vm732_vm2, %v669_v27  ;;  %v4815_v26 = vpack.i.bf16 %v1033_v14, %v937_v25  ;;  %v940_v27 = vld [vmem:[#allocation2 + $0xd2] sm:$0xff]  ;;  %v913_v14 = vld [vmem:[#allocation2 + $0x141] sm:$0xff] }
  0xfc   : > { %4736 = vrot.lane.b32.xlu0 %v4740_v5, %s5449_s29  ;;  %v4543_v32 = vpop.f32.mrf.mxu0  ;;  %v6081_v5 = vld [vmem:[#allocation2 + $0xb0] sm:$0xff]  ;;  %v4850_v28 = vpack.i.bf16 %v940_v27, %v1034_v15 }
  0xfd   : > { %851 = vst.msk [vmem:[#allocation2 + $0x171] sm:$0xff] %vm732_vm2, %v664_v30  ;;  %v679_v39 = vadd.f32 %v4543_v32, %v5872_v7  ;;  %v4820_v12 = vpack.i.bf16 %v970_v6, %v6081_v5  ;;  %v1004_v32 = vld [vmem:[#allocation2 + $0xe1] sm:$0xff] }
  0xfe   : > { %v673_v40 = vpop.f32.mrf.mxu0 }
  0xff   : > { %4766 = vrot.lane.b32.xlu1 %v4765_v29, %s5447_s21  ;;  %v674_v41 = vadd.f32 %v5872_v7, %v673_v40  ;;  %854 = vst.msk [vmem:[#allocation2 + $0x1a1] sm:$0xff] %vm732_vm2, %v679_v39  ;;  %v4825_v29 = vpack.i.bf16 %v1098_v20, %v906_v59  ;;  %v943_v39 = vld [vmem:[#allocation2 + $0x102] sm:$0xff]  ;;  %v1037_v59 = vld [vmem:[#allocation2 + $0xf2] sm:$0xff] }
 0x100   : > { %4746 = vrot.lane.b32.xlu0 %v4745_v34, %s5446_s15  ;;  %v4546_v42 = vpop.f32.mrf.mxu0  ;;  %v1067_v34 = vld [vmem:[#allocation2 + $0xd0] sm:$0xff] }
 0x101   : > { %853 = vst.msk [vmem:[#allocation2 + $0x191] sm:$0xff] %vm732_vm2, %v674_v41  ;;  %v689_v47 = vadd.f32 %v4546_v42, %v5872_v7  ;;  %v4860_v41 = vpack.i.bf16 %v1004_v32, %v1099_v23  ;;  %v4835_v42 = vpack.i.bf16 %v1067_v34, %v970_v6  ;;  %v1103_v6 = vld [vmem:[#allocation2 + $0x111] sm:$0xff] }
 0x102   : > { %v683_v48 = vpop.f32.mrf.mxu0  ;;  %v914_v15 = vld [vmem:[#allocation2 + $0x151] sm:$0xff] }
 0x103   : > { %4781 = vrot.lane.b32.xlu1 %v4780_v31, %s5449_s29  ;;  %v684_v49 = vadd.f32 %v5872_v7, %v683_v48  ;;  %856 = vst.msk [vmem:[#allocation2 + $0x1c1] sm:$0xff] %vm732_vm2, %v689_v47  ;;  %v4880_v47 = vpack.i.bf16 %v1069_v46, %v1068_v45  ;;  %v4855_v48 = vpack.i.bf16 %v1068_v45, %v1067_v34  ;;  %v1071_v23 = vld [vmem:[#allocation2 + $0x110] sm:$0xff]  ;;  %v1010_v34 = vld [vmem:[#allocation2 + $0x161] sm:$0xff] }
 0x104   : > { %4756 = vrot.lane.b32.xlu0 %v4755_v43, %s5445_s14  ;;  %v4549_v50 = vpop.f32.mrf.mxu0  ;;  %v4875_v43 = vpack.i.bf16 %v929_v36, %v943_v39  ;;  %v4975_v20 = vpack.i.bf16 %v914_v15, %v913_v14 }
 0x105   : > { %855 = vst.msk [vmem:[#allocation2 + $0x1b1] sm:$0xff] %vm732_vm2, %v684_v49  ;;  %v699_v55 = vadd.f32 %v4549_v50, %v5872_v7  ;;  %v910_v49 = vld [vmem:[#allocation2 + $0xf1] sm:$0xff]  ;;  %v1036_v50 = vld [vmem:[#allocation2 + $0xe2] sm:$0xff] }
 0x106   : > { %v693_v56 = vpop.f32.mrf.mxu0 }
 0x107   : > { %4791 = vrot.lane.b32.xlu1 %v4790_v51, %s5446_s15  ;;  %v694_v57 = vadd.f32 %v5872_v7, %v693_v56  ;;  %858 = vst.msk [vmem:[#allocation2 + $0x201] sm:$0xff] %vm732_vm2, %v699_v55  ;;  %v4865_v51 = vpack.i.bf16 %v1036_v50, %v940_v27  ;;  %v897_v55 = vld [vmem:[#allocation2 + $0x1] sm:$0xff]  ;;  %v961_v27 = vld [vmem:[#allocation2 + $0x10] sm:$0xff] }
 0x108   : > { %4771 = vrot.lane.b32.xlu0 %v4770_v52, %s5449_s29  ;;  %v4552_v60 = vpop.f32.mrf.mxu0  ;;  %v974_v52 = vld [vmem:[#allocation2 + $0x100] sm:$0xff] }
 0x109   : > { %857 = vst.msk [vmem:[#allocation2 + $0x1f1] sm:$0xff] %vm732_vm2, %v694_v57  ;;  %v709_v63 = vadd.f32 %v4552_v60, %v5872_v7  ;;  %v911_v56 = vld [vmem:[#allocation2 + $0x101] sm:$0xff]  ;;  %v4900_v57 = vpack.i.bf16 %v974_v52, %v1069_v46  ;;  %v4910_v60 = vpack.i.bf16 %v943_v39, %v1037_v59  ;;  %v4940_v25 = vpack.i.bf16 %v1071_v23, %v974_v52 }
 0x10a   : > { %v703_v0 = vpop.f32.mrf.mxu0  ;;  %v4870_v58 = vpack.i.bf16 %v897_v55, %v911_v56  ;;  %v4990_v39 = vpack.i.bf16 %v1010_v34, %v914_v15  ;;  %v980_v55 = vld [vmem:[#allocation2 + $0x180] sm:$0xff] }
 0x10b   : > { %4801 = vrot.lane.b32.xlu1 %v4800_v61, %s5445_s14  ;;  %v704_v4 = vadd.f32 %v5872_v7, %v703_v0  ;;  %860 = vst.msk [vmem:[#allocation2 + $0x221] sm:$0xff] %vm732_vm2, %v709_v63  ;;  %v1072_v61 = vld [vmem:[#allocation2 + $0x120] sm:$0xff]  ;;  %v4895_v0 = vpack.i.bf16 %v1037_v59, %v1036_v50 }
 0x10c   : > { %4776 = vrot.lane.b32.xlu0 %v4775_v62, %s5447_s21  ;;  %v4555_v2 = vpop.f32.mrf.mxu0  ;;  %v6120_v62 = vld [vmem:[#allocation2 + $0x20] sm:$0xff] }
 0x10d   : > { %859 = vst.msk [vmem:[#allocation2 + $0x211] sm:$0xff] %vm732_vm2, %v704_v4  ;;  %v719_v8 = vadd.f32 %v4555_v2, %v5872_v7  ;;  %v4915_v63 = vpack.i.bf16 %v6120_v62, %v1072_v61  ;;  %v4905_v2 = vpack.i.bf16 %v911_v56, %v910_v49 }
 0x10e   : > { %v713_v9 = vpop.f32.mrf.mxu0 }
 0x10f   : > { %4811 = vrot.lane.b32.xlu1 %v4810_v3, %s5444_s27  ;;  %v714_v11 = vadd.f32 %v5872_v7, %v713_v9  ;;  %862 = vst.msk [vmem:[#allocation2 + $0x241] sm:$0xff] %vm732_vm2, %v719_v8  ;;  %v1104_v3 = vld [vmem:[#allocation2 + $0x121] sm:$0xff]  ;;  %v4945_v8 = vpack.i.bf16 %v1103_v6, %v911_v56  ;;  %v993_v9 = vld [vmem:[#allocation2 + $0x11] sm:$0xff] }
 0x110   : > { %4786 = vrot.lane.b32.xlu0 %v4780_v31, %s5444_s27  ;;  %v4558_v30 = vpop.f32.mrf.mxu0  ;;  %v4925_v4 = vpack.i.bf16 %v5932_v33, %v1104_v3  ;;  %v1025_v33 = vld [vmem:[#allocation2 + $0x12] sm:$0xff] }
 0x111   : > { %861 = vst.msk [vmem:[#allocation2 + $0x231] sm:$0xff] %vm732_vm2, %v714_v11  ;;  %v729_v35 = vadd.f32 %v4558_v30, %v5872_v7  ;;  %v4955_v11 = vpack.i.bf16 %v993_v9, %v1103_v6  ;;  %v977_v30 = vld [vmem:[#allocation2 + $0x150] sm:$0xff] }
 0x112   : > { %v723_v40 = vpop.f32.mrf.mxu0  ;;  %v948_v56 = vld [vmem:[#allocation2 + $0x172] sm:$0xff] }
 0x113   : > { %4821 = vrot.lane.b32.xlu1 %v4820_v12, %s5443_s26  ;;  %864 = vst.msk [vmem:[#allocation2 + $0x261] sm:$0xff] %vm732_vm2, %v729_v35  ;;  %v724_v31 = vadd.f32 %v5872_v7, %v723_v40  ;;  %v4890_v7 = vpack.i.bf16 %v910_v49, %v1004_v32  ;;  %v1040_v12 = vld [vmem:[#allocation2 + $0x122] sm:$0xff]  ;;  %v1075_v40 = vld [vmem:[#allocation2 + $0x170] sm:$0xff] }
 0x114   : > { %4796 = vrot.lane.b32.xlu0 %v4795_v13, %s5443_s26  ;;  %v1039_v13 = vld [vmem:[#allocation2 + $0x112] sm:$0xff]  ;;  %v978_v32 = vld [vmem:[#allocation2 + $0x160] sm:$0xff] }
 0x115   : > { %863 = vst.msk [vmem:[#allocation2 + $0x251] sm:$0xff] %vm732_vm2, %v724_v31 }
 0x117   : > { %4831 = vrot.lane.b32.xlu1 %v4830_v18, %s5448_s22  ;;  %v4935_v18 = vpack.i.bf16 %v5908_v24, %v1040_v12  ;;  %v4985_v24 = vpack.i.bf16 %v978_v32, %v977_v30 }
 0x118   : > { %4806 = vrot.lane.b32.xlu0 %v4805_v19, %s5448_s22  ;;  %v4965_v19 = vpack.i.bf16 %v1025_v33, %v1039_v13 }
 0x11b   : > { %4841 = vrot.lane.b32.xlu1 %v4840_v22, %s5449_s29 }
 0x11c   : > { %4816 = vrot.lane.b32.xlu0 %v4815_v26, %s5446_s15  ;;  %v946_v26 = vld [vmem:[#allocation2 + $0x152] sm:$0xff] }
 0x11f   : > { %4851 = vrot.lane.b32.xlu1 %v4850_v28, %s5446_s15 }
 0x120   : > { %4826 = vrot.lane.b32.xlu0 %v4825_v29, %s5445_s14  ;;  %v4950_v29 = vpack.i.bf16 %v961_v27, %v1071_v23 }
 0x123   : > { %4861 = vrot.lane.b32.xlu1 %v4860_v41, %s5445_s14  ;;  %v1042_v41 = vld [vmem:[#allocation2 + $0x162] sm:$0xff] }
 0x124   : > { %4836 = vrot.lane.b32.xlu0 %v4835_v42, %s5447_s21  ;;  %v4995_v45 = vpack.i.bf16 %v1042_v41, %v946_v26 }
 0x127   : > { %4876 = vrot.lane.b32.xlu1 %v4875_v43, %s5446_s15  ;;  %v5000_v43 = vpack.i.bf16 %v1075_v40, %v978_v32 }
 0x128   : > { %4846 = vrot.lane.b32.xlu0 %v4840_v22, %s5444_s27  ;;  %v945_v22 = vld [vmem:[#allocation2 + $0x142] sm:$0xff] }
 0x129   : > { %v4980_v28 = vpack.i.bf16 %v946_v26, %v945_v22 }
 0x12b   : > { %4881 = vrot.lane.b32.xlu1 %v4880_v47, %s5447_s21  ;;  %v916_v47 = vld [vmem:[#allocation2 + $0x171] sm:$0xff] }
 0x12c   : > { %4856 = vrot.lane.b32.xlu0 %v4855_v48, %s5443_s26 }
 0x12f   : > { %4891 = vrot.lane.b32.xlu1 %v4890_v7, %s5444_s27 }
 0x130   : > { %4866 = vrot.lane.b32.xlu0 %v4865_v51, %s5448_s22 }
 0x133   : > { %4901 = vrot.lane.b32.xlu1 %v4900_v57, %s5443_s26 }
 0x134   : > { %4871 = vrot.lane.b32.xlu0 %v4870_v58, %s5444_s27 }
 0x137   : > { %4911 = vrot.lane.b32.xlu1 %v4910_v60, %s5448_s22 }
 0x138   : > { %4886 = vrot.lane.b32.xlu0 %v4890_v7, %s5449_s29  ;;  %v5010_v7 = vpack.i.bf16 %v916_v47, %v1010_v34 }
 0x13b   : > { %4916 = vrot.lane.b32.xlu1 %v4915_v63, %s5447_s21 }
 0x13c   : > { %4896 = vrot.lane.b32.xlu0 %v4895_v0, %s5446_s15  ;;  %v5015_v0 = vpack.i.bf16 %v948_v56, %v1042_v41 }
 0x13f   : > { %4926 = vrot.lane.b32.xlu1 %v4925_v4, %s5449_s29 }
 0x140   : > { %4906 = vrot.lane.b32.xlu0 %v4905_v2, %s5445_s14  ;;  %v1012_v2 = vld [vmem:[#allocation2 + $0x181] sm:$0xff] }
 0x143   : > { %4946 = vrot.lane.b32.xlu1 %v4945_v8, %s5449_s29 }
 0x144   : > { %4921 = vrot.lane.b32.xlu0 %v4915_v63, %s5443_s26  ;;  %v5020_v63 = vpack.i.bf16 %v980_v55, %v1075_v40 }
 0x147   : > { %4956 = vrot.lane.b32.xlu1 %v4955_v11, %s5445_s14 }
 0x148   : > { %4931 = vrot.lane.b32.xlu0 %v4925_v4, %s5445_s14  ;;  %v1044_v4 = vld [vmem:[#allocation2 + $0x182] sm:$0xff] }
 0x149   : > { %v5030_v33 = vpack.i.bf16 %v1044_v4, %v948_v56 }
 0x14b   : > { %4966 = vrot.lane.b32.xlu1 %v4965_v19, %s5448_s22 }
 0x14c   : > { %4936 = vrot.lane.b32.xlu0 %v4935_v18, %s5448_s22  ;;  %v1109_v18 = vld [vmem:[#allocation2 + $0x191] sm:$0xff] }
 0x14f   : > { %4976 = vrot.lane.b32.xlu1 %v4975_v20, %s5444_s27 }
 0x150   : > { %4941 = vrot.lane.b32.xlu0 %v4940_v25, %s5447_s21 }
 0x153   : > { %4981 = vrot.lane.b32.xlu1 %v4980_v28, %s5446_s15  ;;  %v5040_v28 = vpack.i.bf16 %v1109_v18, %v1012_v2 }
 0x154   : > { %4951 = vrot.lane.b32.xlu0 %v4950_v29, %s5443_s26 }
 0x157   : > { %4986 = vrot.lane.b32.xlu1 %v4985_v24, %s5443_s26  ;;  %v950_v24 = vld [vmem:[#allocation2 + $0x192] sm:$0xff] }
 0x158   : > { %4961 = vrot.lane.b32.xlu0 %v4955_v11, %s5444_s27 }
 0x159   : > { %v4707_v35 = vpop.permute.xlu1 %4706 }
 0x15a   : > { %v4697_v36 = vpop.permute.xlu0 %4696  ;;  %v4708_v59 = vunpack.i.l.bf16 %v4707_v35  ;;  %v4709_v9 = vunpack.i.h.bf16 %v4707_v35 }
 0x15b   : > { %4991 = vrot.lane.b32.xlu1 %v4990_v39, %s5445_s14  ;;  %v4698_v46 = vunpack.i.l.bf16 %v4697_v36  ;;  %v4699_v51 = vunpack.i.h.bf16 %v4697_v36 }
 0x15c   : > { %4971 = vrot.lane.b32.xlu0 %v4965_v19, %s5446_s15  ;;  %v1077_v19 = vld [vmem:[#allocation2 + $0x190] sm:$0xff] }
 0x15d   : > { %v4712_v42 = vpop.permute.xlu1 %4711  ;;  %v2052_v52 = vsel %vm732_vm2, %v6120_v62, %v4698_v46  ;;  %v2053_v62 = vsel %vm732_vm2, %v5941_v37, %v4699_v51  ;;  %v5025_v37 = vpack.i.bf16 %v1012_v2, %v916_v47  ;;  %v5035_v29 = vpack.i.bf16 %v1077_v19, %v980_v55 }
 0x15e   : > { %v4702_v31 = vpop.permute.xlu0 %4701  ;;  %v4713_v6 = vunpack.i.l.bf16 %v4712_v42  ;;  %v4714_v20 = vunpack.i.h.bf16 %v4712_v42 }
 0x15f   : > { %v4703_v48 = vunpack.i.l.bf16 %v4702_v31  ;;  %5001 = vrot.lane.b32.xlu1 %v5000_v43, %s5447_s21  ;;  %v4704_v57 = vunpack.i.h.bf16 %v4702_v31  ;;  %v5050_v31 = vpack.i.bf16 %v950_v24, %v1044_v4  ;;  %v1014_v43 = vld [vmem:[#allocation2 + $0x1a1] sm:$0xff] }
 0x160   : > { %4996 = vrot.lane.b32.xlu0 %v4995_v45, %s5448_s22  ;;  %v982_v45 = vld [vmem:[#allocation2 + $0x1a0] sm:$0xff]  ;;  %v5060_v55 = vpack.i.bf16 %v1014_v43, %v1109_v18 }
 0x161   : > { %v6145_v49 = vpop.permute.xlu1 %4731  ;;  %v2085_v58 = vsel %vm2082_vm5, %v2052_v52, %v4703_v48  ;;  %v2086_v8 = vsel %vm2082_vm5, %v2053_v62, %v4704_v57  ;;  %v5055_v56 = vpack.i.bf16 %v982_v45, %v1077_v19  ;;  %v1080_v62 = vld [vmem:[#allocation2 + $0x1c0] sm:$0xff] }
 0x162   : > { %v4717_v50 = vpop.permute.xlu0 %4716  ;;  %v2118_v3 = vsel %vm2115_vm6, %v2085_v58, %v4708_v59  ;;  %v2119_v15 = vsel %vm2115_vm6, %v2086_v8, %v4709_v9  ;;  %v4733_v23 = vunpack.i.l.bf16 %v6145_v49  ;;  %v4734_v34 = vunpack.i.h.bf16 %v6145_v49  ;;  %v6197_v58 = vld [vmem:[#allocation2 + $0x1a2] sm:$0xff] }
 0x163   : > { %5011 = vrot.lane.b32.xlu1 %v5010_v7, %s5444_s27  ;;  %v4718_v11 = vunpack.i.l.bf16 %v4717_v50  ;;  %v2151_v14 = vsel %vm2148_vm7, %v2118_v3, %v4713_v6  ;;  %v4719_v25 = vunpack.i.h.bf16 %v4717_v50  ;;  %v2152_v30 = vsel %vm2148_vm7, %v2119_v15, %v4714_v20  ;;  %v6190_v50 = vld [vmem:[#allocation2 + $0x1c1] sm:$0xff]  ;;  %v1081_v3 = vld [vmem:[#allocation2 + $0x1d0] sm:$0xff] }
 0x164   : > { %5006 = vrot.lane.b32.xlu0 %v5010_v7, %s5449_s29  ;;  %v1113_v7 = vld [vmem:[#allocation2 + $0x1d1] sm:$0xff] }
 0x165   : > { %v6152_v60 = vpop.permute.xlu1 %4741  ;;  %v2184_v22 = vsel %vm2181_vm8, %v2151_v14, %v4718_v11  ;;  %v2185_v40 = vsel %vm2181_vm8, %v2152_v30, %v4719_v25  ;;  %v1079_v11 = vld [vmem:[#allocation2 + $0x1b0] sm:$0xff] }
 0x166   : > { %v6154_v61 = vpop.permute.xlu0 %4721  ;;  %v2217_v35 = vsel %vm2214_vm9, %v2184_v22, %v4733_v23  ;;  %v4743_v46 = vunpack.i.l.bf16 %v6152_v60  ;;  %v2218_v47 = vsel %vm2214_vm9, %v2185_v40, %v4734_v34  ;;  %v4744_v51 = vunpack.i.h.bf16 %v6152_v60 }
 0x167   : > { %5021 = vrot.lane.b32.xlu1 %v5020_v63, %s5443_s26  ;;  %v5075_v60 = vpack.i.bf16 %v1113_v7, %v6190_v50  ;;  %v5080_v23 = vpack.i.bf16 %v1079_v11, %v982_v45  ;;  %v952_v45 = vld [vmem:[#allocation2 + $0x1b2] sm:$0xff] }
 0x168   : > { %5016 = vrot.lane.b32.xlu0 %v5015_v0, %s5446_s15  ;;  %v2054_v59 = vsel %vm732_vm2, %v5943_v38, %v4743_v46  ;;  %v2055_v4 = vsel %vm732_vm2, %v5970_v54, %v4744_v51  ;;  %v5065_v38 = vpack.i.bf16 %v6197_v58, %v950_v24  ;;  %v5070_v54 = vpack.i.bf16 %v1081_v3, %v1080_v62  ;;  %v6257_v3 = vld [vmem:[#allocation2 + $0x1f2] sm:$0xff] }
 0x169   : > { %v6162_v12 = vpop.permute.xlu1 %4751  ;;  %v5100_v51 = vpack.i.bf16 %v1080_v62, %v1079_v11  ;;  %v953_v62 = vld [vmem:[#allocation2 + $0x1e2] sm:$0xff] }
 0x16a   : > { %v6164_v13 = vpop.permute.xlu0 %4726  ;;  %v921_v11 = vld [vmem:[#allocation2 + $0x1e1] sm:$0xff] }
 0x16b   : > { %5031 = vrot.lane.b32.xlu1 %v5030_v33, %s5448_s22  ;;  %v4754_v33 = vunpack.i.h.bf16 %v6162_v12 }
 0x16c   : > { %5026 = vrot.lane.b32.xlu0 %v5025_v37, %s5445_s14 }
 0x16d   : > { %v6172_v26 = vpop.permute.xlu1 %4761 }
 0x16e   : > { %v4737_v27 = vpop.permute.xlu0 %4736  ;;  %v4763_v15 = vunpack.i.l.bf16 %v6172_v26 }
 0x16f   : > { %v4738_v32 = vunpack.i.l.bf16 %v4737_v27  ;;  %5041 = vrot.lane.b32.xlu1 %v5040_v28, %s5449_s29  ;;  %v4739_v36 = vunpack.i.h.bf16 %v4737_v27  ;;  %v920_v27 = vld [vmem:[#allocation2 + $0x1b1] sm:$0xff] }
 0x170   : > { %5036 = vrot.lane.b32.xlu0 %v5035_v29, %s5447_s21 }
 0x171   : > { %v2250_v39 = vsel %vm2247_vm10, %v2217_v35, %v4738_v32  ;;  %v6181_v41 = vpop.permute.xlu1 %4766  ;;  %v2251_v49 = vsel %vm2247_vm10, %v2218_v47, %v4739_v36  ;;  %v5090_v36 = vpack.i.bf16 %v920_v27, %v1014_v43 }
 0x172   : > { %v4747_v42 = vpop.permute.xlu0 %4746  ;;  %2476 = vmatmul.mubr.f32.vlgmr.msra.gmra.mxu1 %v2250_v39 }
 0x173   : > { %4313 = vmatprep.mubr.msk.f32.mxu1 %vm732_vm2, %v6028_v21  ;;  %5051 = vrot.lane.b32.xlu1 %v5050_v31, %s5446_s15  ;;  %v4748_v48 = vunpack.i.l.bf16 %v4747_v42  ;;  %v4749_v57 = vunpack.i.h.bf16 %v4747_v42 }
 0x174   : > { %5046 = vrot.lane.b32.xlu0 %v5040_v28, %s5444_s27  ;;  %v4764_v28 = vunpack.i.h.bf16 %v6172_v26 }
 0x175   : > { %v6193_v52 = vpop.permute.xlu1 %4781  ;;  %v2087_v63 = vsel %vm2082_vm5, %v2054_v59, %v4748_v48  ;;  %v2088_v8 = vsel %vm2082_vm5, %v2055_v4, %v4749_v57 }
 0x176   : > { %v4757_v21 = vpop.permute.xlu0 %4756  ;;  %2481 = vmatmul.mubr.f32.gmra.mxu1 %v2251_v49  ;;  %v2121_v18 = vsel %vm2115_vm6, %v2088_v8, %v4754_v33  ;;  %v4783_v29 = vunpack.i.l.bf16 %v6193_v52  ;;  %v4784_v31 = vunpack.i.h.bf16 %v6193_v52  ;;  %v922_v33 = vld [vmem:[#allocation2 + $0x1f1] sm:$0xff] }
 0x177   : > { %4314 = vmatprep.mubr.msk.f32.mxu1 %vm732_vm2, %v6021_v17  ;;  %5061 = vrot.lane.b32.xlu1 %v5060_v55, %s5445_s14  ;;  %v4758_v0 = vunpack.i.l.bf16 %v4757_v21  ;;  %v4753_v17 = vunpack.i.l.bf16 %v6162_v12  ;;  %v4759_v9 = vunpack.i.h.bf16 %v4757_v21  ;;  %v5095_v55 = vpack.i.bf16 %v952_v45, %v6197_v58 }
 0x178   : > { %5056 = vrot.lane.b32.xlu0 %v5055_v56, %s5443_s26  ;;  %v1048_v56 = vld [vmem:[#allocation2 + $0x1c2] sm:$0xff] }
 0x179   : > { %v4792_v2 = vpop.permute.xlu1 %4791  ;;  %v2120_v37 = vsel %vm2115_vm6, %v2087_v63, %v4753_v17  ;;  %v2154_v25 = vsel %vm2148_vm7, %v2121_v18, %v4759_v9 }
 0x17a   : > { %v6208_v6 = vpop.permute.xlu0 %4771  ;;  %v2153_v14 = vsel %vm2148_vm7, %v2120_v37, %v4758_v0  ;;  %v2187_v39 = vsel %vm2181_vm8, %v2154_v25, %v4764_v28  ;;  %v4793_v43 = vunpack.i.l.bf16 %v4792_v2  ;;  %v4794_v52 = vunpack.i.h.bf16 %v4792_v2  ;;  %v873_v37 = vld [vmem:[#allocation2 + $0xa0] sm:$0xff] }
 0x17b   : > { %5076 = vrot.lane.b32.xlu1 %v5075_v60, %s5449_s29  ;;  %v2186_v30 = vsel %vm2181_vm8, %v2153_v14, %v4763_v15  ;;  %v5110_v0 = vpack.i.bf16 %v1048_v56, %v952_v45  ;;  %v5105_v2 = vpack.i.bf16 %v6190_v50, %v920_v27  ;;  %v5120_v14 = vpack.i.bf16 %v6257_v3, %v953_v62 }
 0x17c   : > { %5066 = vrot.lane.b32.xlu0 %v5065_v38, %s5448_s22  ;;  %v4768_v38 = vunpack.i.l.bf16 %v6181_v41  ;;  %v4773_v50 = vunpack.i.l.bf16 %v6208_v6  ;;  %v5115_v28 = vpack.i.bf16 %v922_v33, %v921_v11 }
 0x17d   : > { %v6219_v19 = vpop.permute.xlu1 %4801 }
 0x17e   : > { %v4777_v20 = vpop.permute.xlu0 %4776  ;;  %v4803_v59 = vunpack.i.l.bf16 %v6219_v19 }
 0x17f   : > { %v4779_v12 = vunpack.i.h.bf16 %v4777_v20  ;;  %v4778_v22 = vunpack.i.l.bf16 %v4777_v20  ;;  %5081 = vrot.lane.b32.xlu1 %v5080_v23, %s5447_s21 }
 0x180   : > { %5071 = vrot.lane.b32.xlu0 %v5070_v54, %s5447_s21 }
 0x181   : > { %v2219_v32 = vsel %vm2214_vm9, %v2186_v30, %v4778_v22  ;;  %v6228_v24 = vpop.permute.xlu1 %4811  ;;  %v2220_v42 = vsel %vm2214_vm9, %v2187_v39, %v4779_v12  ;;  %v4769_v12 = vunpack.i.h.bf16 %v6181_v41  ;;  %v1018_v30 = vld [vmem:[#allocation2 + $0x201] sm:$0xff]  ;;  %v4774_v39 = vunpack.i.h.bf16 %v6208_v6 }
 0x182   : > { %v4787_v34 = vpop.permute.xlu0 %4786  ;;  %v2252_v35 = vsel %vm2247_vm10, %v2219_v32, %v4783_v29  ;;  %v2253_v7 = vsel %vm2247_vm10, %v2220_v42, %v4784_v31  ;;  %v4813_v8 = vunpack.i.l.bf16 %v6228_v24  ;;  %v4814_v18 = vunpack.i.h.bf16 %v6228_v24  ;;  %v1129_v29 = vld [vmem:[#allocation2 + $0x92] sm:$0xff] }
 0x183   : > { %v4789_v40 = vunpack.i.h.bf16 %v4787_v34  ;;  %v4788_v26 = vunpack.i.l.bf16 %v4787_v34  ;;  %2486 = vmatmul.mubr.f32.gmra.mxu1 %v2252_v35  ;;  %5091 = vrot.lane.b32.xlu1 %v5090_v36, %s5444_s27  ;;  %v6279_v24 = vld [vmem:[#allocation2 + $0x1f0] sm:$0xff]  ;;  %v986_v35 = vld [vmem:[#allocation2 + $0x200] sm:$0xff]  ;;  %v5130_v45 = vpack.i.bf16 %v1018_v30, %v922_v33 }
 0x184   : > { %4315 = vmatprep.mubr.msk.f32.mxu1 %vm732_vm2, %v6055_v44  ;;  %5086 = vrot.lane.b32.xlu0 %v5090_v36, %s5449_s29  ;;  %v2058_v32 = vsel %vm732_vm2, %v873_v37, %v4813_v8  ;;  %v6323_v33 = vld [vmem:[#allocation2 + $0x220] sm:$0xff] }
 0x185   : > { %v2056_v46 = vsel %vm732_vm2, %v6005_v10, %v4788_v26  ;;  %v2057_v47 = vsel %vm732_vm2, %v6065_v53, %v4789_v40  ;;  %v6242_v48 = vpop.permute.xlu1 %4821  ;;  %v2059_v40 = vsel %vm732_vm2, %v6081_v5, %v4814_v18 }
 0x186   : > { %v4797_v49 = vpop.permute.xlu0 %4796  ;;  %v2089_v10 = vsel %vm2082_vm5, %v2056_v46, %v4793_v43  ;;  %v2090_v53 = vsel %vm2082_vm5, %v2057_v47, %v4794_v52  ;;  %v4823_v26 = vunpack.i.l.bf16 %v6242_v48  ;;  %v4824_v6 = vunpack.i.h.bf16 %v6242_v48  ;;  %v6299_v52 = vld [vmem:[#allocation2 + $0x202] sm:$0xff] }
 0x187   : > { %v4799_v44 = vunpack.i.h.bf16 %v4797_v49  ;;  %v4798_v21 = vunpack.i.l.bf16 %v4797_v49  ;;  %2491 = vmatmul.mubr.f32.gmra.mxu1 %v2253_v7  ;;  %5101 = vrot.lane.b32.xlu1 %v5100_v51, %s5443_s26  ;;  %v5125_v49 = vpack.i.bf16 %v986_v35, %v6279_v24  ;;  %v6293_v7 = vld [vmem:[#allocation2 + $0x210] sm:$0xff] }
 0x188   : > { %4316 = vmatprep.mubr.msk.f32.mxu1 %vm732_vm2, %v6092_v16  ;;  %5096 = vrot.lane.b32.xlu0 %v5095_v55, %s5446_s15  ;;  %v4804_v16 = vunpack.i.h.bf16 %v6219_v19 }
 0x189   : > { %v2122_v57 = vsel %vm2115_vm6, %v2089_v10, %v4798_v21  ;;  %v2123_v60 = vsel %vm2115_vm6, %v2090_v53, %v4799_v44  ;;  %v6255_v63 = vpop.permute.xlu1 %4831  ;;  %v1130_v21 = vld [vmem:[#allocation2 + $0xc2] sm:$0xff]  ;;  %v5140_v53 = vpack.i.bf16 %v6293_v7, %v986_v35 }
 0x18a   : > { %v4807_v58 = vpop.permute.xlu0 %4806  ;;  %v2155_v9 = vsel %vm2148_vm7, %v2122_v57, %v4803_v59  ;;  %v2156_v15 = vsel %vm2148_vm7, %v2123_v60, %v4804_v16  ;;  %v4833_v55 = vunpack.i.l.bf16 %v6255_v63  ;;  %v4834_v62 = vunpack.i.h.bf16 %v6255_v63  ;;  %v1131_v63 = vld [vmem:[#allocation2 + $0xd2] sm:$0xff] }
 0x18b   : > { %v4809_v4 = vunpack.i.h.bf16 %v4807_v58  ;;  %v4808_v17 = vunpack.i.l.bf16 %v4807_v58  ;;  %5111 = vrot.lane.b32.xlu1 %v5110_v0, %s5448_s22  ;;  %v5135_v58 = vpack.i.bf16 %v6299_v52, %v6257_v3  ;;  %v924_v0 = vld [vmem:[#allocation2 + $0x211] sm:$0xff] }
 0x18c   : > { %5106 = vrot.lane.b32.xlu0 %v5105_v2, %s5445_s14 }
 0x18d   : > { %v2188_v54 = vsel %vm2181_vm8, %v2155_v9, %v4808_v17  ;;  %v6271_v19 = vpop.permute.xlu1 %4841  ;;  %v2189_v25 = vsel %vm2181_vm8, %v2156_v15, %v4809_v4  ;;  %v5150_v9 = vpack.i.bf16 %v924_v0, %v1018_v30 }
 0x18e   : > { %v4817_v20 = vpop.permute.xlu0 %4816  ;;  %v2221_v23 = vsel %vm2214_vm9, %v2188_v54, %v4768_v38  ;;  %v2222_v41 = vsel %vm2214_vm9, %v2189_v25, %v4769_v12  ;;  %v4843_v16 = vunpack.i.l.bf16 %v6271_v19  ;;  %v4844_v37 = vunpack.i.h.bf16 %v6271_v19  ;;  %v6328_v54 = vld [vmem:[#allocation2 + $0x212] sm:$0xff]  ;;  %v6338_v25 = vld [vmem:[#allocation2 + $0x222] sm:$0xff] }
 0x18f   : > { %v4819_v22 = vunpack.i.h.bf16 %v4817_v20  ;;  %v4818_v27 = vunpack.i.l.bf16 %v4817_v20  ;;  %v2254_v34 = vsel %vm2247_vm10, %v2221_v23, %v4773_v50  ;;  %5121 = vrot.lane.b32.xlu1 %v5120_v14, %s5446_s15  ;;  %v2255_v51 = vsel %vm2247_vm10, %v2222_v41, %v4774_v39  ;;  %v1132_v23 = vld [vmem:[#allocation2 + $0xe2] sm:$0xff]  ;;  %v1117_v41 = vld [vmem:[#allocation2 + $0x231] sm:$0xff] }
 0x190   : > { %2496 = vmatmul.mubr.f32.gmra.mxu1 %v2254_v34  ;;  %5116 = vrot.lane.b32.xlu0 %v5115_v28, %s5444_s27  ;;  %v5160_v20 = vpack.i.bf16 %v6323_v33, %v6293_v7  ;;  %v5155_v19 = vpack.i.bf16 %v6328_v54, %v6299_v52  ;;  %v875_v12 = vld [vmem:[#allocation2 + $0xc0] sm:$0xff]  ;;  %v5170_v35 = vpack.i.bf16 %v6338_v25, %v6328_v54  ;;  %v876_v39 = vld [vmem:[#allocation2 + $0xd0] sm:$0xff] }
 0x191   : > { %v2091_v36 = vsel %vm2082_vm5, %v2058_v32, %v4818_v27  ;;  %v6288_v42 = vpop.permute.xlu1 %4851  ;;  %4317 = vmatprep.mubr.msk.f32.mxu1 %vm732_vm2, %v1129_v29  ;;  %v2092_v46 = vsel %vm2082_vm5, %v2059_v40, %v4819_v22  ;;  %v1020_v22 = vld [vmem:[#allocation2 + $0x221] sm:$0xff] }
 0x192   : > { %v4827_v31 = vpop.permute.xlu0 %4826  ;;  %v2124_v5 = vsel %vm2115_vm6, %v2091_v36, %v4823_v26  ;;  %v2125_v56 = vsel %vm2115_vm6, %v2092_v46, %v4824_v6  ;;  %v4853_v30 = vunpack.i.l.bf16 %v6288_v42  ;;  %v5165_v36 = vpack.i.bf16 %v1020_v22, %v924_v0  ;;  %v6351_v26 = vld [vmem:[#allocation2 + $0x230] sm:$0xff] }
 0x193   : > { %v4829_v43 = vunpack.i.h.bf16 %v4827_v31  ;;  %v4828_v47 = vunpack.i.l.bf16 %v4827_v31  ;;  %5131 = vrot.lane.b32.xlu1 %v5130_v45, %s5445_s14 }
 0x194   : > { %2501 = vmatmul.mubr.f32.gmra.mxu1 %v2255_v51  ;;  %5126 = vrot.lane.b32.xlu0 %v5125_v49, %s5443_s26  ;;  %v5180_v51 = vpack.i.bf16 %v1117_v41, %v1020_v22  ;;  %v1134_v22 = vld [vmem:[#allocation2 + $0x102] sm:$0xff] }
 0x195   : > { %v2157_v44 = vsel %vm2148_vm7, %v2124_v5, %v4828_v47  ;;  %4318 = vmatprep.mubr.msk.f32.mxu1 %vm732_vm2, %v1130_v21  ;;  %v6306_v48 = vpop.permute.xlu1 %4861  ;;  %v2158_v57 = vsel %vm2148_vm7, %v2125_v56, %v4829_v43  ;;  %v4854_v47 = vunpack.i.h.bf16 %v6288_v42  ;;  %v6364_v21 = vld [vmem:[#allocation2 + $0x232] sm:$0xff] }
 0x196   : > { %v4837_v10 = vpop.permute.xlu0 %4836  ;;  %v2190_v4 = vsel %vm2181_vm8, %v2157_v44, %v4833_v55  ;;  %v2191_v3 = vsel %vm2181_vm8, %v2158_v57, %v4834_v62  ;;  %v4863_v49 = vunpack.i.l.bf16 %v6306_v48  ;;  %v5175_v44 = vpack.i.bf16 %v6351_v26, %v6323_v33 }
 0x197   : > { %v4839_v59 = vunpack.i.h.bf16 %v4837_v10  ;;  %v4838_v60 = vunpack.i.l.bf16 %v4837_v10  ;;  %5141 = vrot.lane.b32.xlu1 %v5140_v53, %s5447_s21  ;;  %v4864_v57 = vunpack.i.h.bf16 %v6306_v48  ;;  %v5190_v0 = vpack.i.bf16 %v6364_v21, %v6338_v25 }
 0x198   : > { %5136 = vrot.lane.b32.xlu0 %v5135_v58, %s5448_s22 }
 0x199   : > { %v2223_v17 = vsel %vm2214_vm9, %v2190_v4, %v4838_v60  ;;  %v6318_v2 = vpop.permute.xlu1 %4876  ;;  %v2224_v11 = vsel %vm2214_vm9, %v2191_v3, %v4839_v59 }
 0x19a   : > { %v4847_v38 = vpop.permute.xlu0 %4846  ;;  %v2256_v8 = vsel %vm2247_vm10, %v2223_v17, %v4843_v16  ;;  %v2257_v18 = vsel %vm2247_vm10, %v2224_v11, %v4844_v37  ;;  %v1022_v16 = vld [vmem:[#allocation2 + $0x241] sm:$0xff]  ;;  %v1133_v37 = vld [vmem:[#allocation2 + $0xf2] sm:$0xff] }
 0x19b   : > { %2506 = vmatmul.mubr.f32.gmra.mxu1 %v2256_v8  ;;  %5151 = vrot.lane.b32.xlu1 %v5150_v9, %s5444_s27  ;;  %v4848_v14 = vunpack.i.l.bf16 %v4847_v38  ;;  %v4849_v27 = vunpack.i.h.bf16 %v4847_v38  ;;  %v6380_v17 = vld [vmem:[#allocation2 + $0x240] sm:$0xff] }
 0x19c   : > { %4319 = vmatprep.mubr.msk.f32.mxu1 %vm732_vm2, %v1131_v63  ;;  %5146 = vrot.lane.b32.xlu0 %v5150_v9, %s5449_s29 }
 0x19d   : > { %v6331_v15 = vpop.permute.xlu1 %4881  ;;  %v2060_v28 = vsel %vm732_vm2, %v875_v12, %v4848_v14  ;;  %v2061_v31 = vsel %vm732_vm2, %v876_v39, %v4849_v27  ;;  %v5200_v14 = vpack.i.bf16 %v1022_v16, %v1117_v41 }
 0x19e   : > { %v4857_v50 = vpop.permute.xlu0 %4856  ;;  %v2093_v40 = vsel %vm2082_vm5, %v2060_v28, %v4853_v30  ;;  %v2094_v55 = vsel %vm2082_vm5, %v2061_v31, %v4854_v47  ;;  %v4883_v59 = vunpack.i.l.bf16 %v6331_v15  ;;  %v4884_v3 = vunpack.i.h.bf16 %v6331_v15 }
 0x19f   : > { %2511 = vmatmul.mubr.f32.gmra.mxu1 %v2257_v18  ;;  %5161 = vrot.lane.b32.xlu1 %v5160_v20, %s5443_s26  ;;  %v4858_v29 = vunpack.i.l.bf16 %v4857_v50  ;;  %v4859_v45 = vunpack.i.h.bf16 %v4857_v50  ;;  %v5195_v50 = vpack.i.bf16 %v6380_v17, %v6351_v26  ;;  %v6392_v18 = vld [vmem:[#allocation2 + $0x250] sm:$0xff] }
 0x1a0   : > { %4320 = vmatprep.mubr.msk.f32.mxu1 %vm732_vm2, %v1132_v23  ;;  %5156 = vrot.lane.b32.xlu0 %v5155_v19, %s5446_s15  ;;  %v6396_v23 = vld [vmem:[#allocation2 + $0x242] sm:$0xff]  ;;  %v5210_v27 = vpack.i.bf16 %v6392_v18, %v6380_v17 }
 0x1a1   : > { %v6345_v32 = vpop.permute.xlu1 %4891  ;;  %v2126_v46 = vsel %vm2115_vm6, %v2093_v40, %v4858_v29  ;;  %v2127_v42 = vsel %vm2115_vm6, %v2094_v55, %v4859_v45  ;;  %v5205_v28 = vpack.i.bf16 %v6396_v23, %v6364_v21  ;;  %v928_v29 = vld [vmem:[#allocation2 + $0x251] sm:$0xff] }
 0x1a2   : > { %v4867_v34 = vpop.permute.xlu0 %4866  ;;  %v2159_v56 = vsel %vm2148_vm7, %v2126_v46, %v4863_v49  ;;  %v2160_v38 = vsel %vm2148_vm7, %v2127_v42, %v4864_v57  ;;  %v4893_v41 = vunpack.i.l.bf16 %v6345_v32  ;;  %v4894_v31 = vunpack.i.h.bf16 %v6345_v32  ;;  %v1024_v57 = vld [vmem:[#allocation2 + $0x261] sm:$0xff] }
 0x1a3   : > { %5171 = vrot.lane.b32.xlu1 %v5170_v35, %s5448_s22  ;;  %v4868_v43 = vunpack.i.l.bf16 %v4867_v34  ;;  %v4869_v10 = vunpack.i.h.bf16 %v4867_v34  ;;  %v5220_v35 = vpack.i.bf16 %v928_v29, %v1022_v16 }
 0x1a4   : > { %5166 = vrot.lane.b32.xlu0 %v5165_v36, %s5445_s14  ;;  %v1088_v36 = vld [vmem:[#allocation2 + $0x260] sm:$0xff] }
 0x1a5   : > { %v6358_v6 = vpop.permute.xlu1 %4901  ;;  %v2192_v53 = vsel %vm2181_vm8, %v2159_v56, %v4868_v43  ;;  %v2193_v9 = vsel %vm2181_vm8, %v2160_v38, %v4869_v10  ;;  %v5230_v39 = vpack.i.bf16 %v1088_v36, %v6392_v18  ;;  %v877_v43 = vld [vmem:[#allocation2 + $0xe0] sm:$0xff] }
 0x1a6   : > { %v6360_v5 = vpop.permute.xlu0 %4871  ;;  %v2225_v4 = vsel %vm2214_vm9, %v2192_v53, %v4883_v59  ;;  %v2226_v20 = vsel %vm2214_vm9, %v2193_v9, %v4884_v3  ;;  %v2062_v49 = vsel %vm732_vm2, %v877_v43, %v4893_v41  ;;  %v4903_v42 = vunpack.i.l.bf16 %v6358_v6  ;;  %v865_v38 = vld [vmem:[#allocation2] sm:$0xff] }
 0x1a7   : > { %5181 = vrot.lane.b32.xlu1 %v5180_v51, %s5449_s29  ;;  %v4874_v16 = vunpack.i.h.bf16 %v6360_v5  ;;  %v5235_v9 = vpack.i.bf16 %v1024_v57, %v928_v29  ;;  %v4724_v41 = vunpack.i.h.bf16 %v6154_v61  ;;  %v6464_v43 = vld [vmem:[#allocation2 + $0x262] sm:$0xff] }
 0x1a8   : > { %5176 = vrot.lane.b32.xlu0 %v5175_v44, %s5447_s21  ;;  %v878_v44 = vld [vmem:[#allocation2 + $0xf0] sm:$0xff] }
 0x1a9   : > { %v6374_v60 = vpop.permute.xlu1 %4911  ;;  %v2063_v32 = vsel %vm732_vm2, %v878_v44, %v4894_v31 }
 0x1aa   : > { %v4887_v58 = vpop.permute.xlu0 %4886  ;;  %v4913_v3 = vunpack.i.l.bf16 %v6374_v60 }
 0x1ab   : > { %v4888_v62 = vunpack.i.l.bf16 %v4887_v58  ;;  %5191 = vrot.lane.b32.xlu1 %v5190_v0, %s5446_s15  ;;  %v4889_v8 = vunpack.i.h.bf16 %v4887_v58 }
 0x1ac   : > { %5186 = vrot.lane.b32.xlu0 %v5180_v51, %s5444_s27  ;;  %v6424_v51 = vld [vmem:[#allocation2 + $0x252] sm:$0xff] }
 0x1ad   : > { %v2258_v48 = vsel %vm2247_vm10, %v2225_v4, %v4888_v62  ;;  %v6387_v63 = vpop.permute.xlu1 %4916  ;;  %v2259_v15 = vsel %vm2247_vm10, %v2226_v20, %v4889_v8  ;;  %v5225_v0 = vpack.i.bf16 %v6424_v51, %v6396_v23  ;;  %v4904_v62 = vunpack.i.h.bf16 %v6358_v6 }
 0x1ae   : > { %v4897_v11 = vpop.permute.xlu0 %4896  ;;  %2516 = vmatmul.mubr.f32.gmra.mxu1 %v2258_v48  ;;  %v4873_v8 = vunpack.i.l.bf16 %v6360_v5  ;;  %v4914_v5 = vunpack.i.h.bf16 %v6374_v60 }
 0x1af   : > { %4321 = vmatprep.mubr.msk.f32.mxu1 %vm732_vm2, %v1133_v37  ;;  %5201 = vrot.lane.b32.xlu1 %v5200_v14, %s5445_s14  ;;  %v4898_v40 = vunpack.i.l.bf16 %v4897_v11  ;;  %v4899_v47 = vunpack.i.h.bf16 %v4897_v11 }
 0x1b0   : > { %5196 = vrot.lane.b32.xlu0 %v5195_v50, %s5443_s26 }
 0x1b1   : > { %v6400_v19 = vpop.permute.xlu1 %4926  ;;  %v2095_v55 = vsel %vm2082_vm5, %v2062_v49, %v4898_v40  ;;  %v2096_v59 = vsel %vm2082_vm5, %v2063_v32, %v4899_v47 }
 0x1b2   : > { %v4907_v12 = vpop.permute.xlu0 %4906  ;;  %2521 = vmatmul.mubr.f32.gmra.mxu1 %v2259_v15  ;;  %v2128_v4 = vsel %vm2115_vm6, %v2095_v55, %v4903_v42  ;;  %v2129_v11 = vsel %vm2115_vm6, %v2096_v59, %v4904_v62  ;;  %v879_v15 = vld [vmem:[#allocation2 + $0x100] sm:$0xff] }
 0x1b3   : > { %4322 = vmatprep.mubr.msk.f32.mxu1 %vm732_vm2, %v1134_v22  ;;  %5211 = vrot.lane.b32.xlu1 %v5210_v27, %s5447_s21  ;;  %v4908_v56 = vunpack.i.l.bf16 %v4907_v12  ;;  %v4909_v58 = vunpack.i.h.bf16 %v4907_v12  ;;  %v2050_v12 = vsel %vm732_vm2, %v865_v38, %v4874_v16  ;;  %v2064_v29 = vsel %vm732_vm2, %v879_v15, %v4873_v8 }
 0x1b4   : > { %5206 = vrot.lane.b32.xlu0 %v5205_v28, %s5448_s22  ;;  %v4879_v28 = vunpack.i.h.bf16 %v6318_v2 }
 0x1b5   : > { %v6409_v30 = vpop.permute.xlu1 %4946  ;;  %v2161_v48 = vsel %vm2148_vm7, %v2128_v4, %v4908_v56  ;;  %v2162_v14 = vsel %vm2148_vm7, %v2129_v11, %v4909_v58  ;;  %v1135_v56 = vld [vmem:[#allocation2 + $0x112] sm:$0xff]  ;;  %v4723_v58 = vunpack.i.l.bf16 %v6154_v61  ;;  %v4728_v11 = vunpack.i.l.bf16 %v6164_v13 }
 0x1b6   : > { %v6411_v34 = vpop.permute.xlu0 %4921  ;;  %v4948_v22 = vunpack.i.l.bf16 %v6409_v30  ;;  %v2194_v27 = vsel %vm2181_vm8, %v2161_v48, %v4913_v3  ;;  %v2195_v47 = vsel %vm2181_vm8, %v2162_v14, %v4914_v5  ;;  %v2083_v49 = vsel %vm2082_vm5, %v2050_v12, %v4879_v28  ;;  %v1121_v48 = vld [vmem:[#allocation2 + $0x271] sm:$0xff] }
 0x1b7   : > { %5221 = vrot.lane.b32.xlu1 %v5220_v35, %s5444_s27  ;;  %v4949_v42 = vunpack.i.h.bf16 %v6409_v30  ;;  %v4729_v3 = vunpack.i.h.bf16 %v6164_v13  ;;  %v4918_v14 = vunpack.i.l.bf16 %v6387_v63  ;;  %v4928_v5 = vunpack.i.l.bf16 %v6400_v19 }
 0x1b8   : > { %1886 = vrot.lane.b32.xlu0 %v1088_v36, %s5447_s21  ;;  %v1089_v36 = vld [vmem:[#allocation2 + $0x270] sm:$0xff] }
 0x1b9   : > { %v6420_v46 = vpop.permute.xlu1 %4956 }
 0x1ba   : > { %v6418_v45 = vpop.permute.xlu0 %4931 }
 0x1bb   : > { %5231 = vrot.lane.b32.xlu1 %v5230_v39, %s5443_s26  ;;  %v4878_v39 = vunpack.i.l.bf16 %v6318_v2  ;;  %v4959_v2 = vunpack.i.h.bf16 %v6420_v46 }
 0x1bc   : > { %5216 = vrot.lane.b32.xlu0 %v5220_v35, %s5449_s29 }
 0x1bd   : > { %v6432_v53 = vpop.permute.xlu1 %4966  ;;  %v2097_v59 = vsel %vm2082_vm5, %v2064_v29, %v4878_v39 }
 0x1be   : > { %v6430_v10 = vpop.permute.xlu0 %4936  ;;  %v4968_v30 = vunpack.i.l.bf16 %v6432_v53 }
 0x1bf   : > { %1758 = vrot.lane.b32.xlu1 %v6424_v51, %s5448_s22 }
 0x1c0   : > { %5226 = vrot.lane.b32.xlu0 %v5225_v0, %s5446_s15  ;;  %v4969_v0 = vunpack.i.h.bf16 %v6432_v53  ;;  %v1136_v53 = vld [vmem:[#allocation2 + $0x122] sm:$0xff] }
 0x1c1   : > { %v6447_v37 = vpop.permute.xlu1 %4976 }
 0x1c2   : > { %v4942_v6 = vpop.permute.xlu0 %4941  ;;  %v4978_v29 = vunpack.i.l.bf16 %v6447_v37 }
 0x1c3   : > { %v4944_v50 = vunpack.i.h.bf16 %v4942_v6  ;;  %v4943_v20 = vunpack.i.l.bf16 %v4942_v6  ;;  %2014 = vrot.lane.b32.xlu1 %v1024_v57, %s5449_s29  ;;  %v4958_v57 = vunpack.i.l.bf16 %v6420_v46  ;;  %v4919_v6 = vunpack.i.h.bf16 %v6387_v63 }
 0x1c4   : > { %5236 = vrot.lane.b32.xlu0 %v5235_v9, %s5445_s14  ;;  %v4934_v63 = vunpack.i.h.bf16 %v6418_v45 }
 0x1c5   : > { %v2227_v35 = vsel %vm2214_vm9, %v2194_v27, %v4943_v20  ;;  %v6461_v60 = vpop.permute.xlu1 %4981  ;;  %v2228_v32 = vsel %vm2214_vm9, %v2195_v47, %v4944_v50  ;;  %v4929_v50 = vunpack.i.h.bf16 %v6400_v19  ;;  %v4923_v27 = vunpack.i.l.bf16 %v6411_v34 }
 0x1c6   : > { %v4952_v40 = vpop.permute.xlu0 %4951  ;;  %v2260_v31 = vsel %vm2247_vm10, %v2227_v35, %v4948_v22  ;;  %v2261_v8 = vsel %vm2247_vm10, %v2228_v32, %v4949_v42  ;;  %v4924_v22 = vunpack.i.h.bf16 %v6411_v34  ;;  %v4933_v19 = vunpack.i.l.bf16 %v6418_v45  ;;  %v866_v34 = vld [vmem:[#allocation2 + $0x10] sm:$0xff] }
 0x1c7   : > { %v4954_v44 = vunpack.i.h.bf16 %v4952_v40  ;;  %v4953_v55 = vunpack.i.l.bf16 %v4952_v40  ;;  %2526 = vmatmul.mubr.f32.gmra.mxu1 %v2260_v31  ;;  %1888 = vrot.lane.b32.xlu1 %v1089_v36, %s5447_s21  ;;  %v881_v31 = vld [vmem:[#allocation2 + $0x140] sm:$0xff]  ;;  %v4983_v47 = vunpack.i.l.bf16 %v6461_v60  ;;  %v880_v32 = vld [vmem:[#allocation2 + $0x110] sm:$0xff]  ;;  %v4939_v45 = vunpack.i.h.bf16 %v6430_v10  ;;  %s5452_s21 = smov 24  }
 0x1c8   : > { %4323 = vmatprep.mubr.msk.f32.mxu1 %vm732_vm2, %v1135_v56  ;;  %1760 = vrot.lane.b32.xlu0 %v6464_v43, %s5448_s22  ;;  %s5453_s22 = smov 28  }
 0x1c9   : > { %v2116_v62 = vsel %vm2115_vm6, %v2083_v49, %v4954_v44  ;;  %v2130_v16 = vsel %vm2115_vm6, %v2097_v59, %v4953_v55  ;;  %v6483_v4 = vpop.permute.xlu1 %4986  ;;  %v1137_v55 = vld [vmem:[#allocation2 + $0x132] sm:$0xff] }
 0x1ca   : > { %v2149_v46 = vsel %vm2148_vm7, %v2116_v62, %v4959_v2  ;;  %v4962_v38 = vpop.permute.xlu0 %4961  ;;  %v2163_v9 = vsel %vm2148_vm7, %v2130_v16, %v4958_v57  ;;  %v4988_v56 = vunpack.i.l.bf16 %v6483_v4  ;;  %v1123_v57 = vld [vmem:[#allocation2 + $0x32] sm:$0xff] }
 0x1cb   : > { %2531 = vmatmul.mubr.f32.gmra.mxu1 %v2261_v8  ;;  %v4964_v20 = vunpack.i.h.bf16 %v4962_v38  ;;  %v2182_v15 = vsel %vm2181_vm8, %v2149_v46, %v4969_v0  ;;  %v2196_v12 = vsel %vm2181_vm8, %v2163_v9, %v4968_v30  ;;  %v4963_v28 = vunpack.i.l.bf16 %v4962_v38 }
 0x1cc   : > { %4324 = vmatprep.mubr.msk.f32.mxu1 %vm732_vm2, %v1136_v53  ;;  %2016 = vrot.lane.b32.xlu0 %v1121_v48, %s5449_s29  ;;  %v2215_v36 = vsel %vm2214_vm9, %v2182_v15, %v4919_v6  ;;  %v2229_v40 = vsel %vm2214_vm9, %v2196_v12, %v4918_v14  ;;  %v4938_v30 = vunpack.i.l.bf16 %v6430_v10  ;;  %v2066_v46 = vsel %vm732_vm2, %v881_v31, %v4978_v29 }
 0x1cd   : > { %v6501_v35 = vpop.permute.xlu1 %4991  ;;  %v2248_v49 = vsel %vm2247_vm10, %v2215_v36, %v4929_v50  ;;  %v2051_v42 = vsel %vm732_vm2, %v866_v34, %v4964_v20  ;;  %v2262_v59 = vsel %vm2247_vm10, %v2229_v40, %v4928_v5  ;;  %v2065_v0 = vsel %vm732_vm2, %v880_v32, %v4963_v28 }
 0x1ce   : > { %v4972_v39 = vpop.permute.xlu0 %4971  ;;  %2466 = vmatmul.mubr.f32.vlgmr.msra.gmra.mxu0 %v2248_v49  ;;  %v4993_v62 = vunpack.i.l.bf16 %v6501_v35  ;;  %v4979_v6 = vunpack.i.h.bf16 %v6447_v37  ;;  %v4984_v14 = vunpack.i.h.bf16 %v6461_v60  ;;  %v2099_v53 = vsel %vm2082_vm5, %v2066_v46, %v4983_v47  ;;  %v882_v60 = vld [vmem:[#allocation2 + $0x150] sm:$0xff] }
 0x1cf   : > { %v4974_v44 = vunpack.i.h.bf16 %v4972_v39  ;;  %v4973_v2 = vunpack.i.l.bf16 %v4972_v39  ;;  %4311 = vmatprep.mubr.msk.f32.mxu0 %vm732_vm2, %v1123_v57  ;;  %2536 = vmatmul.mubr.f32.gmra.mxu1 %v2262_v59  ;;  %v2132_v10 = vsel %vm2115_vm6, %v2099_v53, %v4988_v56  ;;  %v4989_v29 = vunpack.i.h.bf16 %v6483_v4  ;;  %v1139_v46 = vld [vmem:[#allocation2 + $0x172] sm:$0xff] }
 0x1d0   : > { %4325 = vmatprep.mubr.msk.f32.mxu1 %vm732_vm2, %v1137_v55  ;;  %v2165_v5 = vsel %vm2148_vm7, %v2132_v10, %v4993_v62  ;;  %v4994_v31 = vunpack.i.h.bf16 %v6501_v35  ;;  %3454 = vrot.lane.b32.xlu0 %v3381_v1, %s5451_s20 }
 0x1d1   : > { %v2084_v16 = vsel %vm2082_vm5, %v2051_v42, %v4974_v44  ;;  %v2098_v38 = vsel %vm2082_vm5, %v2065_v0, %v4973_v2  ;;  %v6520_v48 = vpop.permute.xlu1 %5001  ;;  %v883_v42 = vld [vmem:[#allocation2 + $0x160] sm:$0xff] }
 0x1d2   : > { %v2117_v8 = vsel %vm2115_vm6, %v2084_v16, %v4924_v22  ;;  %v4997_v9 = vpop.permute.xlu0 %4996  ;;  %v2131_v50 = vsel %vm2115_vm6, %v2098_v38, %v4923_v27  ;;  %v5003_v22 = vunpack.i.l.bf16 %v6520_v48  ;;  %v884_v16 = vld [vmem:[#allocation2 + $0x170] sm:$0xff] }
 0x1d3   : > { %v4998_v20 = vunpack.i.l.bf16 %v4997_v9  ;;  %v2150_v15 = vsel %vm2148_vm7, %v2117_v8, %v4934_v63  ;;  %v2164_v12 = vsel %vm2148_vm7, %v2131_v50, %v4933_v19  ;;  %v2067_v19 = vsel %vm732_vm2, %v882_v60, %v4979_v6 }
 0x1d4   : > { %v2183_v28 = vsel %vm2181_vm8, %v2150_v15, %v4939_v45  ;;  %v2197_v37 = vsel %vm2181_vm8, %v2164_v12, %v4938_v30  ;;  %v4999_v34 = vunpack.i.h.bf16 %v4997_v9  ;;  %v2100_v61 = vsel %vm2082_vm5, %v2067_v19, %v4984_v14 }
 0x1d5   : > { %v5012_v36 = vpop.permute.xlu1 %5011  ;;  %v2216_v39 = vsel %vm2214_vm9, %v2183_v28, %v4724_v41  ;;  %v2230_v63 = vsel %vm2214_vm9, %v2197_v37, %v4723_v58  ;;  %v2198_v40 = vsel %vm2181_vm8, %v2165_v5, %v4998_v20  ;;  %v1138_v58 = vld [vmem:[#allocation2 + $0x162] sm:$0xff]  ;;  %v2133_v35 = vsel %vm2115_vm6, %v2100_v61, %v4989_v29 }
 0x1d6   : > { %v5007_v27 = vpop.permute.xlu0 %5006  ;;  %v5013_v49 = vunpack.i.l.bf16 %v5012_v36  ;;  %v2249_v4 = vsel %vm2247_vm10, %v2216_v39, %v4729_v3  ;;  %v2263_v41 = vsel %vm2247_vm10, %v2230_v63, %v4728_v11  ;;  %v2231_v44 = vsel %vm2214_vm9, %v2198_v40, %v5003_v22  ;;  %v1140_v5 = vld [vmem:[#allocation2 + $0x182] sm:$0xff] }
 0x1d7   : > { %v5008_v47 = vunpack.i.l.bf16 %v5007_v27  ;;  %2471 = vmatmul.mubr.f32.gmra.mxu0 %v2249_v4  ;;  %2541 = vmatmul.mubr.f32.gmra.mxu1 %v2263_v41  ;;  %v5014_v55 = vunpack.i.h.bf16 %v5012_v36  ;;  %v2166_v13 = vsel %vm2148_vm7, %v2133_v35, %v4994_v31  ;;  %v5004_v11 = vunpack.i.h.bf16 %v6520_v48  ;;  %v1141_v4 = vld [vmem:[#allocation2 + $0x192] sm:$0xff]  ;;  %v1142_v35 = vld [vmem:[#allocation2 + $0x1a2] sm:$0xff] }
 0x1d8   : > { %4326 = vmatprep.mubr.msk.f32.mxu1 %vm732_vm2, %v1138_v58  ;;  %v2068_v59 = vsel %vm732_vm2, %v883_v42, %v5013_v49  ;;  %v5009_v45 = vunpack.i.h.bf16 %v5007_v27  ;;  %v2199_v62 = vsel %vm2181_vm8, %v2166_v13, %v4999_v34  ;;  %v885_v13 = vld [vmem:[#allocation2 + $0x180] sm:$0xff] }
 0x1d9   : > { %v5022_v56 = vpop.permute.xlu1 %5021  ;;  %v2264_v3 = vsel %vm2247_vm10, %v2231_v44, %v5008_v47  ;;  %v2069_v38 = vsel %vm732_vm2, %v884_v16, %v5014_v55  ;;  %v2232_v50 = vsel %vm2214_vm9, %v2199_v62, %v5004_v11 }
 0x1da   : > { %v5017_v32 = vpop.permute.xlu0 %5016  ;;  %v5023_v0 = vunpack.i.l.bf16 %v5022_v56  ;;  %v5024_v8 = vunpack.i.h.bf16 %v5022_v56  ;;  %v2265_v15 = vsel %vm2247_vm10, %v2232_v50, %v5009_v45 }
 0x1db   : > { %v5019_v2 = vunpack.i.h.bf16 %v5017_v32  ;;  %v5018_v57 = vunpack.i.l.bf16 %v5017_v32  ;;  %2546 = vmatmul.mubr.f32.gmra.mxu1 %v2264_v3 }
 0x1dc   : > { %4327 = vmatprep.mubr.msk.f32.mxu1 %vm732_vm2, %v1139_v46 }
 0x1dd   : > { %v2101_v30 = vsel %vm2082_vm5, %v2068_v59, %v5018_v57  ;;  %v5032_v48 = vpop.permute.xlu1 %5031  ;;  %v2102_v6 = vsel %vm2082_vm5, %v2069_v38, %v5019_v2  ;;  %v886_v59 = vld [vmem:[#allocation2 + $0x190] sm:$0xff] }
 0x1de   : > { %v5027_v9 = vpop.permute.xlu0 %5026  ;;  %v5033_v10 = vunpack.i.l.bf16 %v5032_v48  ;;  %v2134_v20 = vsel %vm2115_vm6, %v2101_v30, %v5023_v0  ;;  %v5034_v22 = vunpack.i.h.bf16 %v5032_v48  ;;  %v2135_v28 = vsel %vm2115_vm6, %v2102_v6, %v5024_v8 }
 0x1df   : > { %v5029_v14 = vunpack.i.h.bf16 %v5027_v9  ;;  %v5028_v53 = vunpack.i.l.bf16 %v5027_v9  ;;  %2551 = vmatmul.mubr.f32.gmra.mxu1 %v2265_v15 }
 0x1e0   : > { %4328 = vmatprep.mubr.msk.f32.mxu1 %vm732_vm2, %v1140_v5 }
 0x1e1   : > { %v2167_v12 = vsel %vm2148_vm7, %v2134_v20, %v5028_v53  ;;  %v5042_v37 = vpop.permute.xlu1 %5041  ;;  %v2168_v29 = vsel %vm2148_vm7, %v2135_v28, %v5029_v14 }
 0x1e2   : > { %v5037_v60 = vpop.permute.xlu0 %5036  ;;  %v5043_v36 = vunpack.i.l.bf16 %v5042_v37  ;;  %v2200_v63 = vsel %vm2181_vm8, %v2167_v12, %v5033_v10  ;;  %v5044_v19 = vunpack.i.h.bf16 %v5042_v37  ;;  %v2201_v49 = vsel %vm2181_vm8, %v2168_v29, %v5034_v22 }
 0x1e3   : > { %v5039_v27 = vunpack.i.h.bf16 %v5037_v60  ;;  %v5038_v39 = vunpack.i.l.bf16 %v5037_v60 }
 0x1e5   : > { %v2233_v40 = vsel %vm2214_vm9, %v2200_v63, %v5038_v39  ;;  %v5052_v31 = vpop.permute.xlu1 %5051  ;;  %v2234_v41 = vsel %vm2214_vm9, %v2201_v49, %v5039_v27  ;;  %v1143_v63 = vld [vmem:[#allocation2 + $0x1b2] sm:$0xff] }
 0x1e6   : > { %v5047_v47 = vpop.permute.xlu0 %5046  ;;  %v2266_v34 = vsel %vm2247_vm10, %v2233_v40, %v5043_v36  ;;  %v2267_v44 = vsel %vm2247_vm10, %v2234_v41, %v5044_v19  ;;  %v5053_v3 = vunpack.i.l.bf16 %v5052_v31  ;;  %v5054_v57 = vunpack.i.h.bf16 %v5052_v31  ;;  %v887_v19 = vld [vmem:[#allocation2 + $0x1a0] sm:$0xff]  ;;  %v888_v31 = vld [vmem:[#allocation2 + $0x1b0] sm:$0xff] }
 0x1e7   : > { %2556 = vmatmul.mubr.f32.gmra.mxu1 %v2266_v34  ;;  %v5048_v55 = vunpack.i.l.bf16 %v5047_v47  ;;  %v5049_v11 = vunpack.i.h.bf16 %v5047_v47 }
 0x1e8   : > { %4329 = vmatprep.mubr.msk.f32.mxu1 %vm732_vm2, %v1141_v4 }
 0x1e9   : > { %v5062_v61 = vpop.permute.xlu1 %5061  ;;  %v2070_v42 = vsel %vm732_vm2, %v885_v13, %v5048_v55  ;;  %v2071_v62 = vsel %vm732_vm2, %v886_v59, %v5049_v11 }
 0x1ea   : > { %v5057_v58 = vpop.permute.xlu0 %5056  ;;  %v5063_v16 = vunpack.i.l.bf16 %v5062_v61  ;;  %v2103_v46 = vsel %vm2082_vm5, %v2070_v42, %v5053_v3  ;;  %v5064_v9 = vunpack.i.h.bf16 %v5062_v61  ;;  %v2104_v6 = vsel %vm2082_vm5, %v2071_v62, %v5054_v57  ;;  %v1144_v42 = vld [vmem:[#allocation2 + $0x1c2] sm:$0xff] }
 0x1eb   : > { %2561 = vmatmul.mubr.f32.gmra.mxu1 %v2267_v44  ;;  %v5058_v2 = vunpack.i.l.bf16 %v5057_v58  ;;  %v5059_v30 = vunpack.i.h.bf16 %v5057_v58 }
 0x1ec   : > { %4330 = vmatprep.mubr.msk.f32.mxu1 %vm732_vm2, %v1142_v35 }
 0x1ed   : > { %v6578_v56 = vpop.permute.xlu1 %5076  ;;  %v2136_v38 = vsel %vm2115_vm6, %v2103_v46, %v5058_v2  ;;  %v2137_v53 = vsel %vm2115_vm6, %v2104_v6, %v5059_v30 }
 0x1ee   : > { %v5067_v32 = vpop.permute.xlu0 %5066  ;;  %v2169_v20 = vsel %vm2148_vm7, %v2136_v38, %v5063_v16  ;;  %v2170_v27 = vsel %vm2148_vm7, %v2137_v53, %v5064_v9  ;;  %v5078_v38 = vunpack.i.l.bf16 %v6578_v56 }
 0x1ef   : > { %v5068_v8 = vunpack.i.l.bf16 %v5067_v32  ;;  %v5069_v50 = vunpack.i.h.bf16 %v5067_v32 }
 0x1f1   : > { %v5082_v45 = vpop.permute.xlu1 %5081  ;;  %v2202_v5 = vsel %vm2181_vm8, %v2169_v20, %v5068_v8  ;;  %v2203_v40 = vsel %vm2181_vm8, %v2170_v27, %v5069_v50  ;;  %v889_v8 = vld [vmem:[#allocation2 + $0x1e0] sm:$0xff] }
 0x1f2   : > { %v6581_v0 = vpop.permute.xlu0 %5071  ;;  %v5083_v48 = vunpack.i.l.bf16 %v5082_v45  ;;  %v5084_v15 = vunpack.i.h.bf16 %v5082_v45 }
 0x1f3   : > { %v5073_v62 = vunpack.i.l.bf16 %v6581_v0 }
 0x1f4   : > { %v2235_v37 = vsel %vm2214_vm9, %v2202_v5, %v5083_v48  ;;  %v2236_v49 = vsel %vm2214_vm9, %v2203_v40, %v5084_v15 }
 0x1f5   : > { %v5092_v14 = vpop.permute.xlu1 %5091 }
 0x1f6   : > { %v5087_v10 = vpop.permute.xlu0 %5086  ;;  %v5094_v22 = vunpack.i.h.bf16 %v5092_v14  ;;  %v5093_v28 = vunpack.i.l.bf16 %v5092_v14  ;;  %v5074_v14 = vunpack.i.h.bf16 %v6581_v0 }
 0x1f7   : > { %v5088_v12 = vunpack.i.l.bf16 %v5087_v10  ;;  %v5089_v60 = vunpack.i.h.bf16 %v5087_v10  ;;  %v1145_v10 = vld [vmem:[#allocation2 + $0x1d2] sm:$0xff] }
 0x1f8   : > { %v2073_v4 = vsel %vm732_vm2, %v888_v31, %v5094_v22  ;;  %v2072_v41 = vsel %vm732_vm2, %v887_v19, %v5093_v28 }
 0x1f9   : > { %v5102_v29 = vpop.permute.xlu1 %5101  ;;  %v2268_v36 = vsel %vm2247_vm10, %v2235_v37, %v5088_v12  ;;  %v2269_v32 = vsel %vm2247_vm10, %v2236_v49, %v5089_v60  ;;  %v5079_v37 = vunpack.i.h.bf16 %v6578_v56 }
 0x1fa   : > { %v5097_v39 = vpop.permute.xlu0 %5096  ;;  %2566 = vmatmul.mubr.f32.gmra.mxu1 %v2268_v36  ;;  %v5104_v61 = vunpack.i.h.bf16 %v5102_v29  ;;  %v5103_v58 = vunpack.i.l.bf16 %v5102_v29 }
 0x1fb   : > { %v5099_v47 = vunpack.i.h.bf16 %v5097_v39  ;;  %v5098_v34 = vunpack.i.l.bf16 %v5097_v39  ;;  %4331 = vmatprep.mubr.msk.f32.mxu1 %vm732_vm2, %v1143_v63 }
 0x1fd   : > { %v2106_v44 = vsel %vm2082_vm5, %v2073_v4, %v5099_v47  ;;  %v2105_v35 = vsel %vm2082_vm5, %v2072_v41, %v5098_v34  ;;  %v5112_v55 = vpop.permute.xlu1 %5111 }
 0x1fe   : > { %v5114_v3 = vunpack.i.h.bf16 %v5112_v55  ;;  %v5113_v13 = vunpack.i.l.bf16 %v5112_v55  ;;  %v5107_v11 = vpop.permute.xlu0 %5106  ;;  %2571 = vmatmul.mubr.f32.gmra.mxu1 %v2269_v32  ;;  %v2138_v59 = vsel %vm2115_vm6, %v2105_v35, %v5103_v58  ;;  %v2139_v45 = vsel %vm2115_vm6, %v2106_v44, %v5104_v61 }
 0x1ff   : > { %v5109_v2 = vunpack.i.h.bf16 %v5107_v11  ;;  %v5108_v57 = vunpack.i.l.bf16 %v5107_v11  ;;  %4332 = vmatprep.mubr.msk.f32.mxu1 %vm732_vm2, %v1144_v42 }
 0x201   : > { %v2171_v16 = vsel %vm2148_vm7, %v2138_v59, %v5108_v57  ;;  %v2172_v30 = vsel %vm2148_vm7, %v2139_v45, %v5109_v2  ;;  %v5122_v46 = vpop.permute.xlu1 %5121 }
 0x202   : > { %v5117_v48 = vpop.permute.xlu0 %5116  ;;  %v2204_v9 = vsel %vm2181_vm8, %v2171_v16, %v5113_v13  ;;  %v2205_v6 = vsel %vm2181_vm8, %v2172_v30, %v5114_v3  ;;  %v5123_v20 = vunpack.i.l.bf16 %v5122_v46  ;;  %v5124_v29 = vunpack.i.h.bf16 %v5122_v46  ;;  %v891_v16 = vld [vmem:[#allocation2 + $0x200] sm:$0xff] }
 0x203   : > { %v5118_v53 = vunpack.i.l.bf16 %v5117_v48  ;;  %v2237_v50 = vsel %vm2214_vm9, %v2204_v9, %v5073_v62  ;;  %v5119_v12 = vunpack.i.h.bf16 %v5117_v48  ;;  %v2238_v28 = vsel %vm2214_vm9, %v2205_v6, %v5074_v14  ;;  %v2627_v62 = vld [vmem:[%s7427_s5 + $0x8] sm:$0xff] }
 0x204   : > { %v2270_v15 = vsel %vm2247_vm10, %v2237_v50, %v5078_v38  ;;  %v2271_v39 = vsel %vm2247_vm10, %v2238_v28, %v5079_v37  ;;  %4559 = vmatprep.subr.mxu0 %v2627_v62 }
 0x205   : > { %v2074_v5 = vsel %vm732_vm2, %v889_v8, %v5118_v53  ;;  %2576 = vmatmul.mubr.f32.gmra.mxu1 %v2270_v15  ;;  %v5132_v22 = vpop.permute.xlu1 %5131  ;;  %v2075_v63 = vsel %vm732_vm2, %v6279_v24, %v5119_v12  ;;  %4560 = vmatpush3.msra.mxu0 %v2627_v62 }
 0x206   : > { %v5127_v60 = vpop.permute.xlu0 %5126  ;;  %4333 = vmatprep.mubr.msk.f32.mxu1 %vm732_vm2, %v1145_v10  ;;  %v5133_v36 = vunpack.i.l.bf16 %v5132_v22  ;;  %v2107_v27 = vsel %vm2082_vm5, %v2074_v5, %v5123_v20  ;;  %v5134_v34 = vunpack.i.h.bf16 %v5132_v22  ;;  %v2108_v49 = vsel %vm2082_vm5, %v2075_v63, %v5124_v29 }
 0x207   : > { %v5128_v0 = vunpack.i.l.bf16 %v5127_v60  ;;  %v5129_v40 = vunpack.i.h.bf16 %v5127_v60 }
 0x209   : > { %v2140_v19 = vsel %vm2115_vm6, %v2107_v27, %v5128_v0  ;;  %2581 = vmatmul.mubr.f32.gmra.mxu1 %v2271_v39  ;;  %v5142_v31 = vpop.permute.xlu1 %5141  ;;  %v2141_v61 = vsel %vm2115_vm6, %v2108_v49, %v5129_v40 }
 0x20a   : > { %v5137_v47 = vpop.permute.xlu0 %5136  ;;  %4334 = vmatprep.mubr.msk.f32.mxu1 %vm732_vm2, %v6299_v52  ;;  %v5143_v4 = vunpack.i.l.bf16 %v5142_v31  ;;  %v2173_v41 = vsel %vm2148_vm7, %v2140_v19, %v5133_v36  ;;  %v5144_v32 = vunpack.i.h.bf16 %v5142_v31  ;;  %v2174_v52 = vsel %vm2148_vm7, %v2141_v61, %v5134_v34 }
 0x20b   : > { %v5138_v56 = vunpack.i.l.bf16 %v5137_v47  ;;  %v5139_v58 = vunpack.i.h.bf16 %v5137_v47 }
 0x20d   : > { %v5152_v24 = vpop.permute.xlu1 %5151  ;;  %v2206_v44 = vsel %vm2181_vm8, %v2173_v41, %v5138_v56  ;;  %v2207_v57 = vsel %vm2181_vm8, %v2174_v52, %v5139_v58 }
 0x20e   : > { %v5147_v35 = vpop.permute.xlu0 %5146  ;;  %v5153_v3 = vunpack.i.l.bf16 %v5152_v24  ;;  %v2239_v13 = vsel %vm2214_vm9, %v2206_v44, %v5143_v4  ;;  %v5154_v59 = vunpack.i.h.bf16 %v5152_v24  ;;  %v2240_v48 = vsel %vm2214_vm9, %v2207_v57, %v5144_v32 }
 0x20f   : > { %v5148_v55 = vunpack.i.l.bf16 %v5147_v35  ;;  %v5149_v11 = vunpack.i.h.bf16 %v5147_v35 }
 0x210   : > { %v2076_v38 = vsel %vm732_vm2, %v891_v16, %v5153_v3  ;;  %v2077_v53 = vsel %vm732_vm2, %v6293_v7, %v5154_v59  ;;  %v2626_v7 = vld [vmem:[%s7427_s5] sm:$0xff] }
 0x211   : > { %v5162_v42 = vpop.permute.xlu1 %5161  ;;  %v2272_v2 = vsel %vm2247_vm10, %v2239_v13, %v5148_v55  ;;  %v2273_v14 = vsel %vm2247_vm10, %v2240_v48, %v5149_v11  ;;  %4561 = vmatprep.subr.mxu0 %v2626_v7 }
 0x212   : > { %v5157_v45 = vpop.permute.xlu0 %5156  ;;  %2586 = vmatmul.mubr.f32.gmra.mxu1 %v2272_v2  ;;  %v5163_v8 = vunpack.i.l.bf16 %v5162_v42  ;;  %v5164_v50 = vunpack.i.h.bf16 %v5162_v42  ;;  %4562 = vmatpush3.msra.mxu0 %v2626_v7 }
 0x213   : > { %v5159_v30 = vunpack.i.h.bf16 %v5157_v45  ;;  %v5158_v46 = vunpack.i.l.bf16 %v5157_v45  ;;  %4335 = vmatprep.mubr.msk.f32.mxu1 %vm732_vm2, %v6328_v54 }
 0x215   : > { %v2109_v9 = vsel %vm2082_vm5, %v2076_v38, %v5158_v46  ;;  %v5172_v6 = vpop.permute.xlu1 %5171  ;;  %v2110_v54 = vsel %vm2082_vm5, %v2077_v53, %v5159_v30 }
 0x216   : > { %v5167_v10 = vpop.permute.xlu0 %5166  ;;  %2591 = vmatmul.mubr.f32.gmra.mxu1 %v2273_v14  ;;  %v5173_v12 = vunpack.i.l.bf16 %v5172_v6  ;;  %v2142_v5 = vsel %vm2115_vm6, %v2109_v9, %v5163_v8  ;;  %v5174_v37 = vunpack.i.h.bf16 %v5172_v6  ;;  %v2143_v60 = vsel %vm2115_vm6, %v2110_v54, %v5164_v50 }
 0x217   : > { %v5169_v20 = vunpack.i.h.bf16 %v5167_v10  ;;  %v5168_v15 = vunpack.i.l.bf16 %v5167_v10  ;;  %4336 = vmatprep.mubr.msk.f32.mxu1 %vm732_vm2, %v6338_v25 }
 0x219   : > { %v2175_v22 = vsel %vm2148_vm7, %v2142_v5, %v5168_v15  ;;  %v5182_v28 = vpop.permute.xlu1 %5181  ;;  %v2176_v36 = vsel %vm2148_vm7, %v2143_v60, %v5169_v20 }
 0x21a   : > { %v5183_v0 = vunpack.i.l.bf16 %v5182_v28  ;;  %v5177_v29 = vpop.permute.xlu0 %5176  ;;  %v2208_v39 = vsel %vm2181_vm8, %v2175_v22, %v5173_v12  ;;  %v5184_v19 = vunpack.i.h.bf16 %v5182_v28  ;;  %v2209_v56 = vsel %vm2181_vm8, %v2176_v36, %v5174_v37 }
 0x21b   : > { %v5179_v27 = vunpack.i.h.bf16 %v5177_v29  ;;  %v5178_v25 = vunpack.i.l.bf16 %v5177_v29 }
 0x21d   : > { %v5192_v63 = vpop.permute.xlu1 %5191  ;;  %v2241_v40 = vsel %vm2214_vm9, %v2208_v39, %v5178_v25  ;;  %v2242_v34 = vsel %vm2214_vm9, %v2209_v56, %v5179_v27 }
 0x21e   : > { %v5187_v31 = vpop.permute.xlu0 %5186  ;;  %v2274_v47 = vsel %vm2247_vm10, %v2241_v40, %v5183_v0  ;;  %v2275_v61 = vsel %vm2247_vm10, %v2242_v34, %v5184_v19  ;;  %v5193_v58 = vunpack.i.l.bf16 %v5192_v63  ;;  %v5194_v3 = vunpack.i.h.bf16 %v5192_v63 }
 0x21f   : > { %2596 = vmatmul.mubr.f32.gmra.mxu1 %v2274_v47  ;;  %v5188_v49 = vunpack.i.l.bf16 %v5187_v31  ;;  %v5189_v24 = vunpack.i.h.bf16 %v5187_v31 }
 0x220   : > { %4337 = vmatprep.mubr.msk.f32.mxu1 %vm732_vm2, %v6364_v21 }
 0x221   : > { %v5202_v4 = vpop.permute.xlu1 %5201  ;;  %v2078_v44 = vsel %vm732_vm2, %v6323_v33, %v5188_v49  ;;  %v2079_v21 = vsel %vm732_vm2, %v6351_v26, %v5189_v24 }
 0x222   : > { %v5197_v41 = vpop.permute.xlu0 %5196  ;;  %v5203_v13 = vunpack.i.l.bf16 %v5202_v4  ;;  %v2111_v11 = vsel %vm2082_vm5, %v2078_v44, %v5193_v58  ;;  %v2112_v45 = vsel %vm2082_vm5, %v2079_v21, %v5194_v3  ;;  %v1153_v58 = vld [vmem:[#allocation2 + $0x272] sm:$0xff] }
 0x223   : > { %2601 = vmatmul.mubr.f32.gmra.mxu1 %v2275_v61  ;;  %v5198_v35 = vunpack.i.l.bf16 %v5197_v41  ;;  %v5199_v52 = vunpack.i.h.bf16 %v5197_v41 }
 0x224   : > { %4338 = vmatprep.mubr.msk.f32.mxu1 %vm732_vm2, %v6396_v23  ;;  %v5204_v23 = vunpack.i.h.bf16 %v5202_v4 }
 0x225   : > { %v5212_v55 = vpop.permute.xlu1 %5211  ;;  %v2144_v42 = vsel %vm2115_vm6, %v2111_v11, %v5198_v35  ;;  %v2145_v33 = vsel %vm2115_vm6, %v2112_v45, %v5199_v52 }
 0x226   : > { %v5207_v32 = vpop.permute.xlu0 %5206  ;;  %v5213_v62 = vunpack.i.l.bf16 %v5212_v55  ;;  %v2177_v30 = vsel %vm2148_vm7, %v2144_v42, %v5203_v13  ;;  %v5214_v8 = vunpack.i.h.bf16 %v5212_v55  ;;  %v2178_v9 = vsel %vm2148_vm7, %v2145_v33, %v5204_v23 }
 0x227   : > { %v5208_v2 = vunpack.i.l.bf16 %v5207_v32  ;;  %v5209_v16 = vunpack.i.h.bf16 %v5207_v32 }
 0x229   : > { %v5222_v57 = vpop.permute.xlu1 %5221  ;;  %v2210_v26 = vsel %vm2181_vm8, %v2177_v30, %v5208_v2  ;;  %v2211_v50 = vsel %vm2181_vm8, %v2178_v9, %v5209_v16 }
 0x22a   : > { %v1887_v59 = vpop.permute.xlu0 %1886  ;;  %v5224_v6 = vunpack.i.h.bf16 %v5222_v57  ;;  %v5223_v14 = vunpack.i.l.bf16 %v5222_v57  ;;  %v2243_v53 = vsel %vm2214_vm9, %v2210_v26, %v5213_v62  ;;  %v2244_v7 = vsel %vm2214_vm9, %v2211_v50, %v5214_v8  ;;  %v6705_v8 = vld [vmem:[%s7426_s4] ss:$0 sm:$0xff] }
 0x22c   : > { %v2081_v37 = vsel %vm732_vm2, %v6392_v18, %v5224_v6  ;;  %v2080_v60 = vsel %vm732_vm2, %v6380_v17, %v5223_v14 }
 0x22d   : > { %v5232_v46 = vpop.permute.xlu1 %5231 }
 0x22e   : > { %v5217_v38 = vpop.permute.xlu0 %5216  ;;  %v5234_v0 = vunpack.i.h.bf16 %v5232_v46  ;;  %v5233_v29 = vunpack.i.l.bf16 %v5232_v46 }
 0x22f   : > { %v5218_v48 = vunpack.i.l.bf16 %v5217_v38  ;;  %v5219_v10 = vunpack.i.h.bf16 %v5217_v38 }
 0x231   : > { %v2276_v20 = vsel %vm2247_vm10, %v2243_v53, %v5218_v48  ;;  %v1759_v15 = vpop.permute.xlu1 %1758  ;;  %v2277_v39 = vsel %vm2247_vm10, %v2244_v7, %v5219_v10 }
 0x232   : > { %v6676_v54 = vpop.f32.mrf.mxu1  ;;  %v5227_v12 = vpop.permute.xlu0 %5226  ;;  %2606 = vmatmul.mubr.f32.gmra.mxu1 %v2276_v20 }
 0x233   : > { %v5229_v5 = vunpack.i.h.bf16 %v5227_v12  ;;  %v5228_v22 = vunpack.i.l.bf16 %v5227_v12  ;;  %4339 = vmatprep.mubr.msk.f32.mxu1 %vm732_vm2, %v6424_v51 }
 0x234   : > { %v2479_v28 = vpop.f32.mrf.mxu1 }
 0x235   : > { %v2114_v36 = vsel %vm2082_vm5, %v2081_v37, %v5229_v5  ;;  %v2113_v27 = vsel %vm2082_vm5, %v2080_v60, %v5228_v22  ;;  %v2015_v63 = vpop.permute.xlu1 %2014 }
 0x236   : > { %v2482_v25 = vpop.f32.mrf.mxu1  ;;  %v5237_v51 = vpop.permute.xlu0 %5236  ;;  %2611 = vmatmul.mubr.f32.gmra.mxu1 %v2277_v39  ;;  %v2146_v17 = vsel %vm2115_vm6, %v2113_v27, %v5233_v29  ;;  %v2147_v31 = vsel %vm2115_vm6, %v2114_v36, %v5234_v0  ;;  %vm3735_vm6 = vcmask 162816  }
 0x237   : > { %v5239_v40 = vunpack.i.h.bf16 %v5237_v51  ;;  %v5238_v19 = vunpack.i.l.bf16 %v5237_v51  ;;  %4340 = vmatprep.mubr.msk.f32.mxu1 %vm732_vm2, %v6464_v43  ;;  %v2483_v28 = vadd.f32 %v6705_v8, %v2482_v25 }
 0x238   : > { %v2484_v18 = vpop.f32.mrf.mxu1 }
 0x239   : > { %v2179_v47 = vsel %vm2148_vm7, %v2146_v17, %v5238_v19  ;;  %v2180_v56 = vsel %vm2148_vm7, %v2147_v31, %v5239_v40  ;;  %v1889_v41 = vpop.permute.xlu1 %1888  ;;  %vm3744_vm7 = vcmask 195584  }
 0x23a   : > { %v1761_v34 = vpop.permute.xlu0 %1760  ;;  %v2212_v49 = vsel %vm2181_vm8, %v2179_v47, %v1759_v15  ;;  %v2478_v15 = vadd.f32 %v6705_v8, %v6676_v54 }
 0x23b   : > { %v2213_v4 = vsel %vm2181_vm8, %v2180_v56, %v1761_v34  ;;  %v2245_v61 = vsel %vm2214_vm9, %v2212_v49, %v1887_v59  ;;  %vm3753_vm8 = vcmask 228352  }
 0x23c   : > { %v2278_v43 = vsel %vm2247_vm10, %v2245_v61, %v2015_v63  ;;  %v2246_v24 = vsel %vm2214_vm9, %v2213_v4, %v1889_v41  ;;  %vm3782_vm9 = vcmask 293888  }
 0x23d   : > { %2616 = vmatmul.mubr.f32.gmra.mxu1 %v2278_v43 }
 0x23e   : > { %v2017_v44 = vpop.permute.xlu0 %2016  ;;  %4341 = vmatprep.mubr.msk.f32.mxu1 %vm732_vm2, %v1153_v58 }
 0x23f   : > { %v2279_v35 = vsel %vm2247_vm10, %v2246_v24, %v2017_v44 }
 0x241   : > { %2621 = vmatmul.mubr.f32.gmra.mxu1 %v2279_v35 }
 0x243   : > { %v2487_v55 = vpop.f32.mrf.mxu1 }
 0x244   : > { %v2488_v7 = vadd.f32 %v6705_v8, %v2487_v55 }
 0x245   : > { %v2489_v32 = vpop.f32.mrf.mxu1 }
 0x247   : > { %v2492_v3 = vpop.f32.mrf.mxu1 }
 0x248   : > { %v2493_v0 = vadd.f32 %v6705_v8, %v2492_v3 }
 0x249   : > { %v2494_v21 = vpop.f32.mrf.mxu1 }
 0x250   : > { %v2497_v13 = vpop.f32.mrf.mxu1 }
 0x251   : > { %v2498_v54 = vadd.f32 %v6705_v8, %v2497_v13 }
 0x252   : > { %v2499_v52 = vpop.f32.mrf.mxu1 }
 0x254   : > { %v2502_v11 = vpop.f32.mrf.mxu1 }
 0x255   : > { %v2503_v36 = vadd.f32 %v6705_v8, %v2502_v11 }
 0x256   : > { %v2504_v42 = vpop.f32.mrf.mxu1 }
 0x25b   : > { %v2507_v2 = vpop.f32.mrf.mxu1 }
 0x25c   : > { %v2508_v27 = vadd.f32 %v6705_v8, %v2507_v2 }
 0x25d   : > { %v2509_v57 = vpop.f32.mrf.mxu1 }
 0x25f   : > { %v2512_v59 = vpop.f32.mrf.mxu1 }
 0x260   : > { %v2513_v63 = vadd.f32 %v6705_v8, %v2512_v59 }
 0x261   : > { %v2514_v23 = vpop.f32.mrf.mxu1 }
 0x26e   : > { %v2517_v45 = vpop.f32.mrf.mxu1 }
 0x26f   : > { %v2518_v51 = vadd.f32 %v6705_v8, %v2517_v45  ;;  %v3389_v45 = vld [vmem:[#allocation3 + $0x2] sm:$0xff] }
 0x270   : > { %v2519_v33 = vpop.f32.mrf.mxu1  ;;  %3486 = vrot.lane.b32.xlu1 %v3389_v45, %s5450_s19 }
 0x272   : > { %v2522_v62 = vpop.f32.mrf.mxu1 }
 0x273   : > { %v2523_v18 = vadd.f32 %v6705_v8, %v2522_v62 }
 0x274   : > { %v2524_v16 = vpop.f32.mrf.mxu1 }
 0x287   : > { %v2527_v30 = vpop.f32.mrf.mxu1 }
 0x288   : > { %v2528_v17 = vadd.f32 %v6705_v8, %v2527_v30 }
 0x289   : > { %v2529_v46 = vpop.f32.mrf.mxu1 }
 0x28b   : > { %v2532_v26 = vpop.f32.mrf.mxu1 }
 0x28c   : > { %v2533_v31 = vadd.f32 %v6705_v8, %v2532_v26 }
 0x28d   : > { %v2534_v38 = vpop.f32.mrf.mxu1 }
 0x28e   : > { %v2467_v48 = vpop.f32.mrf.mxu0  ;;  %v3429_v38 = vld [vmem:[#allocation3 + $0x90] sm:$0xff] }
 0x28f   : > { %v2468_v9 = vadd.f32 %v6705_v8, %v2467_v48  ;;  %v2537_v6 = vpop.f32.mrf.mxu1  ;;  %3628 = vrot.lane.b32.xlu0 %v3429_v38, %s5452_s21 }
 0x290   : > { %v2469_v14 = vpop.f32.mrf.mxu0  ;;  %v2538_v47 = vadd.f32 %v6705_v8, %v2537_v6 }
 0x291   : > { %v2539_v53 = vpop.f32.mrf.mxu1  ;;  %4563 = vmatprep.mubr.msk.f32.mxu0 %vm732_vm2, %v2468_v9  ;;  %v3437_v9 = vld [vmem:[#allocation3 + $0x91] sm:$0xff] }
 0x293   : > { %3660 = vrot.lane.b32.xlu0 %v3437_v9, %s5453_s22 }
 0x297   : > { %v2472_v50 = vpop.f32.mrf.mxu0  ;;  %v2542_v10 = vpop.f32.mrf.mxu1 }
 0x298   : > { %v2473_v20 = vadd.f32 %v6705_v8, %v2472_v50  ;;  %v2543_v56 = vadd.f32 %v6705_v8, %v2542_v10 }
 0x299   : > { %v2474_v12 = vpop.f32.mrf.mxu0  ;;  %v2544_v5 = vpop.f32.mrf.mxu1 }
 0x29a   : > { %4564 = vmatmul.mubr.msk.f32.vlgmr.msra.gmra.mxu0 %vm732_vm2, %v2473_v20 }
 0x29b   : > { %v2547_v22 = vpop.f32.mrf.mxu1  ;;  %4566 = vmatprep.mubr.msk.f32.mxu0 %vm732_vm2, %v2478_v15 }
 0x29c   : > { %v2548_v34 = vadd.f32 %v6705_v8, %v2547_v22 }
 0x29d   : > { %v2549_v37 = vpop.f32.mrf.mxu1 }
 0x29e   : > { %4567 = vmatmul.mubr.msk.f32.gmra.mxu0 %vm732_vm2, %v2483_v28 }
 0x29f   : > { %v2552_v60 = vpop.f32.mrf.mxu1  ;;  %4569 = vmatprep.mubr.msk.f32.mxu0 %vm732_vm2, %v2488_v7  ;;  %v6825_v7 = vld [vmem:[%s7428_s6] ss:$0 sm:$0xff] }
 0x2a0   : > { %v2553_v49 = vadd.f32 %v6705_v8, %v2552_v60 }
 0x2a1   : > { %v2554_v29 = vpop.f32.mrf.mxu1 }
 0x2a2   : > { %4570 = vmatmul.mubr.msk.f32.gmra.mxu0 %vm732_vm2, %v2493_v0 }
 0x2a3   : > { %4572 = vmatprep.mubr.msk.f32.mxu0 %vm732_vm2, %v2498_v54 }
 0x2a6   : > { %4573 = vmatmul.mubr.msk.f32.gmra.mxu0 %vm732_vm2, %v2503_v36 }
 0x2a7   : > { %v2557_v25 = vpop.f32.mrf.mxu1  ;;  %4575 = vmatprep.mubr.msk.f32.mxu0 %vm732_vm2, %v2508_v27 }
 0x2a8   : > { %v2558_v4 = vadd.f32 %v6705_v8, %v2557_v25 }
 0x2a9   : > { %v2559_v39 = vpop.f32.mrf.mxu1 }
 0x2aa   : > { %4576 = vmatmul.mubr.msk.f32.gmra.mxu0 %vm732_vm2, %v2513_v63 }
 0x2ab   : > { %v2562_v40 = vpop.f32.mrf.mxu1  ;;  %4578 = vmatprep.mubr.msk.f32.mxu0 %vm732_vm2, %v2518_v51 }
 0x2ac   : > { %v2563_v58 = vadd.f32 %v6705_v8, %v2562_v40 }
 0x2ad   : > { %v2564_v19 = vpop.f32.mrf.mxu1 }
 0x2ae   : > { %4579 = vmatmul.mubr.msk.f32.gmra.mxu0 %vm732_vm2, %v2523_v18 }
 0x2af   : > { %4581 = vmatprep.mubr.msk.f32.mxu0 %vm732_vm2, %v2528_v17 }
 0x2b2   : > { %4582 = vmatmul.mubr.msk.f32.gmra.mxu0 %vm732_vm2, %v2533_v31 }
 0x2b3   : > { %4584 = vmatprep.mubr.msk.f32.mxu0 %vm732_vm2, %v2538_v47 }
 0x2b6   : > { %4585 = vmatmul.mubr.msk.f32.gmra.mxu0 %vm732_vm2, %v2543_v56 }
 0x2b7   : > { %4587 = vmatprep.mubr.msk.f32.mxu0 %vm732_vm2, %v2548_v34 }
 0x2ba   : > { %v2567_v41 = vpop.f32.mrf.mxu1  ;;  %4588 = vmatmul.mubr.msk.f32.gmra.mxu0 %vm732_vm2, %v2553_v49 }
 0x2bb   : > { %4590 = vmatprep.mubr.msk.f32.mxu0 %vm732_vm2, %v2558_v4  ;;  %v2568_v43 = vadd.f32 %v6705_v8, %v2567_v41 }
 0x2bc   : > { %v2569_v61 = vpop.f32.mrf.mxu1 }
 0x2be   : > { %v2572_v24 = vpop.f32.mrf.mxu1  ;;  %4591 = vmatmul.mubr.msk.f32.gmra.mxu0 %vm732_vm2, %v2563_v58 }
 0x2bf   : > { %v2573_v44 = vadd.f32 %v6705_v8, %v2572_v24  ;;  %4593 = vmatprep.mubr.msk.f32.mxu0 %vm732_vm2, %v2568_v43 }
 0x2c0   : > { %v2574_v35 = vpop.f32.mrf.mxu1 }
 0x2c2   : > { %4594 = vmatmul.mubr.msk.f32.gmra.mxu0 %vm732_vm2, %v2573_v44 }
 0x2c5   : > { %v2577_v55 = vpop.f32.mrf.mxu1 }
 0x2c6   : > { %v2578_v32 = vadd.f32 %v6705_v8, %v2577_v55 }
 0x2c7   : > { %v2579_v3 = vpop.f32.mrf.mxu1 }
 0x2c8   : > { %4596 = vmatprep.mubr.msk.f32.mxu0 %vm732_vm2, %v2578_v32 }
 0x2c9   : > { %v2582_v21 = vpop.f32.mrf.mxu1 }
 0x2ca   : > { %v2583_v13 = vadd.f32 %v6705_v8, %v2582_v21 }
 0x2cb   : > { %v2584_v52 = vpop.f32.mrf.mxu1 }
 0x2cc   : > { %4597 = vmatmul.mubr.msk.f32.gmra.mxu0 %vm732_vm2, %v2583_v13 }
 0x2d2   : > { %v2587_v11 = vpop.f32.mrf.mxu1 }
 0x2d3   : > { %v2588_v42 = vadd.f32 %v6705_v8, %v2587_v11 }
 0x2d4   : > { %v2589_v2 = vpop.f32.mrf.mxu1 }
 0x2d5   : > { %4599 = vmatprep.mubr.msk.f32.mxu0 %vm732_vm2, %v2588_v42 }
 0x2d6   : > { %v2592_v57 = vpop.f32.mrf.mxu1 }
 0x2d7   : > { %v2593_v59 = vadd.f32 %v6705_v8, %v2592_v57 }
 0x2d8   : > { %v2594_v23 = vpop.f32.mrf.mxu1 }
 0x2d9   : > { %4600 = vmatmul.mubr.msk.f32.gmra.mxu0 %vm732_vm2, %v2593_v59 }
 0x2df   : > { %v2597_v33 = vpop.f32.mrf.mxu1 }
 0x2e0   : > { %v2598_v62 = vadd.f32 %v6705_v8, %v2597_v33 }
 0x2e1   : > { %v2599_v16 = vpop.f32.mrf.mxu1 }
 0x2e2   : > { %4602 = vmatprep.mubr.msk.f32.mxu0 %vm732_vm2, %v2598_v62 }
 0x2e3   : > { %v2602_v30 = vpop.f32.mrf.mxu1 }
 0x2e4   : > { %v2603_v46 = vadd.f32 %v6705_v8, %v2602_v30 }
 0x2e5   : > { %v2604_v26 = vpop.f32.mrf.mxu1 }
 0x2e6   : > { %4603 = vmatmul.mubr.msk.f32.gmra.mxu0 %vm732_vm2, %v2603_v46 }
 0x2f2   : > { %v2607_v48 = vpop.f32.mrf.mxu1 }
 0x2f3   : > { %v2608_v6 = vadd.f32 %v6705_v8, %v2607_v48 }
 0x2f4   : > { %v2609_v14 = vpop.f32.mrf.mxu1 }
 0x2f5   : > { %4605 = vmatprep.mubr.msk.f32.mxu0 %vm732_vm2, %v2608_v6 }
 0x2f6   : > { %v2612_v53 = vpop.f32.mrf.mxu1 }
 0x2f7   : > { %v2613_v50 = vadd.f32 %v6705_v8, %v2612_v53 }
 0x2f8   : > { %v2614_v10 = vpop.f32.mrf.mxu1 }
 0x2f9   : > { %4606 = vmatmul.mubr.msk.f32.gmra.mxu0 %vm732_vm2, %v2613_v50 }
 0x2fd   : > { %v2617_v20 = vpop.f32.mrf.mxu1 }
 0x2fe   : > { %v2618_v15 = vadd.f32 %v6705_v8, %v2617_v20 }
 0x2ff   : > { %v2619_v12 = vpop.f32.mrf.mxu1 }
 0x300   : > { %4608 = vmatprep.mubr.msk.f32.mxu0 %vm732_vm2, %v2618_v15 }
 0x301   : > { %v2622_v5 = vpop.f32.mrf.mxu1 }
 0x302   : > { %v2623_v22 = vadd.f32 %v6705_v8, %v2622_v5 }
 0x303   : > { %v2624_v28 = vpop.f32.mrf.mxu1 }
 0x304   : > { %4609 = vmatmul.mubr.msk.f32.gmra.mxu0 %vm732_vm2, %v2623_v22 }
 0x35a   : > { %v4565_v37 = vpop.f32.mrf.mxu0 }
 0x35b   : > { %v2803_v60 = vadd.f32 %v4565_v37, %v6825_v7 }
 0x35c   : > { %v2797_v0 = vpop.f32.mrf.mxu0 }
 0x35d   : > { %v4376_v54 = vmul.f32 -1.442695, %v2803_v60  ;;  %v2798_v29 = vadd.f32 %v6825_v7, %v2797_v0  ;;  %v5402_v0 = vld [vmem:[%s5532_s16 + $0x8] sm:$0xff] }
 0x35e   : > { %v4568_v36 = vpop.f32.mrf.mxu0 }
 0x35f   : > { %5242 = vpow2.f32 %v4376_v54  ;;  %v4375_v27 = vmul.f32 -1.442695, %v2798_v29  ;;  %v2813_v8 = vadd.f32 %v4568_v36, %v6825_v7 }
 0x360   : > { %v2807_v25 = vpop.f32.mrf.mxu0 }
 0x361   : > { %5244 = vpow2.f32 %v4375_v27  ;;  %v4378_v39 = vmul.f32 -1.442695, %v2813_v8  ;;  %v2808_v63 = vadd.f32 %v6825_v7, %v2807_v25 }
 0x362   : > { %v4571_v51 = vpop.f32.mrf.mxu0 }
 0x363   : > { %5246 = vpow2.f32 %v4378_v39  ;;  %v4377_v40 = vmul.f32 -1.442695, %v2808_v63  ;;  %v2823_v19 = vadd.f32 %v4571_v51, %v6825_v7 }
 0x364   : > { %v2817_v18 = vpop.f32.mrf.mxu0 }
 0x365   : > { %5248 = vpow2.f32 %v4377_v40  ;;  %v4380_v17 = vmul.f32 -1.442695, %v2823_v19  ;;  %v2818_v31 = vadd.f32 %v6825_v7, %v2817_v18  ;;  %v5403_v19 = vld [vmem:[%s5532_s16] sm:$0xff] }
 0x366   : > { %v4574_v47 = vpop.f32.mrf.mxu0 }
 0x367   : > { %5250 = vpow2.f32 %v4380_v17  ;;  %v4379_v56 = vmul.f32 -1.442695, %v2818_v31  ;;  %v2833_v34 = vadd.f32 %v4574_v47, %v6825_v7 }
 0x368   : > { %v2827_v49 = vpop.f32.mrf.mxu0 }
 0x369   : > { %v4382_v4 = vmul.f32 -1.442695, %v2833_v34  ;;  %v2828_v41 = vadd.f32 %v6825_v7, %v2827_v49  ;;  %5252 = vpow2.f32 %v4379_v56 }
 0x36a   : > { %v4577_v61 = vpop.f32.mrf.mxu0 }
 0x36b   : > { %v4381_v58 = vmul.f32 -1.442695, %v2828_v41  ;;  %v2843_v43 = vadd.f32 %v4577_v61, %v6825_v7  ;;  %5254 = vpow2.f32 %v4382_v4  ;;  %v5404_v61 = vld [vmem:[%s5532_s16 + $0x18] sm:$0xff] }
 0x36c   : > { %v5243_v24 = vpop.eup %5242  ;;  %v2837_v44 = vpop.f32.mrf.mxu0 }
 0x36d   : > { %v3053_v35 = vadd.f32 1.0, %v5243_v24  ;;  %v4384_v55 = vmul.f32 -1.442695, %v2843_v43  ;;  %v2838_v32 = vadd.f32 %v6825_v7, %v2837_v44  ;;  %5256 = vpow2.f32 %v4381_v58 }
 0x36e   : > { %v5245_v3 = vpop.eup %5244  ;;  %v4580_v21 = vpop.f32.mrf.mxu0 }
 0x36f   : > { %5258 = vrcp.f32 %v3053_v35  ;;  %v3052_v13 = vadd.f32 1.0, %v5245_v3  ;;  %v4383_v52 = vmul.f32 -1.442695, %v2838_v32  ;;  %v2853_v11 = vadd.f32 %v4580_v21, %v6825_v7  ;;  %v5405_v21 = vld [vmem:[%s5532_s16 + $0x10] sm:$0xff] }
 0x370   : > { %v5247_v42 = vpop.eup %5246  ;;  %5260 = vpow2.f32 %v4384_v55  ;;  %v2847_v2 = vpop.f32.mrf.mxu0 }
 0x371   : > { %5262 = vrcp.f32 %v3052_v13  ;;  %v3055_v57 = vadd.f32 1.0, %v5247_v42  ;;  %v4386_v59 = vmul.f32 -1.442695, %v2853_v11  ;;  %v2848_v23 = vadd.f32 %v6825_v7, %v2847_v2 }
 0x372   : > { %v5249_v45 = vpop.eup %5248  ;;  %5264 = vpow2.f32 %v4383_v52  ;;  %v4583_v33 = vpop.f32.mrf.mxu0 }
 0x373   : > { %5266 = vrcp.f32 %v3055_v57  ;;  %v3054_v62 = vadd.f32 1.0, %v5249_v45  ;;  %v4385_v16 = vmul.f32 -1.442695, %v2848_v23  ;;  %v2863_v30 = vadd.f32 %v4583_v33, %v6825_v7  ;;  %v5406_v33 = vld [vmem:[%s5532_s16 + $0x28] sm:$0xff] }
 0x374   : > { %v5251_v46 = vpop.eup %5250  ;;  %5268 = vpow2.f32 %v4386_v59  ;;  %v2857_v26 = vpop.f32.mrf.mxu0 }
 0x375   : > { %v4388_v1 = vmul.f32 -1.442695, %v2863_v30  ;;  %v2858_v38 = vadd.f32 %v6825_v7, %v2857_v26  ;;  %5270 = vpow2.f32 %v4385_v16  ;;  %v3057_v6 = vadd.f32 1.0, %v5251_v46 }
 0x376   : > { %v4586_v48 = vpop.f32.mrf.mxu0  ;;  %v5253_v9 = vpop.eup %5252  ;;  %5272 = vrcp.f32 %v3054_v62 }
 0x377   : > { %v2873_v14 = vadd.f32 %v4586_v48, %v6825_v7  ;;  %5274 = vpow2.f32 %v4388_v1  ;;  %v4387_v53 = vmul.f32 -1.442695, %v2858_v38  ;;  %v3056_v20 = vadd.f32 1.0, %v5253_v9  ;;  %v5407_v1 = vld [vmem:[%s5532_s16 + $0x48] sm:$0xff] }
 0x378   : > { %v2867_v50 = vpop.f32.mrf.mxu0  ;;  %v5255_v10 = vpop.eup %5254  ;;  %5276 = vrcp.f32 %v3057_v6 }
 0x379   : > { %v4390_v12 = vmul.f32 -1.442695, %v2873_v14  ;;  %v2868_v5 = vadd.f32 %v6825_v7, %v2867_v50  ;;  %5278 = vpow2.f32 %v4387_v53  ;;  %v3059_v60 = vadd.f32 1.0, %v5255_v10  ;;  %v5408_v50 = vld [vmem:[%s5532_s16 + $0x20] sm:$0xff] }
 0x37a   : > { %v5257_v15 = vpop.eup %5256  ;;  %v4589_v22 = vpop.f32.mrf.mxu0  ;;  %5280 = vrcp.f32 %v3056_v20 }
 0x37b   : > { %v2883_v27 = vadd.f32 %v4589_v22, %v6825_v7  ;;  %5282 = vpow2.f32 %v4390_v12  ;;  %v4389_v25 = vmul.f32 -1.442695, %v2868_v5  ;;  %v3058_v31 = vadd.f32 1.0, %v5257_v15  ;;  %v5409_v5 = vld [vmem:[%s5532_s16 + $0x40] sm:$0xff] }
 0x37c   : > { %v5259_v28 = vpop.eup %5258  ;;  %v2877_v39 = vpop.f32.mrf.mxu0 }
 0x37d   : > { %v5261_v37 = vpop.eup %5260  ;;  %v6844_v54 = vmul.f32 %v5402_v0, %v5259_v28  ;;  %v4392_v56 = vmul.f32 -1.442695, %v2883_v27  ;;  %v2878_v49 = vadd.f32 %v6825_v7, %v2877_v39  ;;  %v5410_v27 = vld [vmem:[%s5532_s16 + $0x38] sm:$0xff] }
 0x37e   : > { %v5263_v29 = vpop.eup %5262  ;;  %v3061_v36 = vadd.f32 1.0, %v5261_v37  ;;  %v4592_v4 = vpop.f32.mrf.mxu0 }
 0x37f   : > { %v5265_v8 = vpop.eup %5264  ;;  %v3183_v63 = vsel %vm410_vm1, %v6844_v54, 0.0  ;;  %v6850_v18 = vmul.f32 %v5403_v19, %v5263_v29  ;;  %v2893_v35 = vadd.f32 %v4592_v4, %v6825_v7  ;;  %v4391_v55 = vmul.f32 -1.442695, %v2878_v49 }
 0x380   : > { %v5267_v51 = vpop.eup %5266  ;;  %5284 = vrcp.f32 %v3061_v36  ;;  %v3060_v40 = vadd.f32 1.0, %v5265_v8  ;;  %3184 = vadd.xlane.f32.xlu1 %v3183_v63  ;;  %v2887_v32 = vpop.f32.mrf.mxu0 }
 0x381   : > { %v5269_v17 = vpop.eup %5268  ;;  %5286 = vrcp.f32 %v3059_v60  ;;  %v3180_v41 = vsel %vm410_vm1, %v6850_v18, 0.0  ;;  %v6856_v58 = vmul.f32 %v5404_v61, %v5267_v51  ;;  %v4394_v2 = vmul.f32 -1.442695, %v2893_v35  ;;  %v5411_v51 = vld [vmem:[%s5532_s16 + $0x58] sm:$0xff] }
 0x382   : > { %5288 = vrcp.f32 %v3060_v40  ;;  %v3063_v47 = vadd.f32 1.0, %v5269_v17  ;;  %v5271_v34 = vpop.eup %5270  ;;  %v2888_v59 = vadd.f32 %v6825_v7, %v2887_v32  ;;  %v4595_v23 = vpop.f32.mrf.mxu0 }
 0x383   : > { %5290 = vpow2.f32 %v4389_v25  ;;  %v5273_v43 = vpop.eup %5272  ;;  %v3062_v24 = vadd.f32 1.0, %v5271_v34  ;;  %v3189_v3 = vsel %vm410_vm1, %v6856_v58, 0.0  ;;  %v2903_v6 = vadd.f32 %v4595_v23, %v6825_v7  ;;  %v5412_v34 = vld [vmem:[%s5532_s16 + $0x30] sm:$0xff]  ;;  %v5414_v23 = vld [vmem:[%s5532_s16 + $0x68] sm:$0xff] }
 0x384   : > { %5292 = vrcp.f32 %v3063_v47  ;;  %3181 = vadd.xlane.f32.xlu1 %v3180_v41  ;;  %v5275_v44 = vpop.eup %5274  ;;  %v6862_v13 = vmul.f32 %v5405_v21, %v5273_v43  ;;  %v4393_v9 = vmul.f32 -1.442695, %v2888_v59  ;;  %v2897_v14 = vpop.f32.mrf.mxu0 }
 0x385   : > { %5294 = vrcp.f32 %v3058_v31  ;;  %v5277_v52 = vpop.eup %5276  ;;  %v3065_v11 = vadd.f32 1.0, %v5275_v44  ;;  %v2898_v37 = vadd.f32 %v6825_v7, %v2897_v14  ;;  %v4396_v29 = vmul.f32 -1.442695, %v2903_v6 }
 0x386   : > { %5296 = vpow2.f32 %v4392_v56  ;;  %v5279_v42 = vpop.eup %5278  ;;  %v3186_v45 = vsel %vm410_vm1, %v6862_v13, 0.0  ;;  %v6868_v62 = vmul.f32 %v5406_v33, %v5277_v52 }
 0x387   : > { %5298 = vrcp.f32 %v3062_v24  ;;  %v5281_v57 = vpop.eup %5280  ;;  %v3064_v30 = vadd.f32 1.0, %v5279_v42  ;;  %v4395_v17 = vmul.f32 -1.442695, %v2898_v37  ;;  %v5413_v24 = vld [vmem:[%s5532_s16 + $0x50] sm:$0xff] }
 0x388   : > { %3190 = vadd.xlane.f32.xlu1 %v3189_v3  ;;  %5300 = vpow2.f32 %v4391_v55  ;;  %v5283_v16 = vpop.eup %5282  ;;  %v3195_v53 = vsel %vm410_vm1, %v6868_v62, 0.0  ;;  %v6877_v10 = vmul.f32 %v5408_v50, %v5281_v57 }
 0x389   : > { %5302 = vrcp.f32 %v3065_v11  ;;  %v3067_v15 = vadd.f32 1.0, %v5283_v16 }
 0x38a   : > { %5304 = vpow2.f32 %v4394_v2  ;;  %v3192_v36 = vsel %vm410_vm1, %v6877_v10, 0.0 }
 0x38b   : > { %5306 = vrcp.f32 %v3064_v30 }
 0x38c   : > { %3187 = vadd.xlane.f32.xlu1 %v3186_v45  ;;  %v4598_v60 = vpop.f32.mrf.mxu0  ;;  %5308 = vpow2.f32 %v4393_v9 }
 0x38d   : > { %v5285_v46 = vpop.eup %5284  ;;  %5310 = vrcp.f32 %v3067_v15  ;;  %v2913_v31 = vadd.f32 %v4598_v60, %v6825_v7 }
 0x38e   : > { %v5287_v26 = vpop.eup %5286  ;;  %v6871_v38 = vmul.f32 %v5407_v1, %v5285_v46  ;;  %v2907_v47 = vpop.f32.mrf.mxu0  ;;  %5312 = vpow2.f32 %v4396_v29 }
 0x38f   : > { %v5289_v48 = vpop.eup %5288  ;;  %v6888_v8 = vmul.f32 %v5410_v27, %v5287_v26  ;;  %v4398_v32 = vmul.f32 -1.442695, %v2913_v31  ;;  %v2908_v52 = vadd.f32 %v6825_v7, %v2907_v47 }
 0x390   : > { %v5291_v20 = vpop.eup %5290  ;;  %v3207_v12 = vsel %vm410_vm1, %v6871_v38, 0.0  ;;  %3196 = vadd.xlane.f32.xlu1 %v3195_v53  ;;  %v6882_v22 = vmul.f32 %v5409_v5, %v5289_v48  ;;  %v5415_v48 = vld [vmem:[%s5532_s16 + $0x60] sm:$0xff] }
 0x391   : > { %v5293_v28 = vpop.eup %5292  ;;  %3208 = vadd.xlane.f32.xlu0 %v3207_v12  ;;  %v3066_v39 = vadd.f32 1.0, %v5291_v20  ;;  %v3201_v56 = vsel %vm410_vm1, %v6888_v8, 0.0  ;;  %v4397_v30 = vmul.f32 -1.442695, %v2908_v52  ;;  %v5416_v20 = vld [vmem:[%s5532_s16 + $0x78] sm:$0xff] }
 0x392   : > { %v5295_v0 = vpop.eup %5294  ;;  %v3204_v63 = vsel %vm410_vm1, %v6882_v22, 0.0  ;;  %v6893_v40 = vmul.f32 %v5411_v51, %v5293_v28 }
 0x393   : > { %v5297_v25 = vpop.eup %5296  ;;  %v6899_v49 = vmul.f32 %v5412_v34, %v5295_v0  ;;  %5314 = vrcp.f32 %v3066_v39 }
 0x394   : > { %3193 = vadd.xlane.f32.xlu1 %v3192_v36  ;;  %v5299_v19 = vpop.eup %5298  ;;  %v3069_v41 = vadd.f32 1.0, %v5297_v25  ;;  %v3213_v61 = vsel %vm410_vm1, %v6893_v40, 0.0  ;;  %5316 = vpow2.f32 %v4395_v17  ;;  %v5417_v25 = vld [vmem:[%s5532_s16 + $0x70] sm:$0xff] }
 0x395   : > { %3205 = vadd.xlane.f32.xlu0 %v3204_v63  ;;  %v5301_v4 = vpop.eup %5300  ;;  %v6904_v44 = vmul.f32 %v5413_v24, %v5299_v19  ;;  %v3198_v2 = vsel %vm410_vm1, %v6899_v49, 0.0 }
 0x396   : > { %v5303_v35 = vpop.eup %5302  ;;  %5318 = vrcp.f32 %v3069_v41  ;;  %v3068_v57 = vadd.f32 1.0, %v5301_v4  ;;  %v5418_v4 = vld [vmem:[%s5532_s16 + $0x88] sm:$0xff] }
 0x397   : > { %v5305_v21 = vpop.eup %5304  ;;  %v3210_v59 = vsel %vm410_vm1, %v6904_v44, 0.0  ;;  %v6914_v45 = vmul.f32 %v5414_v23, %v5303_v35 }
 0x398   : > { %3202 = vadd.xlane.f32.xlu1 %v3201_v56  ;;  %v5307_v33 = vpop.eup %5306  ;;  %v3071_v26 = vadd.f32 1.0, %v5305_v21 }
 0x399   : > { %v4601_v43 = vpop.f32.mrf.mxu0  ;;  %3214 = vadd.xlane.f32.xlu0 %v3213_v61  ;;  %v5309_v46 = vpop.eup %5308  ;;  %v3219_v1 = vsel %vm410_vm1, %v6914_v45, 0.0  ;;  %v6919_v9 = vmul.f32 %v5415_v48, %v5307_v33 }
 0x39a   : > { %v2923_v55 = vadd.f32 %v4601_v43, %v6825_v7  ;;  %v5311_v6 = vpop.eup %5310  ;;  %v3070_v14 = vadd.f32 1.0, %v5309_v46  ;;  %v5421_v46 = vld [vmem:[%s5532_s16 + $0x90] sm:$0xff] }
 0x39b   : > { %v2917_v3 = vpop.f32.mrf.mxu0  ;;  %v5313_v53 = vpop.eup %5312  ;;  %v3216_v50 = vsel %vm410_vm1, %v6919_v9, 0.0  ;;  %v6924_v15 = vmul.f32 %v5416_v20, %v5311_v6 }
 0x39c   : > { %v4400_v11 = vmul.f32 -1.442695, %v2923_v55  ;;  %v2918_v42 = vadd.f32 %v6825_v7, %v2917_v3  ;;  %3199 = vadd.xlane.f32.xlu1 %v3198_v2  ;;  %v3073_v60 = vadd.f32 1.0, %v5313_v53  ;;  %v5420_v2 = vld [vmem:[%s5532_s16 + $0x98] sm:$0xff] }
 0x39d   : > { %3211 = vadd.xlane.f32.xlu0 %v3210_v59  ;;  %7439 = vst [vmem:[#allocation4_spill] sm:$0xff] %v6924_v15  ;;  %v3225_v27 = vsel %vm410_vm1, %v6924_v15, 0.0 }
 0x39e   : > { %5320 = vpow2.f32 %v4400_v11  ;;  %v4399_v16 = vmul.f32 -1.442695, %v2918_v42 }
 0x39f   : > { %5322 = vpow2.f32 %v4398_v32  ;;  %v5419_v32 = vld [vmem:[%s5532_s16 + $0x80] sm:$0xff] }
 0x3a0   : > { %5324 = vpow2.f32 %v4399_v16  ;;  %v5315_v12 = vpop.eup %5314 }
 0x3a1   : > { %5326 = vrcp.f32 %v3068_v57  ;;  %3220 = vadd.xlane.f32.xlu0 %v3219_v1  ;;  %v5317_v37 = vpop.eup %5316  ;;  %v6931_v39 = vmul.f32 %v5417_v25, %v5315_v12  ;;  %v5422_v12 = vld [vmem:[%s5532_s16 + $0xc8] sm:$0xff]  ;;  %v5424_v25 = vld [vmem:[%s5532_s16 + $0xc0] sm:$0xff] }
 0x3a2   : > { %5328 = vpow2.f32 %v4397_v30  ;;  %v3072_v56 = vadd.f32 1.0, %v5317_v37 }
 0x3a3   : > { %5330 = vrcp.f32 %v3071_v26  ;;  %7440 = vst [vmem:[#allocation5_spill] sm:$0xff] %v6931_v39  ;;  %v5319_v63 = vpop.eup %5318  ;;  %v3222_v34 = vsel %vm410_vm1, %v6931_v39, 0.0 }
 0x3a4   : > { %5332 = vrcp.f32 %v3070_v14  ;;  %v6936_v41 = vmul.f32 %v5418_v4, %v5319_v63 }
 0x3a5   : > { %3217 = vadd.xlane.f32.xlu0 %v3216_v50 }
 0x3a6   : > { %v4604_v5 = vpop.f32.mrf.mxu0  ;;  %v3231_v55 = vsel %vm410_vm1, %v6936_v41, 0.0 }
 0x3a7   : > { %v2933_v28 = vadd.f32 %v4604_v5, %v6825_v7 }
 0x3a8   : > { %v2927_v0 = vpop.f32.mrf.mxu0 }
 0x3a9   : > { %v4402_v29 = vmul.f32 -1.442695, %v2933_v28  ;;  %v2928_v36 = vadd.f32 %v6825_v7, %v2927_v0  ;;  %3226 = vadd.xlane.f32.xlu0 %v3225_v27 }
 0x3ab   : > { %v5321_v51 = vpop.eup %5320  ;;  %5334 = vpow2.f32 %v4402_v29  ;;  %v4401_v19 = vmul.f32 -1.442695, %v2928_v36 }
 0x3ac   : > { %v5323_v17 = vpop.eup %5322  ;;  %5336 = vrcp.f32 %v3073_v60  ;;  %v3077_v31 = vadd.f32 1.0, %v5321_v51  ;;  %v5423_v60 = vld [vmem:[%s5532_s16 + $0xa8] sm:$0xff] }
 0x3ad   : > { %v5325_v47 = vpop.eup %5324  ;;  %5338 = vpow2.f32 %v4401_v19  ;;  %3223 = vadd.xlane.f32.xlu0 %v3222_v34  ;;  %v3075_v24 = vadd.f32 1.0, %v5323_v17  ;;  %v5425_v17 = vld [vmem:[%s5532_s16 + $0xa0] sm:$0xff]  ;;  %v5426_v34 = vld [vmem:[%s5532_s16 + $0xb8] sm:$0xff] }
 0x3ae   : > { %v5327_v61 = vpop.eup %5326  ;;  %5340 = vrcp.f32 %v3077_v31  ;;  %v3076_v43 = vadd.f32 1.0, %v5325_v47 }
 0x3af   : > { %v5329_v35 = vpop.eup %5328  ;;  %v6941_v3 = vmul.f32 %v5419_v32, %v5327_v61 }
 0x3b0   : > { %5342 = vrcp.f32 %v3076_v43  ;;  %v5331_v21 = vpop.eup %5330  ;;  %v3074_v11 = vadd.f32 1.0, %v5329_v35 }
 0x3b1   : > { %5344 = vrcp.f32 %v3072_v56  ;;  %3232 = vadd.xlane.f32.xlu0 %v3231_v55  ;;  %v5333_v52 = vpop.eup %5332  ;;  %v3228_v42 = vsel %vm410_vm1, %v6941_v3, 0.0  ;;  %v6946_v57 = vmul.f32 %v5420_v2, %v5331_v21 }
 0x3b2   : > { %5346 = vrcp.f32 %v3075_v24  ;;  %v6951_v26 = vmul.f32 %v5421_v46, %v5333_v52 }
 0x3b3   : > { %5348 = vrcp.f32 %v3074_v11  ;;  %v3237_v16 = vsel %vm410_vm1, %v6946_v57, 0.0 }
 0x3b4   : > { %v3234_v37 = vsel %vm410_vm1, %v6951_v26, 0.0 }
 0x3b5   : > { %3229 = vadd.xlane.f32.xlu0 %v3228_v42  ;;  %v5427_v42 = vld [vmem:[%s5532_s16 + $0xb0] sm:$0xff] }
 0x3b8   : > { %v5335_v59 = vpop.eup %5334 }
 0x3b9   : > { %v5337_v23 = vpop.eup %5336  ;;  %v3079_v33 = vadd.f32 1.0, %v5335_v59  ;;  %v4607_v30 = vpop.f32.mrf.mxu0  ;;  %3238 = vadd.xlane.f32.xlu0 %v3237_v16  ;;  %v5428_v59 = vld [vmem:[%s5532_s16 + $0xd8] sm:$0xff] }
 0x3ba   : > { %v5339_v1 = vpop.eup %5338  ;;  %v2943_v48 = vadd.f32 %v4607_v30, %v6825_v7  ;;  %v6961_v0 = vmul.f32 %v5423_v60, %v5337_v23  ;;  %v5430_v60 = vld [vmem:[%s5532_s16 + $0xe8] sm:$0xff] }
 0x3bb   : > { %v5341_v6 = vpop.eup %5340  ;;  %5350 = vrcp.f32 %v3079_v33  ;;  %v3078_v14 = vadd.f32 1.0, %v5339_v1  ;;  %v2937_v53 = vpop.f32.mrf.mxu0 }
 0x3bc   : > { %v4404_v50 = vmul.f32 -1.442695, %v2943_v48  ;;  %v2938_v20 = vadd.f32 %v6825_v7, %v2937_v53  ;;  %v6956_v5 = vmul.f32 %v5422_v12, %v5341_v6  ;;  %v3243_v19 = vsel %vm410_vm1, %v6961_v0, 0.0 }
 0x3bd   : > { %v5343_v28 = vpop.eup %5342  ;;  %5352 = vrcp.f32 %v3078_v14  ;;  %3235 = vadd.xlane.f32.xlu0 %v3234_v37 }
 0x3be   : > { %v5345_v29 = vpop.eup %5344  ;;  %5354 = vpow2.f32 %v4404_v50  ;;  %v4403_v36 = vmul.f32 -1.442695, %v2938_v20  ;;  %v3255_v27 = vsel %vm410_vm1, %v6956_v5, 0.0  ;;  %v6966_v63 = vmul.f32 %v5424_v25, %v5343_v28  ;;  %v5431_v25 = vld [vmem:[%s5532_s16 + $0xe0] sm:$0xff] }
 0x3bf   : > { %3256 = vadd.xlane.f32.xlu1 %v3255_v27  ;;  %v5347_v51 = vpop.eup %5346  ;;  %v6971_v31 = vmul.f32 %v5425_v17, %v5345_v29 }
 0x3c0   : > { %5356 = vpow2.f32 %v4403_v36  ;;  %v3252_v47 = vsel %vm410_vm1, %v6966_v63, 0.0  ;;  %v6976_v4 = vmul.f32 %v5426_v34, %v5347_v51  ;;  %v5349_v24 = vpop.eup %5348 }
 0x3c1   : > { %3244 = vadd.xlane.f32.xlu0 %v3243_v19  ;;  %v3240_v43 = vsel %vm410_vm1, %v6971_v31, 0.0  ;;  %v6985_v2 = vmul.f32 %v5427_v42, %v5349_v24 }
 0x3c2   : > { %7441 = vst [vmem:[#allocation6_spill] sm:$0xff] %v6976_v4  ;;  %v3249_v52 = vsel %vm410_vm1, %v6976_v4, 0.0 }
 0x3c3   : > { %3253 = vadd.xlane.f32.xlu1 %v3252_v47  ;;  %7442 = vst [vmem:[#allocation7_spill] sm:$0xff] %v6985_v2  ;;  %v3246_v6 = vsel %vm410_vm1, %v6985_v2, 0.0  ;;  %v5432_v47 = vld [vmem:[%s5532_s16 + $0xf8] sm:$0xff] }
 0x3c4   : > { %v4610_v56 = vpop.f32.mrf.mxu0 }
 0x3c5   : > { %v2953_v61 = vadd.f32 %v4610_v56, %v6825_v7  ;;  %3241 = vadd.xlane.f32.xlu0 %v3240_v43  ;;  %v5433_v43 = vld [vmem:[%s5532_s16 + $0xf0] sm:$0xff] }
 0x3c6   : > { %v2947_v35 = vpop.f32.mrf.mxu0 }
 0x3c7   : > { %v4406_v55 = vmul.f32 -1.442695, %v2953_v61  ;;  %v2948_v32 = vadd.f32 %v6825_v7, %v2947_v35  ;;  %v5429_v7 = vld [vmem:[%s5532_s16 + $0xd0] sm:$0xff]  ;;  %s5454_s16 = smov 12  }
 0x3c8   : > { %v5351_v21 = vpop.eup %5350 }
 0x3c9   : > { %5358 = vpow2.f32 %v4406_v55  ;;  %v4405_v11 = vmul.f32 -1.442695, %v2948_v32  ;;  %v6988_v23 = vmul.f32 %v5428_v59, %v5351_v21  ;;  %3250 = vadd.xlane.f32.xlu0 %v3249_v52  ;;  %v7019_v55 = vpop.permute.xlu0 %3454  ;;  %v7023_v21 = vpop.permute.xlu1 %3486 }
 0x3ca   : > { %v5353_v33 = vpop.eup %5352 }
 0x3cb   : > { %v5355_v16 = vpop.eup %5354  ;;  %5360 = vpow2.f32 %v4405_v11  ;;  %v3261_v30 = vsel %vm410_vm1, %v6988_v23, 0.0  ;;  %v6993_v46 = vmul.f32 %v5429_v7, %v5353_v33 }
 0x3cc   : > { %v3081_v1 = vadd.f32 1.0, %v5355_v16  ;;  %3262 = vadd.xlane.f32.xlu1 %v3261_v30 }
 0x3cd   : > { %v5357_v48 = vpop.eup %5356  ;;  %3247 = vadd.xlane.f32.xlu0 %v3246_v6  ;;  %v3258_v53 = vsel %vm410_vm1, %v6993_v46, 0.0  ;;  %v7021_v32 = vpop.permute.xlu0 %3628 }
 0x3ce   : > { %5362 = vrcp.f32 %v3081_v1  ;;  %v3080_v14 = vadd.f32 1.0, %v5357_v48 }
 0x3d0   : > { %5364 = vrcp.f32 %v3080_v14  ;;  %3259 = vadd.xlane.f32.xlu1 %v3258_v53 }
 0x3d1   : > { %v7025_v52 = vpop.permute.xlu0 %3660 }
 0x3d6   : > { %v5359_v50 = vpop.eup %5358 }
 0x3d7   : > { %v3083_v20 = vadd.f32 1.0, %v5359_v50 }
 0x3d8   : > { %v5361_v12 = vpop.eup %5360 }
 0x3d9   : > { %5366 = vrcp.f32 %v3083_v20  ;;  %v3082_v28 = vadd.f32 1.0, %v5361_v12 }
 0x3db   : > { %v5363_v37 = vpop.eup %5362  ;;  %5368 = vrcp.f32 %v3082_v28 }
 0x3dc   : > { %v7000_v29 = vmul.f32 %v5430_v60, %v5363_v37 }
 0x3dd   : > { %v5365_v36 = vpop.eup %5364 }
 0x3de   : > { %v3267_v27 = vsel %vm410_vm1, %v7000_v29, 0.0  ;;  %v7005_v51 = vmul.f32 %v5431_v25, %v5365_v36 }
 0x3df   : > { %3268 = vadd.xlane.f32.xlu1 %v3267_v27 }
 0x3e0   : > { %7443 = vst [vmem:[#allocation8_spill] sm:$0xff] %v7005_v51  ;;  %v3264_v19 = vsel %vm410_vm1, %v7005_v51, 0.0 }
 0x3e3   : > { %3265 = vadd.xlane.f32.xlu1 %v3264_v19 }
 0x3e6   : > { %v5367_v17 = vpop.eup %5366 }
 0x3e7   : > { %v7010_v56 = vmul.f32 %v5432_v47, %v5367_v17 }
 0x3e8   : > { %v5369_v34 = vpop.eup %5368 }
 0x3e9   : > { %7444 = vst [vmem:[#allocation9_spill] sm:$0xff] %v7010_v56  ;;  %v3273_v61 = vsel %vm410_vm1, %v7010_v56, 0.0  ;;  %v7015_v24 = vmul.f32 %v5433_v43, %v5369_v34 }
 0x3ea   : > { %3274 = vadd.xlane.f32.xlu1 %v3273_v61 }
 0x3eb   : > { %7445 = vst [vmem:[#allocation10_spill] sm:$0xff] %v7015_v24  ;;  %v3270_v35 = vsel %vm410_vm1, %v7015_v24, 0.0 }
 0x3ee   : > { %3271 = vadd.xlane.f32.xlu1 %v3270_v35 }
 0x409   : > { %v3185_v11 = vpop.xlane.xlu1 %3184 }
 0x40a   : > { %v3278_v27 = vmul.f32 0.125, %v3185_v11 }
 0x40d   : > { %v3182_v33 = vpop.xlane.xlu1 %3181 }
 0x40e   : > { %v3277_v35 = vmul.f32 0.125, %v3182_v33 }
 0x411   : > { %v3191_v30 = vpop.xlane.xlu1 %3190 }
 0x412   : > { %v3280_v33 = vmul.f32 0.125, %v3191_v30 }
 0x415   : > { %v3188_v48 = vpop.xlane.xlu1 %3187 }
 0x419   : > { %v7031_v14 = vpop.xlane.xlu1 %3196 }
 0x41a   : > { %v3209_v42 = vpop.xlane.xlu0 %3208 }
 0x41b   : > { %v3286_v60 = vmul.f32 0.125, %v3209_v42 }
 0x41d   : > { %v7035_v50 = vpop.xlane.xlu1 %3193  ;;  %v3311_v17 = vsel %vm3309_vm14, %v3278_v27, %v3286_v60 }
 0x41e   : > { %v3206_v59 = vpop.xlane.xlu0 %3205 }
 0x41f   : > { %v3285_v47 = vmul.f32 0.125, %v3206_v59 }
 0x421   : > { %v7039_v12 = vpop.xlane.xlu1 %3202 }
 0x422   : > { %v3215_v16 = vpop.xlane.xlu0 %3214 }
 0x423   : > { %v3288_v59 = vmul.f32 0.125, %v3215_v16 }
 0x425   : > { %v7041_v37 = vpop.xlane.xlu1 %3199 }
 0x426   : > { %v3212_v7 = vpop.xlane.xlu0 %3211 }
 0x42a   : > { %v7027_v1 = vpop.xlane.xlu0 %3220 }
 0x42e   : > { %v7029_v6 = vpop.xlane.xlu0 %3217 }
 0x432   : > { %v7033_v53 = vpop.xlane.xlu0 %3226 }
 0x436   : > { %v7037_v20 = vpop.xlane.xlu0 %3223 }
 0x43a   : > { %v3233_v28 = vpop.xlane.xlu0 %3232 }
 0x43b   : > { %v3294_v36 = vmul.f32 0.125, %v3233_v28  ;;  %v3310_v28 = vsel %vm3309_vm14, %v3277_v35, %v3285_v47  ;;  %v3279_v47 = vmul.f32 0.125, %v3188_v48 }
 0x43d   : > { %v3320_v61 = vsel %vm3318_vm15, %v3311_v17, %v3294_v36  ;;  %v3287_v17 = vmul.f32 0.125, %v3212_v7 }
 0x43e   : > { %v3230_v25 = vpop.xlane.xlu0 %3229 }
 0x43f   : > { %v3293_v43 = vmul.f32 0.125, %v3230_v25 }
 0x441   : > { %v3319_v2 = vsel %vm3318_vm15, %v3310_v28, %v3293_v43 }
 0x442   : > { %v3239_v39 = vpop.xlane.xlu0 %3238 }
 0x443   : > { %v3296_v60 = vmul.f32 0.125, %v3239_v39 }
 0x446   : > { %v3236_v25 = vpop.xlane.xlu0 %3235 }
 0x447   : > { %v3295_v16 = vmul.f32 0.125, %v3236_v25  ;;  %v3282_v25 = vmul.f32 0.125, %v7031_v14 }
 0x448   : > { %v3257_v19 = vpop.xlane.xlu1 %3256 }
 0x449   : > { %v3302_v34 = vmul.f32 0.125, %v3257_v19  ;;  %v3313_v19 = vsel %vm3309_vm14, %v3280_v33, %v3288_v59  ;;  %v3290_v59 = vmul.f32 0.125, %v7027_v1 }
 0x44a   : > { %v3245_v28 = vpop.xlane.xlu0 %3244 }
 0x44b   : > { %v3329_v24 = vsel %vm3327_vm0, %v3320_v61, %v3302_v34  ;;  %v3312_v61 = vsel %vm3309_vm14, %v3279_v47, %v3287_v17  ;;  %v3315_v17 = vsel %vm3309_vm14, %v3282_v25, %v3290_v59 }
 0x44c   : > { %3366 = vst.msk [vmem:[#allocation3 + $0x21] sm:$0xff] %vm3336_vm12, %v3329_v24  ;;  %v3254_v42 = vpop.xlane.xlu1 %3253  ;;  %v3321_v7 = vsel %vm3318_vm15, %v3312_v61, %v3295_v16  ;;  %v3281_v16 = vmul.f32 0.125, %v7035_v50 }
 0x44d   : > { %v3301_v11 = vmul.f32 0.125, %v3254_v42 }
 0x44e   : > { %v3242_v33 = vpop.xlane.xlu0 %3241 }
 0x44f   : > { %v3328_v56 = vsel %vm3327_vm0, %v3319_v2, %v3301_v11  ;;  %v3774_v11 = vld [vmem:[%s7429_s7 + $0x20] sm:$0xf]  ;;  %v3297_v1 = vmul.f32 0.125, %v3242_v33 }
 0x450   : > { %3365 = vst.msk [vmem:[#allocation3 + $0x11] sm:$0xff] %vm3336_vm12, %v3328_v56  ;;  %v3322_v56 = vsel %vm3318_vm15, %v3313_v19, %v3296_v60  ;;  %4611 = vmatprep.subr.msk.mxu0 %vm3807_vm3, %v3774_v11  ;;  %v3298_v60 = vmul.f32 0.125, %v3245_v28 }
 0x451   : > { %4612 = vmatpush3.msk.msra.mxu0 %vm3807_vm3, %v3774_v11  ;;  %v3284_v11 = vmul.f32 0.125, %v7039_v12  ;;  %v3772_v12 = vld [vmem:[%s7429_s7 + $0x10] sm:$0xff] }
 0x453   : > { %v3406_v36 = vld [vmem:[#allocation3 + $0x21] sm:$0xff] }
 0x454   : > { %v7051_v27 = vld [vmem:[#allocation3 + $0x20] sm:$0xff]  ;;  %3552 = vrot.lane.b32.xlu1 %v3406_v36, %s5444_s27 }
 0x455   : > { %3520 = vrot.lane.b32.xlu0 %v7051_v27, %s5454_s16  ;;  %v3263_v24 = vpop.xlane.xlu1 %3262  ;;  %v3414_v39 = vld [vmem:[#allocation3 + $0x22] sm:$0xff] }
 0x456   : > { %v3304_v2 = vmul.f32 0.125, %v3263_v24 }
 0x457   : > { %v3382_v35 = vld [vmem:[#allocation3 + $0x11] sm:$0xff] }
 0x458   : > { %v3331_v34 = vsel %vm3327_vm0, %v3322_v56, %v3304_v2  ;;  %3584 = vrot.lane.b32.xlu1 %v3414_v39, %s5455_s25  ;;  %v7068_v48 = vld [vmem:[#allocation3 + $0x10] sm:$0xff]  ;;  %v3324_v56 = vsel %vm3318_vm15, %v3315_v17, %v3298_v60 }
 0x459   : > { %3458 = vrot.lane.b32.xlu0 %v3406_v36, %s5451_s20  ;;  %3368 = vst.msk [vmem:[#allocation3 + $0x41] sm:$0xff] %vm3336_vm12, %v3331_v34  ;;  %v3260_v30 = vpop.xlane.xlu1 %3259  ;;  %v3390_v47 = vld [vmem:[#allocation3 + $0x12] sm:$0xff] }
 0x45a   : > { %v3303_v43 = vmul.f32 0.125, %v3260_v30  ;;  %v3251_v30 = vpop.xlane.xlu0 %3250 }
 0x45b   : > { %v3300_v28 = vmul.f32 0.125, %v3251_v30 }
 0x45c   : > { %v3330_v42 = vsel %vm3327_vm0, %v3321_v7, %v3303_v43  ;;  %3456 = vrot.lane.b32.xlu1 %v3382_v35, %s5451_s20 }
 0x45d   : > { %3490 = vrot.lane.b32.xlu0 %v3414_v39, %s5450_s19  ;;  %3367 = vst.msk [vmem:[#allocation3 + $0x31] sm:$0xff] %vm3336_vm12, %v3330_v42  ;;  %v3292_v42 = vmul.f32 0.125, %v7033_v53 }
 0x45e   : > { %v3248_v59 = vpop.xlane.xlu0 %3247 }
 0x45f   : > { %v3317_v25 = vsel %vm3309_vm14, %v3284_v11, %v3292_v42 }
 0x460   : > { %3518 = vrot.lane.b32.xlu1 %v7068_v48, %s5454_s16  ;;  %v7081_v24 = vld [vmem:[#allocation3 + $0x40] sm:$0xff]  ;;  %v3326_v53 = vsel %vm3318_vm15, %v3317_v25, %v3300_v28  ;;  %v3445_v25 = vld [vmem:[#allocation3 + $0x92] sm:$0xff] }
 0x461   : > { %3614 = vrot.lane.b32.xlu0 %v7051_v27, %s5452_s21  ;;  %v3385_v34 = vld [vmem:[#allocation3 + $0x41] sm:$0xff] }
 0x464   : > { %3550 = vrot.lane.b32.xlu1 %v3382_v35, %s5444_s27  ;;  %v3416_v35 = vld [vmem:[#allocation3 + $0x42] sm:$0xff]  ;;  %v3384_v33 = vld [vmem:[#allocation3 + $0x31] sm:$0xff] }
 0x465   : > { %3646 = vrot.lane.b32.xlu0 %v3406_v36, %s5453_s22  ;;  %v3289_v36 = vmul.f32 0.125, %v7029_v6  ;;  %v3773_v6 = vld [vmem:[%s7429_s7 + $0x18] sm:$0xff]  ;;  %v7122_v30 = vld [vmem:[#allocation3 + $0x30] sm:$0xff] }
 0x466   : > { %4613 = vmatprep.subr.mxu0 %v3773_v6 }
 0x467   : > { %v3314_v61 = vsel %vm3309_vm14, %v3281_v16, %v3289_v36  ;;  %4614 = vmatpush3.msra.mxu0 %v3773_v6  ;;  %v3299_v36 = vmul.f32 0.125, %v3248_v59  ;;  %v3770_v6 = vld [vmem:[%s7429_s7] sm:$0xff] }
 0x468   : > { %3524 = vrot.lane.b32.xlu1 %v7081_v24, %s5454_s16  ;;  %v3269_v19 = vpop.xlane.xlu1 %3268  ;;  %v3323_v50 = vsel %vm3318_vm15, %v3314_v61, %v3297_v1  ;;  %4615 = vmatprep.subr.mxu0 %v3772_v12 }
 0x469   : > { %3678 = vrot.lane.b32.xlu0 %v3414_v39, %s5446_s15  ;;  %v3306_v2 = vmul.f32 0.125, %v3269_v19  ;;  %v3291_v19 = vmul.f32 0.125, %v7037_v20  ;;  %v3392_v20 = vld [vmem:[#allocation3 + $0x32] sm:$0xff]  ;;  %4616 = vmatpush3.msra.mxu0 %v3772_v12 }
 0x46b   : > { %v3333_v14 = vsel %vm3327_vm0, %v3324_v56, %v3306_v2  ;;  %v3283_v2 = vmul.f32 0.125, %v7041_v37 }
 0x46c   : > { %3370 = vst.msk [vmem:[#allocation3 + $0x61] sm:$0xff] %vm3336_vm12, %v3333_v14  ;;  %3462 = vrot.lane.b32.xlu1 %v3385_v34, %s5451_s20  ;;  %v3266_v39 = vpop.xlane.xlu1 %3265 }
 0x46d   : > { %3488 = vrot.lane.b32.xlu0 %v3390_v47, %s5450_s19  ;;  %v3305_v43 = vmul.f32 0.125, %v3266_v39  ;;  %v3316_v16 = vsel %vm3309_vm14, %v3283_v2, %v3291_v19  ;;  %v3771_v39 = vld [vmem:[%s7429_s7 + $0x8] sm:$0xff] }
 0x46e   : > { %v3325_v37 = vsel %vm3318_vm15, %v3316_v16, %v3299_v36  ;;  %4617 = vmatprep.subr.mxu0 %v3771_v39 }
 0x46f   : > { %v3332_v7 = vsel %vm3327_vm0, %v3323_v50, %v3305_v43  ;;  %4618 = vmatpush3.msra.mxu0 %v3771_v39 }
 0x470   : > { %3369 = vst.msk [vmem:[#allocation3 + $0x51] sm:$0xff] %vm3336_vm12, %v3332_v7  ;;  %3588 = vrot.lane.b32.xlu1 %v3416_v35, %s5455_s25  ;;  %4619 = vmatprep.subr.mxu0 %v3770_v6 }
 0x471   : > { %3582 = vrot.lane.b32.xlu0 %v3390_v47, %s5455_s25  ;;  %4620 = vmatpush3.msra.mxu0 %v3770_v6 }
 0x473   : > { %v3275_v60 = vpop.xlane.xlu1 %3274  ;;  %v7138_v61 = vld [vmem:[#allocation3 + $0x60] sm:$0xff] }
 0x474   : > { %v3308_v17 = vmul.f32 0.125, %v3275_v60  ;;  %3460 = vrot.lane.b32.xlu1 %v3384_v33, %s5451_s20  ;;  %v3418_v43 = vld [vmem:[#allocation3 + $0x62] sm:$0xff] }
 0x475   : > { %3556 = vrot.lane.b32.xlu0 %v3385_v34, %s5444_s27 }
 0x476   : > { %v3335_v56 = vsel %vm3327_vm0, %v3326_v53, %v3308_v17 }
 0x477   : > { %3372 = vst.msk [vmem:[#allocation3 + $0x81] sm:$0xff] %vm3336_vm12, %v3335_v56  ;;  %v3272_v1 = vpop.xlane.xlu1 %3271  ;;  %v3386_v50 = vld [vmem:[#allocation3 + $0x51] sm:$0xff] }
 0x478   : > { %v3307_v14 = vmul.f32 0.125, %v3272_v1  ;;  %3492 = vrot.lane.b32.xlu1 %v3392_v20, %s5450_s19  ;;  %v3394_v7 = vld [vmem:[#allocation3 + $0x52] sm:$0xff] }
 0x479   : > { %3494 = vrot.lane.b32.xlu0 %v3416_v35, %s5450_s19 }
 0x47a   : > { %v3334_v47 = vsel %vm3327_vm0, %v3325_v37, %v3307_v14  ;;  %v3373_v14 = vld [vmem:[#allocation3] sm:$0xff] }
 0x47b   : > { %3371 = vst.msk [vmem:[#allocation3 + $0x71] sm:$0xff] %vm3336_vm12, %v3334_v47  ;;  %v3702_v39 = vsel %vm3336_vm12, %v3373_v14, %v7019_v55 }
 0x47c   : > { %3616 = vrot.lane.b32.xlu1 %v7122_v30, %s5452_s21 }
 0x47d   : > { %3618 = vrot.lane.b32.xlu0 %v7081_v24, %s5452_s21 }
 0x47e   : > { %v3404_v42 = vld [vmem:[#allocation3 + $0x80] sm:$0xff] }
 0x47f   : > { %v3412_v28 = vld [vmem:[#allocation3 + $0x81] sm:$0xff] }
 0x480   : > { %3648 = vrot.lane.b32.xlu1 %v3384_v33, %s5453_s22  ;;  %v3420_v11 = vld [vmem:[#allocation3 + $0x82] sm:$0xff] }
 0x481   : > { %3650 = vrot.lane.b32.xlu0 %v3385_v34, %s5453_s22  ;;  %v3387_v34 = vld [vmem:[#allocation3 + $0x61] sm:$0xff] }
 0x482   : > { %v7171_v59 = vld [vmem:[#allocation3 + $0x70] sm:$0xff] }
 0x483   : > { %v3388_v60 = vld [vmem:[#allocation3 + $0x71] sm:$0xff] }
 0x484   : > { %3586 = vrot.lane.b32.xlu1 %v3392_v20, %s5455_s25 }
 0x485   : > { %3682 = vrot.lane.b32.xlu0 %v3416_v35, %s5446_s15  ;;  %v7152_v35 = vld [vmem:[#allocation3 + $0x50] sm:$0xff] }
 0x488   : > { %3528 = vrot.lane.b32.xlu1 %v7138_v61, %s5454_s16 }
 0x489   : > { %3522 = vrot.lane.b32.xlu0 %v7122_v30, %s5454_s16 }
 0x48c   : > { %3466 = vrot.lane.b32.xlu1 %v3387_v34, %s5451_s20 }
 0x48d   : > { %3554 = vrot.lane.b32.xlu0 %v3384_v33, %s5444_s27  ;;  %v3396_v33 = vld [vmem:[#allocation3 + $0x72] sm:$0xff] }
 0x490   : > { %3592 = vrot.lane.b32.xlu1 %v3418_v43, %s5455_s25 }
 0x491   : > { %3680 = vrot.lane.b32.xlu0 %v3392_v20, %s5446_s15 }
 0x494   : > { %3464 = vrot.lane.b32.xlu1 %v3386_v50, %s5451_s20 }
 0x495   : > { %3560 = vrot.lane.b32.xlu0 %v3387_v34, %s5444_s27 }
 0x498   : > { %3496 = vrot.lane.b32.xlu1 %v3394_v7, %s5450_s19 }
 0x499   : > { %3498 = vrot.lane.b32.xlu0 %v3418_v43, %s5450_s19 }
 0x49c   : > { %3620 = vrot.lane.b32.xlu1 %v7152_v35, %s5452_s21 }
 0x49d   : > { %3622 = vrot.lane.b32.xlu0 %v7138_v61, %s5452_s21 }
 0x4a0   : > { %3652 = vrot.lane.b32.xlu1 %v3386_v50, %s5453_s22 }
 0x4a1   : > { %3654 = vrot.lane.b32.xlu0 %v3387_v34, %s5453_s22 }
 0x4a4   : > { %3590 = vrot.lane.b32.xlu1 %v3394_v7, %s5455_s25 }
 0x4a5   : > { %3686 = vrot.lane.b32.xlu0 %v3418_v43, %s5446_s15  ;;  %v3710_v43 = vsel %vm410_vm1, %v3702_v39, %v7023_v21 }
 0x4a8   : > { %3532 = vrot.lane.b32.xlu1 %v3404_v42, %s5454_s16 }
 0x4a9   : > { %3526 = vrot.lane.b32.xlu0 %v7152_v35, %s5454_s16 }
 0x4ac   : > { %3564 = vrot.lane.b32.xlu1 %v3412_v28, %s5444_s27 }
 0x4ad   : > { %3558 = vrot.lane.b32.xlu0 %v3386_v50, %s5444_s27 }
 0x4b0   : > { %3626 = vrot.lane.b32.xlu1 %v3404_v42, %s5452_s21 }
 0x4b1   : > { %3684 = vrot.lane.b32.xlu0 %v3394_v7, %s5446_s15 }
 0x4b4   : > { %3658 = vrot.lane.b32.xlu1 %v3412_v28, %s5453_s22 }
 0x4b5   : > { %3596 = vrot.lane.b32.xlu0 %v3420_v11, %s5455_s25 }
 0x4b8   : > { %3468 = vrot.lane.b32.xlu1 %v3388_v60, %s5451_s20  ;;  %s5458_s20 = smov 126  }
 0x4b9   : > { %3530 = vrot.lane.b32.xlu0 %v7171_v59, %s5454_s16 }
 0x4bc   : > { %3500 = vrot.lane.b32.xlu1 %v3396_v33, %s5450_s19  ;;  %s5457_s19 = smov 127  }
 0x4bd   : > { %3562 = vrot.lane.b32.xlu0 %v3388_v60, %s5444_s27 }
 0x4c0   : > { %3624 = vrot.lane.b32.xlu1 %v7171_v59, %s5452_s21  ;;  %s5459_s21 = smov 125  }
 0x4c1   : > { %3594 = vrot.lane.b32.xlu0 %v3396_v33, %s5455_s25  ;;  %s7321_s25 = scalar_lea.vmem %s7431_s9, %s4427_s13 }
 0x4c4   : > { %3656 = vrot.lane.b32.xlu1 %v3388_v60, %s5453_s22 }
 0x4c5   : > { %3692 = vrot.lane.b32.xlu0 %v3445_v25, %s5446_s15 }
 0x4c6   : > { %v3553_v17 = vpop.permute.xlu1 %3552 }
 0x4c7   : > { %v3521_v19 = vpop.permute.xlu0 %3520 }
 0x4c8   : > { %3688 = vrot.lane.b32.xlu1 %v3396_v33, %s5446_s15 }
 0x4ca   : > { %v3585_v36 = vpop.permute.xlu1 %3584 }
 0x4cb   : > { %v3459_v53 = vpop.permute.xlu0 %3458 }
 0x4cc   : > { %3690 = vrot.lane.b32.xlu1 %v3420_v11, %s5446_s15 }
 0x4ce   : > { %v3457_v56 = vpop.permute.xlu1 %3456 }
 0x4cf   : > { %v3491_v2 = vpop.permute.xlu0 %3490 }
 0x4d2   : > { %v3519_v1 = vpop.permute.xlu1 %3518 }
 0x4d3   : > { %v3615_v12 = vpop.permute.xlu0 %3614  ;;  %v3719_v50 = vsel %vm3718_vm4, %v3710_v43, %v3519_v1 }
 0x4d6   : > { %v3551_v16 = vpop.permute.xlu1 %3550 }
 0x4d7   : > { %v3647_v20 = vpop.permute.xlu0 %3646  ;;  %v3727_v7 = vsel %vm732_vm2, %v3719_v50, %v3551_v16 }
 0x4da   : > { %v7185_v47 = vpop.permute.xlu1 %3524 }
 0x4db   : > { %v3679_v37 = vpop.permute.xlu0 %3678 }
 0x4de   : > { %v7189_v34 = vpop.permute.xlu1 %3462 }
 0x4df   : > { %v3489_v6 = vpop.permute.xlu0 %3488 }
 0x4e2   : > { %v7195_v28 = vpop.permute.xlu1 %3588 }
 0x4e3   : > { %v3583_v42 = vpop.permute.xlu0 %3582 }
 0x4e4   : > { %v3736_v11 = vsel %vm3735_vm6, %v3727_v7, %v3583_v42  ;;  %v3703_v7 = vsel %vm3336_vm12, %v7068_v48, %v3457_v56 }
 0x4e5   : > { %v3745_v55 = vsel %vm3744_vm7, %v3736_v11, %v3615_v12  ;;  %v3711_v11 = vsel %vm410_vm1, %v3703_v7, %v3489_v6 }
 0x4e6   : > { %v3754_v60 = vsel %vm3753_vm8, %v3745_v55, %v3647_v20  ;;  %v3461_v25 = vpop.permute.xlu1 %3460  ;;  %v3720_v20 = vsel %vm3718_vm4, %v3711_v11, %v3521_v19 }
 0x4e7   : > { %v3557_v33 = vpop.permute.xlu0 %3556  ;;  %v3762_v21 = vsel %vm2082_vm5, %v3754_v60, %v3679_v37  ;;  %v3704_v37 = vsel %vm3336_vm12, %v7051_v27, %v3459_v53 }
 0x4e8   : > { %4621 = vmatprep.mubr.msk.f32.mxu0 %vm3782_vm9, %v3762_v21  ;;  %v3712_v60 = vsel %vm410_vm1, %v3704_v37, %v3491_v2  ;;  %v3728_v21 = vsel %vm732_vm2, %v3720_v20, %v3553_v17 }
 0x4e9   : > { %v3737_v6 = vsel %vm3735_vm6, %v3728_v21, %v3585_v36 }
 0x4ea   : > { %v3493_v14 = vpop.permute.xlu1 %3492 }
 0x4eb   : > { %v3495_v1 = vpop.permute.xlu0 %3494 }
 0x4ee   : > { %v3617_v39 = vpop.permute.xlu1 %3616 }
 0x4ef   : > { %v3619_v16 = vpop.permute.xlu0 %3618  ;;  %v3746_v7 = vsel %vm3744_vm7, %v3737_v6, %v3617_v39 }
 0x4f2   : > { %v3649_v50 = vpop.permute.xlu1 %3648 }
 0x4f3   : > { %v3651_v43 = vpop.permute.xlu0 %3650  ;;  %v3755_v27 = vsel %vm3753_vm8, %v3746_v7, %v3649_v50  ;;  %v3706_v7 = vsel %vm3336_vm12, %v7081_v24, %v7189_v34 }
 0x4f6   : > { %v3587_v12 = vpop.permute.xlu1 %3586 }
 0x4f7   : > { %v3683_v42 = vpop.permute.xlu0 %3682 }
 0x4fa   : > { %v7206_v4 = vpop.permute.xlu1 %3528 }
 0x4fb   : > { %v3523_v55 = vpop.permute.xlu0 %3522 }
 0x4fc   : > { %v3721_v15 = vsel %vm3718_vm4, %v3712_v60, %v3523_v55  ;;  %v3705_v60 = vsel %vm3336_vm12, %v7122_v30, %v3461_v25 }
 0x4fe   : > { %v3467_v48 = vpop.permute.xlu1 %3466 }
 0x4ff   : > { %v3555_v51 = vpop.permute.xlu0 %3554 }
 0x500   : > { %v3729_v56 = vsel %vm732_vm2, %v3721_v15, %v3555_v51 }
 0x501   : > { %v3738_v19 = vsel %vm3735_vm6, %v3729_v56, %v3587_v12  ;;  %v3713_v56 = vsel %vm410_vm1, %v3705_v60, %v3493_v14 }
 0x502   : > { %v3747_v11 = vsel %vm3744_vm7, %v3738_v19, %v3619_v16  ;;  %v7219_v2 = vpop.permute.xlu1 %3592 }
 0x503   : > { %v3681_v53 = vpop.permute.xlu0 %3680  ;;  %v3756_v17 = vsel %vm3753_vm8, %v3747_v11, %v3651_v43  ;;  %v3714_v11 = vsel %vm410_vm1, %v3706_v7, %v3495_v1 }
 0x504   : > { %v3763_v20 = vsel %vm2082_vm5, %v3755_v27, %v3681_v53  ;;  %v3764_v55 = vsel %vm2082_vm5, %v3756_v17, %v3683_v42  ;;  %v3722_v42 = vsel %vm3718_vm4, %v3713_v56, %v7185_v47 }
 0x505   : > { %4622 = vmatmul.mubr.msk.f32.vlgmr.msra.gmra.mxu0 %vm3782_vm9, %v3763_v20  ;;  %v3730_v27 = vsel %vm732_vm2, %v3722_v42, %v3557_v33 }
 0x506   : > { %4624 = vmatprep.mubr.msk.f32.mxu0 %vm3782_vm9, %v3764_v55  ;;  %v3465_v51 = vpop.permute.xlu1 %3464  ;;  %v3739_v14 = vsel %vm3735_vm6, %v3730_v27, %v7195_v28 }
 0x507   : > { %v3561_v15 = vpop.permute.xlu0 %3560 }
 0x50a   : > { %v3497_v39 = vpop.permute.xlu1 %3496 }
 0x50b   : > { %v3499_v36 = vpop.permute.xlu0 %3498 }
 0x50e   : > { %v3621_v12 = vpop.permute.xlu1 %3620 }
 0x50f   : > { %v3623_v16 = vpop.permute.xlu0 %3622  ;;  %v3748_v20 = vsel %vm3744_vm7, %v3739_v14, %v3621_v12 }
 0x512   : > { %v3653_v37 = vpop.permute.xlu1 %3652 }
 0x513   : > { %v3655_v50 = vpop.permute.xlu0 %3654  ;;  %v3757_v24 = vsel %vm3753_vm8, %v3748_v20, %v3653_v37 }
 0x516   : > { %v3591_v21 = vpop.permute.xlu1 %3590 }
 0x517   : > { %v3687_v43 = vpop.permute.xlu0 %3686 }
 0x51a   : > { %v3533_v19 = vpop.permute.xlu1 %3532 }
 0x51b   : > { %v3527_v6 = vpop.permute.xlu0 %3526 }
 0x51c   : > { %v3723_v53 = vsel %vm3718_vm4, %v3714_v11, %v3527_v6 }
 0x51e   : > { %v3565_v25 = vpop.permute.xlu1 %3564 }
 0x51f   : > { %v3559_v30 = vpop.permute.xlu0 %3558 }
 0x520   : > { %v3731_v17 = vsel %vm732_vm2, %v3723_v53, %v3559_v30  ;;  %v3708_v30 = vsel %vm3336_vm12, %v7138_v61, %v3467_v48 }
 0x521   : > { %v3740_v47 = vsel %vm3735_vm6, %v3731_v17, %v3591_v21 }
 0x522   : > { %v3749_v55 = vsel %vm3744_vm7, %v3740_v47, %v3623_v16  ;;  %v3627_v1 = vpop.permute.xlu1 %3626  ;;  %v3707_v16 = vsel %vm3336_vm12, %v7152_v35, %v3465_v51  ;;  %v3716_v35 = vsel %vm410_vm1, %v3708_v30, %v3499_v36 }
 0x523   : > { %v3685_v34 = vpop.permute.xlu0 %3684  ;;  %v3758_v33 = vsel %vm3753_vm8, %v3749_v55, %v3655_v50  ;;  %v3715_v6 = vsel %vm410_vm1, %v3707_v16, %v3497_v39 }
 0x524   : > { %v3765_v60 = vsel %vm2082_vm5, %v3757_v24, %v3685_v34  ;;  %v3766_v56 = vsel %vm2082_vm5, %v3758_v33, %v3687_v43  ;;  %v3724_v11 = vsel %vm3718_vm4, %v3715_v6, %v7206_v4 }
 0x525   : > { %4625 = vmatmul.mubr.msk.f32.gmra.mxu0 %vm3782_vm9, %v3765_v60  ;;  %v3732_v39 = vsel %vm732_vm2, %v3724_v11, %v3561_v15 }
 0x526   : > { %4627 = vmatprep.mubr.msk.f32.mxu0 %vm3782_vm9, %v3766_v56  ;;  %v3659_v21 = vpop.permute.xlu1 %3658 }
 0x527   : > { %v3597_v28 = vpop.permute.xlu0 %3596 }
 0x52a   : > { %v3469_v12 = vpop.permute.xlu1 %3468 }
 0x52b   : > { %v3531_v42 = vpop.permute.xlu0 %3530  ;;  %v3709_v50 = vsel %vm3336_vm12, %v7171_v59, %v3469_v12 }
 0x52c   : > { %v3725_v17 = vsel %vm3718_vm4, %v3716_v35, %v3531_v42 }
 0x52e   : > { %v3501_v37 = vpop.permute.xlu1 %3500 }
 0x52f   : > { %v3563_v7 = vpop.permute.xlu0 %3562  ;;  %v3717_v43 = vsel %vm410_vm1, %v3709_v50, %v3501_v37 }
 0x530   : > { %v3726_v53 = vsel %vm3718_vm4, %v3717_v43, %v3533_v19  ;;  %v3733_v47 = vsel %vm732_vm2, %v3725_v17, %v3563_v7  ;;  %v3741_v19 = vsel %vm3735_vm6, %v3732_v39, %v7219_v2 }
 0x531   : > { %v3734_v59 = vsel %vm732_vm2, %v3726_v53, %v3565_v25 }
 0x532   : > { %v3625_v27 = vpop.permute.xlu1 %3624  ;;  %v3743_v61 = vsel %vm3735_vm6, %v3734_v59, %v3597_v28 }
 0x533   : > { %v3595_v51 = vpop.permute.xlu0 %3594  ;;  %v3750_v20 = vsel %vm3744_vm7, %v3741_v19, %v3625_v27  ;;  %v3752_v25 = vsel %vm3744_vm7, %v3743_v61, %v7021_v32  ;;  %v4407_v32 = vld [vmem:[%s7430_s8] ss:$0 sm:$0xff] }
 0x534   : > { %v3742_v4 = vsel %vm3735_vm6, %v3733_v47, %v3595_v51  ;;  %v3761_v33 = vsel %vm3753_vm8, %v3752_v25, %v7025_v52 }
 0x535   : > { %v3751_v15 = vsel %vm3744_vm7, %v3742_v4, %v3627_v1  ;;  %v5456_v1 = vmov 0  }
 0x536   : > { %v3657_v14 = vpop.permute.xlu1 %3656  ;;  %v3760_v34 = vsel %vm3753_vm8, %v3751_v15, %v3659_v21  ;;  %5240 = vset.pattern.permute.xlu1 %v5456_v1  ;;  %5241 = vset.pattern.permute.xlu0 %v5456_v1 }
 0x537   : > { %v3759_v48 = vsel %vm3753_vm8, %v3750_v20, %v3657_v14  ;;  %v3693_v24 = vpop.permute.xlu0 %3692 }
 0x538   : > { %v3769_v56 = vsel %vm2082_vm5, %v3761_v33, %v3693_v24 }
 0x53a   : > { %v3689_v36 = vpop.permute.xlu1 %3688 }
 0x53b   : > { %v3767_v55 = vsel %vm2082_vm5, %v3759_v48, %v3689_v36 }
 0x53c   : > { %4628 = vmatmul.mubr.msk.f32.gmra.mxu0 %vm3782_vm9, %v3767_v55 }
 0x53e   : > { %v3691_v2 = vpop.permute.xlu1 %3690 }
 0x53f   : > { %v3768_v60 = vsel %vm2082_vm5, %v3760_v34, %v3691_v2 }
 0x540   : > { %4630 = vmatprep.mubr.msk.f32.mxu0 %vm3782_vm9, %v3768_v60 }
 0x541   : > { %4631 = vmatmul.mubr.msk.f32.gmra.mxu0 %vm3782_vm9, %v3769_v56 }
 0x5c5   : > { %v4623_v28 = vpop.f32.mrf.mxu0 }
 0x5c6   : > { %v3883_v21 = vadd.f32 %v4623_v28, %v4407_v32 }
 0x5c7   : > { %v3877_v42 = vpop.f32.mrf.mxu0 }
 0x5c8   : > { %v4418_v12 = vmul.f32 -1.442695, %v3883_v21  ;;  %v3878_v52 = vadd.f32 %v4407_v32, %v3877_v42 }
 0x5ca   : > { %5370 = vpow2.f32 %v4418_v12  ;;  %v4417_v16 = vmul.f32 -1.442695, %v3878_v52 }
 0x5cc   : > { %5372 = vpow2.f32 %v4417_v16 }
 0x5d7   : > { %v5371_v37 = vpop.eup %5370 }
 0x5d8   : > { %v3941_v6 = vadd.f32 1.0, %v5371_v37 }
 0x5d9   : > { %v5373_v50 = vpop.eup %5372 }
 0x5da   : > { %5374 = vrcp.f32 %v3941_v6  ;;  %v3940_v7 = vadd.f32 1.0, %v5373_v50 }
 0x5dc   : > { %5376 = vrcp.f32 %v3940_v7 }
 0x5e5   : > { %v4626_v43 = vpop.f32.mrf.mxu0 }
 0x5e6   : > { %v3893_v11 = vadd.f32 %v4626_v43, %v4407_v32 }
 0x5e7   : > { %v7286_v27 = vpop.eup %5374  ;;  %v3887_v53 = vpop.f32.mrf.mxu0 }
 0x5e8   : > { %v4420_v30 = vmul.f32 -1.442695, %v3893_v11  ;;  %v3888_v35 = vadd.f32 %v4407_v32, %v3887_v53  ;;  %3974 = vrot.lane.b32.xlu0 %v7286_v27, %s5457_s19 }
 0x5e9   : > { %v5377_v51 = vpop.eup %5376 }
 0x5ea   : > { %5378 = vpow2.f32 %v4420_v30  ;;  %v4419_v39 = vmul.f32 -1.442695, %v3888_v35  ;;  %3972 = vrot.lane.b32.xlu1 %v5377_v51, %s5457_s19 }
 0x5ec   : > { %5380 = vpow2.f32 %v4419_v39  ;;  %3990 = vrot.lane.b32.xlu0 %v7286_v27, %s5458_s20 }
 0x5ee   : > { %3988 = vrot.lane.b32.xlu1 %v5377_v51, %s5458_s20 }
 0x5f0   : > { %4006 = vrot.lane.b32.xlu0 %v7286_v27, %s5459_s21 }
 0x5f2   : > { %4004 = vrot.lane.b32.xlu1 %v5377_v51, %s5459_s21 }
 0x5f6   : > { %4021 = vperm.xlu1 %5240, %v5377_v51  }
 0x5f7   : > { %v5379_v17 = vpop.eup %5378 }
 0x5f8   : > { %v3943_v59 = vadd.f32 1.0, %v5379_v17 }
 0x5f9   : > { %v5381_v14 = vpop.eup %5380 }
 0x5fa   : > { %5382 = vrcp.f32 %v3943_v59  ;;  %v3942_v47 = vadd.f32 1.0, %v5381_v14 }
 0x5fc   : > { %5384 = vrcp.f32 %v3942_v47  ;;  %v4629_v4 = vpop.f32.mrf.mxu0 }
 0x5fd   : > { %v3903_v19 = vadd.f32 %v4629_v4, %v4407_v32 }
 0x5fe   : > { %v3897_v20 = vpop.f32.mrf.mxu0 }
 0x5ff   : > { %v4422_v61 = vmul.f32 -1.442695, %v3903_v19  ;;  %v3898_v48 = vadd.f32 %v4407_v32, %v3897_v20 }
 0x601   : > { %5386 = vpow2.f32 %v4422_v61  ;;  %v4421_v36 = vmul.f32 -1.442695, %v3898_v48  ;;  %v4632_v15 = vpop.f32.mrf.mxu0 }
 0x602   : > { %v3913_v55 = vadd.f32 %v4632_v15, %v4407_v32 }
 0x603   : > { %5388 = vpow2.f32 %v4421_v36  ;;  %v3907_v25 = vpop.f32.mrf.mxu0 }
 0x604   : > { %v4424_v24 = vmul.f32 -1.442695, %v3913_v55  ;;  %v3908_v2 = vadd.f32 %v4407_v32, %v3907_v25 }
 0x606   : > { %5390 = vpow2.f32 %v4424_v24  ;;  %v4423_v60 = vmul.f32 -1.442695, %v3908_v2 }
 0x607   : > { %v5383_v34 = vpop.eup %5382 }
 0x608   : > { %3978 = vrot.lane.b32.xlu0 %v5383_v34, %s5457_s19  ;;  %5392 = vpow2.f32 %v4423_v60 }
 0x609   : > { %v5385_v33 = vpop.eup %5384 }
 0x60a   : > { %3976 = vrot.lane.b32.xlu1 %v5385_v33, %s5457_s19 }
 0x60c   : > { %3994 = vrot.lane.b32.xlu0 %v5383_v34, %s5458_s20 }
 0x60e   : > { %3992 = vrot.lane.b32.xlu1 %v5385_v33, %s5458_s20  ;;  %v5387_v56 = vpop.eup %5386 }
 0x60f   : > { %v3945_v1 = vadd.f32 1.0, %v5387_v56 }
 0x610   : > { %4010 = vrot.lane.b32.xlu0 %v5383_v34, %s5459_s21  ;;  %v5389_v28 = vpop.eup %5388 }
 0x611   : > { %5394 = vrcp.f32 %v3945_v1  ;;  %v3944_v21 = vadd.f32 1.0, %v5389_v28 }
 0x612   : > { %4008 = vrot.lane.b32.xlu1 %v5385_v33, %s5459_s21 }
 0x613   : > { %5396 = vrcp.f32 %v3944_v21  ;;  %v5391_v32 = vpop.eup %5390 }
 0x614   : > { %v3947_v42 = vadd.f32 1.0, %v5391_v32 }
 0x615   : > { %v5393_v12 = vpop.eup %5392 }
 0x616   : > { %5398 = vrcp.f32 %v3947_v42  ;;  %v3946_v16 = vadd.f32 1.0, %v5393_v12 }
 0x618   : > { %5400 = vrcp.f32 %v3946_v16 }
 0x61e   : > { %v5395_v52 = vpop.eup %5394 }
 0x61f   : > { %3982 = vrot.lane.b32.xlu0 %v5395_v52, %s5457_s19 }
 0x620   : > { %v5397_v37 = vpop.eup %5396 }
 0x621   : > { %3980 = vrot.lane.b32.xlu1 %v5397_v37, %s5457_s19 }
 0x623   : > { %3998 = vrot.lane.b32.xlu0 %v5395_v52, %s5458_s20  ;;  %v5399_v6 = vpop.eup %5398 }
 0x625   : > { %3996 = vrot.lane.b32.xlu1 %v5397_v37, %s5458_s20  ;;  %v5401_v50 = vpop.eup %5400 }
 0x627   : > { %4014 = vrot.lane.b32.xlu0 %v5395_v52, %s5459_s21 }
 0x629   : > { %4012 = vrot.lane.b32.xlu1 %v5397_v37, %s5459_s21 }
 0x62b   : > { %3986 = vrot.lane.b32.xlu0 %v5399_v6, %s5457_s19 }
 0x62d   : > { %4029 = vperm.xlu1 %5240, %v5385_v33  }
 0x62f   : > { %4002 = vrot.lane.b32.xlu0 %v5399_v6, %s5458_s20 }
 0x631   : > { %3984 = vrot.lane.b32.xlu1 %v5401_v50, %s5457_s19 }
 0x633   : > { %4018 = vrot.lane.b32.xlu0 %v5399_v6, %s5459_s21 }
 0x635   : > { %4000 = vrot.lane.b32.xlu1 %v5401_v50, %s5458_s20 }
 0x637   : > { %4025 = vperm.xlu0 %5241, %v7286_v27  }
 0x639   : > { %4016 = vrot.lane.b32.xlu1 %v5401_v50, %s5459_s21 }
 0x63b   : > { %4037 = vperm.xlu0 %5241, %v5397_v37  }
 0x63d   : > { %4033 = vperm.xlu1 %5240, %v5383_v34  }
 0x63f   : > { %4045 = vperm.xlu0 %5241, %v5401_v50  }
 0x641   : > { %4041 = vperm.xlu1 %5240, %v5395_v52  }
 0x645   : > { %4049 = vperm.xlu1 %5240, %v5399_v6  }
 0x65a   : > { %v3975_v7 = vpop.permute.xlu0 %3974 }
 0x65b   : > { %4057 = vperm.xlu1 %5240, %v3975_v7  }
 0x65c   : > { %v3973_v43 = vpop.permute.xlu1 %3972 }
 0x65d   : > { %4053 = vperm.xlu0 %5241, %v3973_v43  }
 0x65e   : > { %v3991_v11 = vpop.permute.xlu0 %3990 }
 0x65f   : > { %4089 = vperm.xlu1 %5240, %v3991_v11  }
 0x660   : > { %v3989_v53 = vpop.permute.xlu1 %3988 }
 0x661   : > { %4085 = vperm.xlu0 %5241, %v3989_v53  }
 0x662   : > { %v4007_v30 = vpop.permute.xlu0 %4006 }
 0x663   : > { %4121 = vperm.xlu1 %5240, %v4007_v30  }
 0x664   : > { %v4005_v35 = vpop.permute.xlu1 %4004 }
 0x665   : > { %4117 = vperm.xlu0 %5241, %v4005_v35  }
 0x671   : > { %v4022_v27 = vpop.permute.xlu1 %4021 }
 0x672   : > { %v4148_v51 = vmul.f32 %v4022_v27, %v6850_v18 }
 0x674   : > { %4180 = vst.msk [vmem:[%s7321_s25] sm:$0xff] %vm410_vm1, %v4148_v51 }
 0x67a   : > { %v3979_v39 = vpop.permute.xlu0 %3978 }
 0x67b   : > { %4065 = vperm.xlu1 %5240, %v3979_v39  }
 0x67c   : > { %v3977_v17 = vpop.permute.xlu1 %3976 }
 0x67d   : > { %4061 = vperm.xlu0 %5241, %v3977_v17  }
 0x67e   : > { %v3995_v59 = vpop.permute.xlu0 %3994 }
 0x67f   : > { %4097 = vperm.xlu1 %5240, %v3995_v59  }
 0x680   : > { %v3993_v14 = vpop.permute.xlu1 %3992 }
 0x681   : > { %4093 = vperm.xlu0 %5241, %v3993_v14  }
 0x682   : > { %v4011_v47 = vpop.permute.xlu0 %4010 }
 0x683   : > { %4129 = vperm.xlu1 %5240, %v4011_v47  }
 0x684   : > { %v4009_v4 = vpop.permute.xlu1 %4008 }
 0x685   : > { %4125 = vperm.xlu0 %5241, %v4009_v4  }
 0x691   : > { %v3983_v19 = vpop.permute.xlu0 %3982 }
 0x692   : > { %4073 = vperm.xlu1 %5240, %v3983_v19   ;;  %v7446_v19 = vld [vmem:[#allocation8_spill] sm:$0xff] }
 0x693   : > { %v3981_v20 = vpop.permute.xlu1 %3980 }
 0x694   : > { %4069 = vperm.xlu0 %5241, %v3981_v20  }
 0x695   : > { %v3999_v61 = vpop.permute.xlu0 %3998 }
 0x696   : > { %4105 = vperm.xlu1 %5240, %v3999_v61   ;;  %v7447_v61 = vld [vmem:[#allocation4_spill] sm:$0xff] }
 0x697   : > { %v3997_v18 = vpop.permute.xlu1 %3996 }
 0x698   : > { %4101 = vperm.xlu0 %5241, %v3997_v18  }
 0x699   : > { %v4015_v48 = vpop.permute.xlu0 %4014 }
 0x69a   : > { %4137 = vperm.xlu1 %5240, %v4015_v48   ;;  %v7448_v48 = vld [vmem:[#allocation6_spill] sm:$0xff] }
 0x69b   : > { %v4013_v36 = vpop.permute.xlu1 %4012 }
 0x69c   : > { %4133 = vperm.xlu0 %5241, %v4013_v36  }
 0x69d   : > { %v3987_v15 = vpop.permute.xlu0 %3986 }
 0x69e   : > { %4081 = vperm.xlu1 %5240, %v3987_v15   ;;  %v7449_v15 = vld [vmem:[#allocation9_spill] sm:$0xff] }
 0x6a1   : > { %v4003_v55 = vpop.permute.xlu0 %4002 }
 0x6a2   : > { %4113 = vperm.xlu1 %5240, %v4003_v55  }
 0x6a5   : > { %v4019_v25 = vpop.permute.xlu0 %4018 }
 0x6a6   : > { %4145 = vperm.xlu1 %5240, %v4019_v25  }
 0x6a8   : > { %v4030_v24 = vpop.permute.xlu1 %4029 }
 0x6a9   : > { %v4150_v34 = vmul.f32 %v4030_v24, %v6862_v13  ;;  %v7450_v24 = vld [vmem:[#allocation5_spill] sm:$0xff] }
 0x6ab   : > { %4182 = vst.msk [vmem:[%s7321_s25 + $0x10] sm:$0xff] %vm410_vm1, %v4150_v34 }
 0x6ac   : > { %v3985_v2 = vpop.permute.xlu1 %3984 }
 0x6ad   : > { %4077 = vperm.xlu0 %5241, %v3985_v2  }
 0x6b0   : > { %v4001_v33 = vpop.permute.xlu1 %4000 }
 0x6b1   : > { %4109 = vperm.xlu0 %5241, %v4001_v33   ;;  %v7451_v33 = vld [vmem:[#allocation7_spill] sm:$0xff] }
 0x6b2   : > { %v4026_v60 = vpop.permute.xlu0 %4025 }
 0x6b3   : > { %v4149_v56 = vmul.f32 %v4026_v60, %v6844_v54 }
 0x6b4   : > { %v4017_v1 = vpop.permute.xlu1 %4016 }
 0x6b5   : > { %4181 = vst.msk [vmem:[%s7321_s25 + $0x8] sm:$0xff] %vm410_vm1, %v4149_v56  ;;  %4141 = vperm.xlu0 %5241, %v4017_v1   ;;  %v7452_v1 = vld [vmem:[#allocation10_spill] sm:$0xff] }
 0x6b6   : > { %v4038_v28 = vpop.permute.xlu0 %4037 }
 0x6b7   : > { %v4152_v13 = vmul.f32 %v4038_v28, %v6877_v10 }
 0x6b8   : > { %v4034_v21 = vpop.permute.xlu1 %4033 }
 0x6b9   : > { %4184 = vst.msk [vmem:[%s7321_s25 + $0x20] sm:$0xff] %vm410_vm1, %v4152_v13  ;;  %v4151_v32 = vmul.f32 %v4034_v21, %v6856_v58 }
 0x6ba   : > { %v4046_v42 = vpop.permute.xlu0 %4045 }
 0x6bb   : > { %4183 = vst.msk [vmem:[%s7321_s25 + $0x18] sm:$0xff] %vm410_vm1, %v4151_v32  ;;  %v4154_v54 = vmul.f32 %v4046_v42, %v6899_v49 }
 0x6bc   : > { %v4042_v12 = vpop.permute.xlu1 %4041 }
 0x6bd   : > { %4186 = vst.msk [vmem:[%s7321_s25 + $0x30] sm:$0xff] %vm410_vm1, %v4154_v54  ;;  %v4153_v52 = vmul.f32 %v4042_v12, %v6868_v62 }
 0x6bf   : > { %4185 = vst.msk [vmem:[%s7321_s25 + $0x28] sm:$0xff] %vm410_vm1, %v4153_v52 }
 0x6c0   : > { %v4050_v10 = vpop.permute.xlu1 %4049 }
 0x6c1   : > { %v4155_v16 = vmul.f32 %v4050_v10, %v6888_v8 }
 0x6c3   : > { %4187 = vst.msk [vmem:[%s7321_s25 + $0x38] sm:$0xff] %vm410_vm1, %v4155_v16 }
 0x6d6   : > { %v4058_v58 = vpop.permute.xlu1 %4057 }
 0x6d7   : > { %v4157_v37 = vmul.f32 %v4058_v58, %v6871_v38 }
 0x6d8   : > { %v4054_v49 = vpop.permute.xlu0 %4053 }
 0x6d9   : > { %4189 = vst.msk [vmem:[%s7321_s25 + $0x48] sm:$0xff] %vm410_vm1, %v4157_v37  ;;  %v4156_v6 = vmul.f32 %v4054_v49, %v6882_v22 }
 0x6da   : > { %v4090_v50 = vpop.permute.xlu1 %4089 }
 0x6db   : > { %4188 = vst.msk [vmem:[%s7321_s25 + $0x40] sm:$0xff] %vm410_vm1, %v4156_v6  ;;  %v4165_v62 = vmul.f32 %v4090_v50, %v6936_v41 }
 0x6dc   : > { %v4086_v7 = vpop.permute.xlu0 %4085 }
 0x6dd   : > { %4197 = vst.msk [vmem:[%s7321_s25 + $0x88] sm:$0xff] %vm410_vm1, %v4165_v62  ;;  %v4164_v8 = vmul.f32 %v4086_v7, %v6941_v3 }
 0x6de   : > { %v4122_v43 = vpop.permute.xlu1 %4121 }
 0x6df   : > { %4196 = vst.msk [vmem:[%s7321_s25 + $0x80] sm:$0xff] %vm410_vm1, %v4164_v8  ;;  %v4173_v38 = vmul.f32 %v4122_v43, %v6956_v5 }
 0x6e0   : > { %v4118_v11 = vpop.permute.xlu0 %4117 }
 0x6e1   : > { %4205 = vst.msk [vmem:[%s7321_s25 + $0xc8] sm:$0xff] %vm410_vm1, %v4173_v38  ;;  %v4172_v22 = vmul.f32 %v4118_v11, %v6966_v63 }
 0x6e3   : > { %4204 = vst.msk [vmem:[%s7321_s25 + $0xc0] sm:$0xff] %vm410_vm1, %v4172_v22 }
 0x6f6   : > { %v4066_v41 = vpop.permute.xlu1 %4065 }
 0x6f7   : > { %v4159_v53 = vmul.f32 %v4066_v41, %v6893_v40 }
 0x6f8   : > { %v4062_v3 = vpop.permute.xlu0 %4061 }
 0x6f9   : > { %4191 = vst.msk [vmem:[%s7321_s25 + $0x58] sm:$0xff] %vm410_vm1, %v4159_v53  ;;  %v4158_v30 = vmul.f32 %v4062_v3, %v6904_v44 }
 0x6fa   : > { %v4098_v35 = vpop.permute.xlu1 %4097 }
 0x6fb   : > { %4190 = vst.msk [vmem:[%s7321_s25 + $0x50] sm:$0xff] %vm410_vm1, %v4158_v30  ;;  %v4167_v5 = vmul.f32 %v4098_v35, %v6946_v57 }
 0x6fc   : > { %v4094_v27 = vpop.permute.xlu0 %4093 }
 0x6fd   : > { %4199 = vst.msk [vmem:[%s7321_s25 + $0x98] sm:$0xff] %vm410_vm1, %v4167_v5  ;;  %v4166_v63 = vmul.f32 %v4094_v27, %v6951_v26 }
 0x6fe   : > { %v4130_v51 = vpop.permute.xlu1 %4129 }
 0x6ff   : > { %4198 = vst.msk [vmem:[%s7321_s25 + $0x90] sm:$0xff] %vm410_vm1, %v4166_v63  ;;  %v4175_v40 = vmul.f32 %v4130_v51, %v6988_v23 }
 0x700   : > { %v4126_v39 = vpop.permute.xlu0 %4125 }
 0x701   : > { %4207 = vst.msk [vmem:[%s7321_s25 + $0xd8] sm:$0xff] %vm410_vm1, %v4175_v40  ;;  %v4174_v44 = vmul.f32 %v4126_v39, %v6993_v46 }
 0x703   : > { %4206 = vst.msk [vmem:[%s7321_s25 + $0xd0] sm:$0xff] %vm410_vm1, %v4174_v44 }
 0x70d   : > { %v4074_v57 = vpop.permute.xlu1 %4073 }
 0x70e   : > { %v4161_v17 = vmul.f32 %v4074_v57, %v6914_v45 }
 0x70f   : > { %v4070_v59 = vpop.permute.xlu0 %4069 }
 0x710   : > { %4193 = vst.msk [vmem:[%s7321_s25 + $0x68] sm:$0xff] %vm410_vm1, %v4161_v17  ;;  %v4160_v26 = vmul.f32 %v4070_v59, %v6919_v9 }
 0x711   : > { %v4106_v23 = vpop.permute.xlu1 %4105 }
 0x712   : > { %4192 = vst.msk [vmem:[%s7321_s25 + $0x60] sm:$0xff] %vm410_vm1, %v4160_v26  ;;  %v4169_v14 = vmul.f32 %v4106_v23, %v6961_v0 }
 0x713   : > { %v4102_v46 = vpop.permute.xlu0 %4101 }
 0x714   : > { %4201 = vst.msk [vmem:[%s7321_s25 + $0xa8] sm:$0xff] %vm410_vm1, %v4169_v14  ;;  %v4168_v47 = vmul.f32 %v4102_v46, %v6971_v31 }
 0x715   : > { %v4138_v45 = vpop.permute.xlu1 %4137 }
 0x716   : > { %4200 = vst.msk [vmem:[%s7321_s25 + $0xa0] sm:$0xff] %vm410_vm1, %v4168_v47  ;;  %v4177_v4 = vmul.f32 %v4138_v45, %v7000_v29 }
 0x717   : > { %v4134_v9 = vpop.permute.xlu0 %4133 }
 0x718   : > { %4209 = vst.msk [vmem:[%s7321_s25 + $0xe8] sm:$0xff] %vm410_vm1, %v4177_v4  ;;  %v4176_v20 = vmul.f32 %v4134_v9, %v7446_v19 }
 0x719   : > { %v4082_v0 = vpop.permute.xlu1 %4081 }
 0x71a   : > { %4208 = vst.msk [vmem:[%s7321_s25 + $0xe0] sm:$0xff] %vm410_vm1, %v4176_v20  ;;  %v4163_v18 = vmul.f32 %v4082_v0, %v7447_v61 }
 0x71c   : > { %4195 = vst.msk [vmem:[%s7321_s25 + $0x78] sm:$0xff] %vm410_vm1, %v4163_v18 }
 0x71d   : > { %v4114_v31 = vpop.permute.xlu1 %4113 }
 0x71e   : > { %v4171_v36 = vmul.f32 %v4114_v31, %v7448_v48 }
 0x720   : > { %4203 = vst.msk [vmem:[%s7321_s25 + $0xb8] sm:$0xff] %vm410_vm1, %v4171_v36 }
 0x721   : > { %v4146_v29 = vpop.permute.xlu1 %4145 }
 0x722   : > { %v4179_v55 = vmul.f32 %v4146_v29, %v7449_v15 }
 0x724   : > { %4211 = vst.msk [vmem:[%s7321_s25 + $0xf8] sm:$0xff] %vm410_vm1, %v4179_v55 }
 0x728   : > { %v4078_v25 = vpop.permute.xlu0 %4077 }
 0x729   : > { %v4162_v34 = vmul.f32 %v4078_v25, %v7450_v24 }
 0x72b   : > { %4194 = vst.msk [vmem:[%s7321_s25 + $0x70] sm:$0xff] %vm410_vm1, %v4162_v34 }
 0x72c   : > { %v4110_v2 = vpop.permute.xlu0 %4109 }
 0x72d   : > { %v4170_v60 = vmul.f32 %v4110_v2, %v7451_v33 }
 0x72f   : > { %4202 = vst.msk [vmem:[%s7321_s25 + $0xb0] sm:$0xff] %vm410_vm1, %v4170_v60 }
 0x730   : > { %v4142_v56 = vpop.permute.xlu0 %4141 }
 0x731   : > { %v4178_v28 = vmul.f32 %v4142_v56, %v7452_v1 }
 0x733   : > { %4210 = vst.msk [vmem:[%s7321_s25 + $0xf0] sm:$0xff] %vm410_vm1, %v4178_v28 }
 0x734 PF: > { %s19_s30 = sadd.s32 1, %s5440_s30  }
 0x735   : > { %p16_p4 = scmp.ge.s32.totalorder %s19_s30, 4  }
 0x737   :  { %18 = sbr.rel (!%p16_p4) target bundleno = 1 (0x1), region = 92 }

</bundles_post_ra>
